<compile_context>
chip_gen: v7x
topology: tpu7x:2x2x1
jax: 0.10.0
libtpu: 0.0.40
codegen_flags: <defaults>
</compile_context>

<pallas_src>
import functools
import math

import jax
import jax.numpy as jnp
from jax import lax
from jax.experimental import pallas as pl
from jax.experimental.pallas import tpu as pltpu

FEAT_DIM = 512    # resnet34 base_model.fc.in_features
HIDDEN = 2048     # Decoder.fc out_features
T_DIM = 3
Q_DIM = 4
HEAD_DIM = 8      # T_DIM + Q_DIM padded with one zero column


def _posenet_kernel(*refs, use_dropout):
    if use_dropout:
        x_ref, w1_ref, b1_ref, wh_ref, bh_ref, mask_ref, out_ref = refs
    else:
        x_ref, w1_ref, b1_ref, wh_ref, bh_ref, out_ref = refs
        mask_ref = None

    # ---- encoder tail: AdaptiveAvgPool2d((1,1)) + flatten -> [TB, C] ----
    # x_ref is [TB, H*W, C] (channels lane-dense); pool = sublane reduction.
    x = x_ref[...].astype(jnp.float32)
    feat = jnp.mean(x, axis=1)                                   # [TB, C]

    # ---- Decoder.fc + ReLU (bf16 MXU inputs, f32 accumulate) ----
    h = jnp.dot(feat.astype(jnp.bfloat16), w1_ref[...],
                preferred_element_type=jnp.float32) + b1_ref[...]
    h = jnp.maximum(h, 0.0)                                      # [TB, HIDDEN]

    # ---- inverted dropout: mask is pre-scaled by 1/(1-p) in the wrapper ----
    if use_dropout:
        h = h * mask_ref[...].astype(jnp.float32)

    # ---- fused heads: [fc_t | fc_q | 0] -> single [TB, 8] matmul ----
    tq = jnp.dot(h.astype(jnp.bfloat16), wh_ref[...],
                 preferred_element_type=jnp.float32) + bh_ref[...]   # [TB, 8]

    # ---- F.normalize(q, p=2, dim=1) applied only to the q columns (3..6) ----
    col = lax.broadcasted_iota(jnp.int32, tq.shape, 1)
    is_q = (col >= T_DIM) & (col < T_DIM + Q_DIM)
    qsq = jnp.where(is_q, tq * tq, 0.0)
    norm = jnp.sqrt(jnp.sum(qsq, axis=1, keepdims=True))
    inv = 1.0 / jnp.maximum(norm, 1e-12)
    out = jnp.where(is_q, tq * inv, tq)

    out_ref[...] = out.astype(out_ref.dtype)


def posenet_forward(x, params, *, seed=0, test_time=False, dropout_rate=0.5,
                    batch_tile=16):
    """x: [B, FEAT_DIM, H, W] layer4 feature map (NCHW). Returns (t [B,3], q [B,4])."""
    B, C, H, W = x.shape
    assert C == FEAT_DIM
    HW = H * W

    # Wrapper-side layout fix: make channels the lane dimension.
    x_r = jnp.transpose(x, (0, 2, 3, 1)).reshape(B, HW, C)

    use_dropout = (not test_time) and dropout_rate > 0.0
    tb = min(batch_tile, B)
    grid = (pl.cdiv(B, tb),)

    in_specs = [
        pl.BlockSpec((tb, HW, C), lambda i: (i, 0, 0)),          # x tile
        pl.BlockSpec((C, HIDDEN), lambda i: (0, 0)),             # W1 (bf16, resident)
        pl.BlockSpec((1, HIDDEN), lambda i: (0, 0)),             # b1
        pl.BlockSpec((HIDDEN, HEAD_DIM), lambda i: (0, 0)),      # fused head weight (bf16)
        pl.BlockSpec((1, HEAD_DIM), lambda i: (0, 0)),           # fused head bias
    ]
    args = [x_r, params["w1"], params["b1"], params["wh"], params["bh"]]

    if use_dropout:
        keep = jax.random.bernoulli(jax.random.PRNGKey(seed),
                                    1.0 - dropout_rate, (B, HIDDEN))
        mask = keep.astype(jnp.float32) * (1.0 / (1.0 - dropout_rate))
        in_specs.append(pl.BlockSpec((tb, HIDDEN), lambda i: (i, 0)))
        args.append(mask)

    out = pl.pallas_call(
        functools.partial(_posenet_kernel, use_dropout=use_dropout),
        grid=grid,
        in_specs=in_specs,
        out_specs=pl.BlockSpec((tb, HEAD_DIM), lambda i: (i, 0)),
        out_shape=jax.ShapeDtypeStruct((B, HEAD_DIM), jnp.float32),
        compiler_params=pltpu.CompilerParams(
            # batch tiles are independent -> shard across TensorCores (v7x).
            dimension_semantics=("parallel",),
        ),
    )(*args)

    t = out[:, :T_DIM]
    q = out[:, T_DIM:T_DIM + Q_DIM]
    return t, q


def init_decoder_params(key):
    """Deterministic kaiming_normal_ (fan_in, gain=sqrt(2)) weights, zero biases.

    Weights are stored [in, out] (PyTorch Linear weight transposed); fc_t and
    fc_q are fused into one [HIDDEN, 8] matrix (7 real columns + 1 zero pad).
    Matmul weights are kept in bf16 (f32 accumulation in-kernel).
    """
    k1, k2, k3 = jax.random.split(key, 3)

    def kaiming(k, out_f, in_f):
        std = math.sqrt(2.0 / in_f)
        w_torch = jax.random.normal(k, (out_f, in_f), jnp.float32) * std  # [out, in]
        return w_torch.T                                                  # stored [in, out]

    wt = kaiming(k2, T_DIM, HIDDEN)
    wq = kaiming(k3, Q_DIM, HIDDEN)
    wh = jnp.concatenate(
        [wt, wq, jnp.zeros((HIDDEN, HEAD_DIM - T_DIM - Q_DIM), jnp.float32)],
        axis=1)

    return {
        "w1": kaiming(k1, HIDDEN, FEAT_DIM).astype(jnp.bfloat16),
        "b1": jnp.zeros((1, HIDDEN), jnp.float32),
        "wh": wh.astype(jnp.bfloat16),
        "bh": jnp.zeros((1, HEAD_DIM), jnp.float32),
    }


if __name__ == "__main__":
    root = jax.random.PRNGKey(0)
    k_x, k_p = jax.random.split(root)

    # layer4 feature map for a 128x128 input image: [B=2, 512, 4, 4].
    x = jax.random.normal(k_x, (2, FEAT_DIM, 4, 4), jnp.float32)
    params = init_decoder_params(k_p)

    t, q = posenet_forward(x, params, seed=0, test_time=False, dropout_rate=0.5)
    t = jax.block_until_ready(t)
    q = jax.block_until_ready(q)

    assert t.shape == (2, T_DIM) and q.shape == (2, Q_DIM)
    # q rows must be unit-norm after F.normalize
    assert bool(jnp.all(jnp.abs(jnp.linalg.norm(q, axis=1) - 1.0) < 1e-3))
    print("KERNEL_OK")
</pallas_src>

<mosaic_0001>
module attributes {stable_mosaic.version = 11 : i64} {
  func.func @_posenet_kernel(%arg0: i32, %arg1: memref<2x16x512xf32, #tpu.memory_space<vmem>>, %arg2: memref<512x2048xbf16, #tpu.memory_space<vmem>>, %arg3: memref<1x2048xf32, #tpu.memory_space<vmem>>, %arg4: memref<2048x8xbf16, #tpu.memory_space<vmem>>, %arg5: memref<1x8xf32, #tpu.memory_space<vmem>>, %arg6: memref<2x2048xf32, #tpu.memory_space<vmem>>, %arg7: memref<2x8xf32, #tpu.memory_space<vmem>>) attributes {dimension_semantics = [#tpu.dimension_semantics<parallel>], iteration_bounds = array<i64: 1>, scalar_prefetch = 0 : i64, scratch_operands = 0 : i64, tpu.core_type = #tpu.core_type<tc>, window_params = [{transform_indices = @transform_0, window_bounds = array<i64: 2, 16, 512>}, {pipeline_mode = #tpu.pipeline_mode<synchronous>, transform_indices = @transform_1, window_bounds = array<i64: 512, 2048>}, {pipeline_mode = #tpu.pipeline_mode<synchronous>, transform_indices = @transform_2, window_bounds = array<i64: 1, 2048>}, {pipeline_mode = #tpu.pipeline_mode<synchronous>, transform_indices = @transform_3, window_bounds = array<i64: 2048, 8>}, {pipeline_mode = #tpu.pipeline_mode<synchronous>, transform_indices = @transform_4, window_bounds = array<i64: 1, 8>}, {transform_indices = @transform_5, window_bounds = array<i64: 2, 2048>}, {transform_indices = @transform_6, window_bounds = array<i64: 2, 8>}]} {
    %c0 = arith.constant 0 : index
    %c0_0 = arith.constant 0 : index
    %c0_1 = arith.constant 0 : index
    %0 = vector.load %arg1[%c0, %c0_0, %c0_1] : memref<2x16x512xf32, #tpu.memory_space<vmem>>, vector<2x16x512xf32>
    %cst = arith.constant dense<0.000000e+00> : vector<2x512xf32>
    %1 = vector.multi_reduction <add>, %0, %cst [1] : vector<2x16x512xf32> to vector<2x512xf32>
    %cst_2 = arith.constant 1.600000e+01 : f32
    %2 = vector.broadcast %cst_2 : f32 to vector<2x512xf32>
    %3 = arith.divf %1, %2 : vector<2x512xf32>
    %4 = arith.truncf %3 : vector<2x512xf32> to vector<2x512xbf16>
    %c0_3 = arith.constant 0 : index
    %c0_4 = arith.constant 0 : index
    %5 = vector.load %arg2[%c0_3, %c0_4] : memref<512x2048xbf16, #tpu.memory_space<vmem>>, vector<512x2048xbf16>
    %cst_5 = arith.constant dense<0.000000e+00> : vector<2x2048xf32>
    %6 = tpu.matmul %4, %5, %cst_5 {dimension_numbers = #tpu.dot_dimension_numbers<[1], [0], [0], [1], [0, 0, 1, 1], [], []>} : vector<2x512xbf16>, vector<512x2048xbf16>, vector<2x2048xf32> -> vector<2x2048xf32>
    %c0_6 = arith.constant 0 : index
    %c0_7 = arith.constant 0 : index
    %7 = vector.load %arg3[%c0_6, %c0_7] : memref<1x2048xf32, #tpu.memory_space<vmem>>, vector<1x2048xf32>
    %8 = vector.broadcast %7 : vector<1x2048xf32> to vector<2x2048xf32>
    %9 = arith.addf %6, %8 : vector<2x2048xf32>
    %cst_8 = arith.constant 0.000000e+00 : f32
    %10 = vector.broadcast %cst_8 : f32 to vector<2x2048xf32>
    %11 = arith.maximumf %9, %10 : vector<2x2048xf32>
    %c0_9 = arith.constant 0 : index
    %c0_10 = arith.constant 0 : index
    %12 = vector.load %arg6[%c0_9, %c0_10] : memref<2x2048xf32, #tpu.memory_space<vmem>>, vector<2x2048xf32>
    %13 = arith.mulf %11, %12 : vector<2x2048xf32>
    %14 = arith.truncf %13 : vector<2x2048xf32> to vector<2x2048xbf16>
    %c0_11 = arith.constant 0 : index
    %c0_12 = arith.constant 0 : index
    %15 = vector.load %arg4[%c0_11, %c0_12] : memref<2048x8xbf16, #tpu.memory_space<vmem>>, vector<2048x8xbf16>
    %cst_13 = arith.constant dense<0.000000e+00> : vector<2x8xf32>
    %16 = tpu.matmul %14, %15, %cst_13 {dimension_numbers = #tpu.dot_dimension_numbers<[1], [0], [0], [1], [0, 0, 1, 1], [], []>} : vector<2x2048xbf16>, vector<2048x8xbf16>, vector<2x8xf32> -> vector<2x8xf32>
    %c0_14 = arith.constant 0 : index
    %c0_15 = arith.constant 0 : index
    %17 = vector.load %arg5[%c0_14, %c0_15] : memref<1x8xf32, #tpu.memory_space<vmem>>, vector<1x8xf32>
    %18 = vector.broadcast %17 : vector<1x8xf32> to vector<2x8xf32>
    %19 = arith.addf %16, %18 : vector<2x8xf32>
    %20 = tpu.iota {dimensions = array<i32: 1>} : vector<2x8xi32>
    %c3_i32 = arith.constant 3 : i32
    %21 = vector.broadcast %c3_i32 : i32 to vector<2x8xi32>
    %22 = arith.cmpi sge, %20, %21 : vector<2x8xi32>
    %c7_i32 = arith.constant 7 : i32
    %23 = vector.broadcast %c7_i32 : i32 to vector<2x8xi32>
    %24 = arith.cmpi slt, %20, %23 : vector<2x8xi32>
    %25 = arith.andi %22, %24 : vector<2x8xi1>
    %26 = arith.mulf %19, %19 : vector<2x8xf32>
    %cst_16 = arith.constant 0.000000e+00 : f32
    %27 = vector.broadcast %cst_16 : f32 to vector<2x8xf32>
    %28 = arith.select %25, %26, %27 : vector<2x8xi1>, vector<2x8xf32>
    %cst_17 = arith.constant dense<0.000000e+00> : vector<2xf32>
    %29 = vector.multi_reduction <add>, %28, %cst_17 [1] : vector<2x8xf32> to vector<2xf32>
    %30 = vector.shape_cast %29 : vector<2xf32> to vector<2x1xf32>
    %31 = math.sqrt %30 : vector<2x1xf32>
    %cst_18 = arith.constant 9.99999996E-13 : f32
    %32 = vector.broadcast %cst_18 : f32 to vector<2x1xf32>
    %33 = arith.maximumf %31, %32 : vector<2x1xf32>
    %cst_19 = arith.constant 1.000000e+00 : f32
    %34 = vector.broadcast %cst_19 : f32 to vector<2x1xf32>
    %35 = arith.divf %34, %33 : vector<2x1xf32>
    %36 = vector.broadcast %35 : vector<2x1xf32> to vector<2x8xf32>
    %37 = arith.mulf %19, %36 : vector<2x8xf32>
    %38 = arith.select %25, %37, %19 : vector<2x8xi1>, vector<2x8xf32>
    %c0_20 = arith.constant 0 : index
    %c0_21 = arith.constant 0 : index
    %39 = vector.load %arg7[%c0_20, %c0_21] : memref<2x8xf32, #tpu.memory_space<vmem>>, vector<2x8xf32>
    tpu.vector_store %arg7[%c0_20, %c0_21], %38 {strides = array<i32>} : memref<2x8xf32, #tpu.memory_space<vmem>>, vector<2x8xf32>,
    return
  }
  func.func @transform_0(%arg0: i32) -> (i32, i32, i32) {
    %c0_i32 = arith.constant 0 : i32
    %c0_i32_0 = arith.constant 0 : i32
    %c0_i32_1 = arith.constant 0 : i32
    return %arg0, %c0_i32, %c0_i32_0 : i32, i32, i32
  }
  func.func @transform_1(%arg0: i32) -> (i32, i32) {
    %c0_i32 = arith.constant 0 : i32
    %c0_i32_0 = arith.constant 0 : i32
    %c0_i32_1 = arith.constant 0 : i32
    return %c0_i32, %c0_i32_0 : i32, i32
  }
  func.func @transform_2(%arg0: i32) -> (i32, i32) {
    %c0_i32 = arith.constant 0 : i32
    %c0_i32_0 = arith.constant 0 : i32
    %c0_i32_1 = arith.constant 0 : i32
    return %c0_i32, %c0_i32_0 : i32, i32
  }
  func.func @transform_3(%arg0: i32) -> (i32, i32) {
    %c0_i32 = arith.constant 0 : i32
    %c0_i32_0 = arith.constant 0 : i32
    %c0_i32_1 = arith.constant 0 : i32
    return %c0_i32, %c0_i32_0 : i32, i32
  }
  func.func @transform_4(%arg0: i32) -> (i32, i32) {
    %c0_i32 = arith.constant 0 : i32
    %c0_i32_0 = arith.constant 0 : i32
    %c0_i32_1 = arith.constant 0 : i32
    return %c0_i32, %c0_i32_0 : i32, i32
  }
  func.func @transform_5(%arg0: i32) -> (i32, i32) {
    %c0_i32 = arith.constant 0 : i32
    %c0_i32_0 = arith.constant 0 : i32
    return %arg0, %c0_i32 : i32, i32
  }
  func.func @transform_6(%arg0: i32) -> (i32, i32) {
    %c0_i32 = arith.constant 0 : i32
    %c0_i32_0 = arith.constant 0 : i32
    return %arg0, %c0_i32 : i32, i32
  }
}

</mosaic_0001>

<bundles_post_ra>
// kernel: tpu_custom_call.1
= control target key start
LH: loop header
LB: loop body
LE: loop exit
PB: predicated region body
PF: predicated region fallthrough
CT: control target
= control target key end

     0   :  { %11 = vsyncpa [#allocation3], 0  ;;  %s7376_s0 = inlined_call_operand.hbm [shape: f32[2,16,512], index: 0, kind: input, shape index: {}]   ;;  %s7377_s1 = inlined_call_operand.hbm [shape: bf16[512,2048], index: 1, kind: input, shape index: {}]   ;;  %s7378_s2 = inlined_call_operand.hbm [shape: f32[1,2048], index: 2, kind: input, shape index: {}]   ;;  %s7379_s3 = inlined_call_operand.vmem [shape: bf16[2048,8], index: 3, kind: input, shape index: {}]   ;;  %s7380_s4 = inlined_call_operand.hbm [shape: f32[1,8], index: 4, kind: input, shape index: {}]   ;;  %s7381_s5 = inlined_call_operand.hbm [shape: f32[2,2048], index: 5, kind: input, shape index: {}]   ;;  %s7382_s6 = inlined_call_operand.hbm [shape: f32[2,8], index: 6, kind: output, shape index: {}]  }
   0x1   :  { %12 = vsyncpa [#allocation6], 0 }
   0x2   :  { %13 = vsyncpa [#allocation9], 0 }
   0x3   :  { %14 = vsyncpa [#allocation4], 0  ;;  %s6701_s21 = smov [#allocation5]   ;;  %s6561_s25 = scalar_lea.hbm %s7377_s1, 65536 }
   0x4   :  { %s32_s22 = sshll.u32 %s6701_s21, 4  ;;  %p6562_p0 = scmp.ne.s32.totalorder %s7377_s1, %s6561_s25  ;;  %s33_s22 = int_to_ptr.vmem [resolvable:$true] %s32_s22 }
   0x5   :  { %p6565_p1 = scmp.lt.u32.totalorder %s6561_s25, %s7377_s1 }
   0x7   :  { %p6567_p2 = pnand %p6565_p1, %p6562_p0 }
   0x9   :  { %6570 = shalt.err (!%p6567_p2)
}
   0xa   :  { %s6571_s30 = scalar_lea.vmem %s33_s22, 65536  ;;  %p6576_p4 = scmp.lt.s32.totalorder %s33_s22, %s33_s22 }
   0xb   :  { %p6572_p3 = scmp.ne.s32.totalorder %s33_s22, %s6571_s30  ;;  %p6577_p5 = scmp.lt.s32.totalorder %s6571_s30, %s6571_s30 }
   0xd   :  { %p6578_p6 = por %p6577_p5, %p6576_p4 }
   0xf   :  { %p6579_p7 = pnand %p6578_p6, %p6572_p3 }
  0x11   :  { %6582 = shalt.err (!%p6579_p7)
}
  0x12   :  { %s6702_s7 = smov 1024   ;;  %s6703_s8 = smov 64  }
  0x13   :  { %38 = dma.hbm_to_vmem [thread:$0]  %s7377_s1, 65536, %s33_s22, [#allocation6], %s6702_s7, %s6702_s7, %s6703_s8  }
  0x14   :  { %s6704_s11 = smov [#allocation8]   ;;  %s6705_s13 = smov [#allocation2]  }
  0x15   :  { %s57_s12 = sshll.u32 %s6704_s11, 4  ;;  %s20_s14 = sshll.u32 %s6705_s13, 4  ;;  %s58_s12 = int_to_ptr.vmem [resolvable:$true] %s57_s12  ;;  %s21_s14 = int_to_ptr.vmem [resolvable:$true] %s20_s14 }
  0x16   :  { %s6583_s17 = scalar_lea.hbm %s7380_s4, 16 }
  0x17   :  { %p6584_p8 = scmp.ne.s32.totalorder %s7380_s4, %s6583_s17  ;;  %p6587_p9 = scmp.lt.u32.totalorder %s6583_s17, %s7380_s4 }
  0x19   :  { %p6589_p10 = pnand %p6587_p9, %p6584_p8 }
  0x1b   :  { %6592 = shalt.err (!%p6589_p10)
}
  0x1c   :  { %s6593_s1 = scalar_lea.vmem %s58_s12, 16  ;;  %s6597_s22 = scalar_lea.vmem %s58_s12, 32 }
  0x1d   :  { %p6594_p11 = scmp.ne.s32.totalorder %s58_s12, %s6593_s1  ;;  %p6598_p12 = scmp.lt.s32.totalorder %s58_s12, %s58_s12 }
  0x1e   :  { %p6599_p13 = scmp.lt.s32.totalorder %s6597_s22, %s6593_s1 }
  0x20   :  { %p6600_p0 = por %p6599_p13, %p6598_p12 }
  0x22   :  { %p6601_p1 = pnand %p6600_p0, %p6594_p11 }
  0x24   :  { %6604 = shalt.err (!%p6601_p1)
}
  0x25   :  { %60 = dma.hbm_to_vmem [thread:$0]  %s7380_s4, 16, %s58_s12, [#allocation9]  }
  0x26   :  { %s6605_s27 = scalar_lea.hbm %s7376_s0, 2048 }
  0x27   :  { %p6606_p2 = scmp.ne.s32.totalorder %s7376_s0, %s6605_s27  ;;  %p6609_p3 = scmp.lt.u32.totalorder %s6605_s27, %s7376_s0 }
  0x29   :  { %p6611_p4 = pnand %p6609_p3, %p6606_p2 }
  0x2b   :  { %6614 = shalt.err (!%p6611_p4)
}
  0x2c   :  { %s6615_s8 = scalar_lea.vmem %s21_s14, 2048  ;;  %p6620_p6 = scmp.lt.s32.totalorder %s21_s14, %s21_s14 }
  0x2d   :  { %p6616_p5 = scmp.ne.s32.totalorder %s21_s14, %s6615_s8  ;;  %p6621_p7 = scmp.lt.s32.totalorder %s6615_s8, %s6615_s8 }
  0x2f   :  { %p6622_p8 = por %p6621_p7, %p6620_p6 }
  0x31   :  { %p6623_p9 = pnand %p6622_p8, %p6616_p5 }
  0x33   :  { %6626 = shalt.err (!%p6623_p9)
}
  0x34   :  { %s6706_s4 = smov 512   ;;  %s6707_s9 = smov 32  }
  0x35   :  { %26 = dma.hbm_to_vmem [thread:$0]  %s7376_s0, 2048, %s21_s14, [#allocation3], %s6706_s4, %s6706_s4, %s6707_s9  }
  0x36   :  { %s6708_s12 = smov [#allocation7]   ;;  %s6709_s15 = smov [#allocation10]  }
  0x37   :  { %s45_s13 = sshll.u32 %s6708_s12, 4  ;;  %s67_s16 = sshll.u32 %s6709_s15, 4  ;;  %s46_s13 = int_to_ptr.vmem [resolvable:$true] %s45_s13  ;;  %s68_s16 = int_to_ptr.vmem [resolvable:$true] %s67_s16 }
  0x38   :  { %s6627_s19 = scalar_lea.hbm %s7378_s2, 256 }
  0x39   :  { %p6628_p10 = scmp.ne.s32.totalorder %s7378_s2, %s6627_s19  ;;  %p6631_p11 = scmp.lt.u32.totalorder %s6627_s19, %s7378_s2 }
  0x3b   :  { %p6633_p12 = pnand %p6631_p11, %p6628_p10 }
  0x3d   :  { %6636 = shalt.err (!%p6633_p12)
}
  0x3e   :  { %s6637_s0 = scalar_lea.vmem %s46_s13, 256  ;;  %p6642_p0 = scmp.lt.s32.totalorder %s46_s13, %s46_s13 }
  0x3f   :  { %p6638_p13 = scmp.ne.s32.totalorder %s46_s13, %s6637_s0  ;;  %p6643_p1 = scmp.lt.s32.totalorder %s6637_s0, %s6637_s0 }
  0x41   :  { %p6644_p2 = por %p6643_p1, %p6642_p0 }
  0x43   :  { %p6645_p3 = pnand %p6644_p2, %p6638_p13 }
  0x45   :  { %6648 = shalt.err (!%p6645_p3)
}
  0x46   :  { %48 = dma.hbm_to_vmem [thread:$0]  %s7378_s2, 256, %s46_s13, [#allocation6]  }
  0x47   :  { %s6649_s26 = scalar_lea.hbm %s7381_s5, 512 }
  0x48   :  { %p6650_p4 = scmp.ne.s32.totalorder %s7381_s5, %s6649_s26  ;;  %p6653_p5 = scmp.lt.u32.totalorder %s6649_s26, %s7381_s5 }
  0x4a   :  { %p6655_p6 = pnand %p6653_p5, %p6650_p4 }
  0x4c   :  { %6658 = shalt.err (!%p6655_p6)
}
  0x4d   :  { %s6659_s7 = scalar_lea.vmem %s68_s16, 512  ;;  %p6664_p8 = scmp.lt.s32.totalorder %s68_s16, %s68_s16 }
  0x4e   :  { %p6660_p7 = scmp.ne.s32.totalorder %s68_s16, %s6659_s7  ;;  %p6665_p9 = scmp.lt.s32.totalorder %s6659_s7, %s6659_s7 }
  0x50   :  { %p6666_p10 = por %p6665_p9, %p6664_p8 }
  0x52   :  { %p6667_p11 = pnand %p6666_p10, %p6660_p7 }
  0x54   :  { %6670 = shalt.err (!%p6667_p11)
}
  0x55   :  { %70 = dma.hbm_to_vmem [thread:$0]  %s7381_s5, 512, %s68_s16, [#allocation9]  }
  0x56   :  { %6693 = dma.done.wait [#allocation3], 2048  }
  0x57   :  { %6694 = vsyncadd [#allocation3], 4294965248 }
  0x58   :  { %6695 = dma.done.wait [#allocation6], 65792  }
  0x59   :  { %6696 = vsyncadd [#allocation6], 4294901504 }
  0x5a   :  { %6697 = dma.done.wait [#allocation9], 528  }
  0x5b   :  { %6698 = vsyncadd [#allocation9], 4294966768  ;;  %v176_v0 = vld [vmem:[#allocation5] sm:$0xff]  ;;  %v177_v2 = vld [vmem:[#allocation5 + $0x8] sm:$0xff]  ;;  %vm788_vm0 = vcmask 1041409   ;;  %vm5515_vm4 = vcmask 58368  }
  0x5c   :  { %v184_v1 = vld [vmem:[#allocation5 + $0x40] sm:$0xff]  ;;  %v185_v4 = vld [vmem:[#allocation5 + $0x48] sm:$0xff] }
  0x5d   :  { %v5550_v3 = vcombine.high %v176_v0, %v184_v1  ;;  %v5549_v5 = vcombine.low %v176_v0, %v184_v1  ;;  %v192_v6 = vld [vmem:[#allocation5 + $0x80] sm:$0xff]  ;;  %v5552_v8 = vcombine.high %v177_v2, %v185_v4  ;;  %v5551_v9 = vcombine.low %v177_v2, %v185_v4  ;;  %v193_v11 = vld [vmem:[#allocation5 + $0x88] sm:$0xff] }
  0x5e   :  { %v200_v7 = vld [vmem:[#allocation5 + $0xc0] sm:$0xff]  ;;  %v201_v12 = vld [vmem:[#allocation5 + $0xc8] sm:$0xff] }
  0x5f   :  { %v5566_v10 = vcombine.high %v192_v6, %v200_v7  ;;  %v208_v13 = vld [vmem:[#allocation5 + $0x100] sm:$0xff]  ;;  %3361 = vmatprep.subr.bf16.mxu0 %v5550_v3  ;;  %v5568_v14 = vcombine.high %v193_v11, %v201_v12  ;;  %v209_v16 = vld [vmem:[#allocation5 + $0x108] sm:$0xff]  ;;  %3443 = vmatprep.subr.bf16.mxu1 %v5552_v8  ;;  %v5565_v18 = vcombine.low %v192_v6, %v200_v7 }
  0x60   :  { %v216_v15 = vld [vmem:[#allocation5 + $0x140] sm:$0xff]  ;;  %v217_v17 = vld [vmem:[#allocation5 + $0x148] sm:$0xff]  ;;  %3362 = vmatpush1.bf16.msra.mxu0 %v5549_v5  ;;  %3444 = vmatpush1.bf16.msra.mxu1 %v5551_v9  ;;  %v5567_v19 = vcombine.low %v193_v11, %v201_v12 }
  0x61   :  { %3363 = vmatprep.subr.bf16.mxu0 %v5566_v10  ;;  %v5582_v20 = vcombine.high %v208_v13, %v216_v15  ;;  %3445 = vmatprep.subr.bf16.mxu1 %v5568_v14  ;;  %v5584_v21 = vcombine.high %v209_v16, %v217_v17  ;;  %v224_v22 = vld [vmem:[#allocation5 + $0x180] sm:$0xff]  ;;  %v225_v24 = vld [vmem:[#allocation5 + $0x188] sm:$0xff]  ;;  %v5581_v26 = vcombine.low %v208_v13, %v216_v15 }
  0x62   :  { %v232_v23 = vld [vmem:[#allocation5 + $0x1c0] sm:$0xff]  ;;  %v233_v25 = vld [vmem:[#allocation5 + $0x1c8] sm:$0xff]  ;;  %v5583_v27 = vcombine.low %v209_v16, %v217_v17 }
  0x63   :  { %v5598_v28 = vcombine.high %v224_v22, %v232_v23  ;;  %v5600_v29 = vcombine.high %v225_v24, %v233_v25  ;;  %v240_v30 = vld [vmem:[#allocation5 + $0x200] sm:$0xff]  ;;  %v241_v32 = vld [vmem:[#allocation5 + $0x208] sm:$0xff]  ;;  %v5597_v34 = vcombine.low %v224_v22, %v232_v23  ;;  %v5599_v35 = vcombine.low %v225_v24, %v233_v25 }
  0x64   :  { %3364 = vmatpush1.bf16.msra.mxu0 %v5565_v18  ;;  %3446 = vmatpush1.bf16.msra.mxu1 %v5567_v19  ;;  %v248_v31 = vld [vmem:[#allocation5 + $0x240] sm:$0xff]  ;;  %v249_v33 = vld [vmem:[#allocation5 + $0x248] sm:$0xff] }
  0x65   :  { %3365 = vmatprep.subr.bf16.mxu0 %v5582_v20  ;;  %3447 = vmatprep.subr.bf16.mxu1 %v5584_v21  ;;  %v5614_v36 = vcombine.high %v240_v30, %v248_v31  ;;  %v5616_v37 = vcombine.high %v241_v32, %v249_v33  ;;  %v256_v38 = vld [vmem:[#allocation5 + $0x280] sm:$0xff]  ;;  %v257_v40 = vld [vmem:[#allocation5 + $0x288] sm:$0xff]  ;;  %v5613_v42 = vcombine.low %v240_v30, %v248_v31 }
  0x66   :  { %v264_v39 = vld [vmem:[#allocation5 + $0x2c0] sm:$0xff]  ;;  %v265_v41 = vld [vmem:[#allocation5 + $0x2c8] sm:$0xff]  ;;  %v5615_v43 = vcombine.low %v241_v32, %v249_v33 }
  0x67   :  { %v5630_v44 = vcombine.high %v256_v38, %v264_v39  ;;  %v5632_v45 = vcombine.high %v257_v40, %v265_v41  ;;  %v272_v46 = vld [vmem:[#allocation5 + $0x300] sm:$0xff]  ;;  %v273_v48 = vld [vmem:[#allocation5 + $0x308] sm:$0xff]  ;;  %v5629_v50 = vcombine.low %v256_v38, %v264_v39  ;;  %v5631_v51 = vcombine.low %v257_v40, %v265_v41 }
  0x68   :  { %3366 = vmatpush1.bf16.msra.mxu0 %v5581_v26  ;;  %3448 = vmatpush1.bf16.msra.mxu1 %v5583_v27  ;;  %v280_v47 = vld [vmem:[#allocation5 + $0x340] sm:$0xff]  ;;  %v281_v49 = vld [vmem:[#allocation5 + $0x348] sm:$0xff] }
  0x69   :  { %3367 = vmatprep.subr.bf16.mxu0 %v5598_v28  ;;  %3449 = vmatprep.subr.bf16.mxu1 %v5600_v29  ;;  %v5646_v52 = vcombine.high %v272_v46, %v280_v47  ;;  %v288_v53 = vld [vmem:[#allocation5 + $0x380] sm:$0xff]  ;;  %v88_v54 = vld [vmem:[#allocation2 + $0x8] sm:$0xff]  ;;  %v5648_v56 = vcombine.high %v273_v48, %v281_v49  ;;  %v5645_v0 = vcombine.low %v272_v46, %v280_v47 }
  0x6a   :  { %v92_v55 = vld [vmem:[#allocation2 + $0x28] sm:$0xff]  ;;  %v296_v57 = vld [vmem:[#allocation5 + $0x3c0] sm:$0xff]  ;;  %v5647_v5 = vcombine.low %v273_v48, %v281_v49 }
  0x6b   :  { %v96_v58 = vld [vmem:[#allocation2 + $0x48] sm:$0xff]  ;;  %v110_v60 = vadd.f32 %v92_v55, %v88_v54  ;;  %v87_v2 = vld [vmem:[#allocation2] sm:$0xff]  ;;  %v5662_v6 = vcombine.high %v288_v53, %v296_v57  ;;  %v5661_v19 = vcombine.low %v288_v53, %v296_v57 }
  0x6c   :  { %3368 = vmatpush1.bf16.msra.mxu0 %v5597_v34  ;;  %3450 = vmatpush1.bf16.msra.mxu1 %v5599_v35  ;;  %v100_v59 = vld [vmem:[#allocation2 + $0x68] sm:$0xff]  ;;  %v91_v3 = vld [vmem:[#allocation2 + $0x20] sm:$0xff] }
  0x6d   :  { %3369 = vmatprep.subr.bf16.mxu0 %v5614_v36  ;;  %3451 = vmatprep.subr.bf16.mxu1 %v5616_v37  ;;  %v289_v61 = vld [vmem:[#allocation5 + $0x388] sm:$0xff]  ;;  %v138_v63 = vadd.f32 %v100_v59, %v96_v58  ;;  %v111_v1 = vrot.slane %v110_v60, 4  ;;  %v95_v4 = vld [vmem:[#allocation2 + $0x40] sm:$0xff]  ;;  %v103_v9 = vadd.f32 %v91_v3, %v87_v2 }
  0x6e   :  { %v297_v62 = vld [vmem:[#allocation5 + $0x3c8] sm:$0xff]  ;;  %v99_v8 = vld [vmem:[#allocation2 + $0x60] sm:$0xff] }
  0x6f   :  { %v139_v7 = vrot.slane %v138_v63, 4  ;;  %v5664_v10 = vcombine.high %v289_v61, %v297_v62  ;;  %v304_v11 = vld [vmem:[#allocation5 + $0x400] sm:$0xff]  ;;  %v112_v13 = vadd.f32 %v111_v1, %v110_v60  ;;  %v131_v14 = vadd.f32 %v99_v8, %v95_v4  ;;  %v305_v15 = vld [vmem:[#allocation5 + $0x408] sm:$0xff] }
  0x70   :  { %3370 = vmatpush1.bf16.msra.mxu0 %v5613_v42  ;;  %3452 = vmatpush1.bf16.msra.mxu1 %v5615_v43  ;;  %v312_v12 = vld [vmem:[#allocation5 + $0x440] sm:$0xff]  ;;  %v313_v16 = vld [vmem:[#allocation5 + $0x448] sm:$0xff]  ;;  %v104_v18 = vrot.slane %v103_v9, 4  ;;  %v5663_v22 = vcombine.low %v289_v61, %v297_v62 }
  0x71   :  { %3371 = vmatprep.subr.bf16.mxu0 %v5630_v44  ;;  %3453 = vmatprep.subr.bf16.mxu1 %v5632_v45  ;;  %v140_v17 = vadd.f32 %v139_v7, %v138_v63  ;;  %v113_v20 = vrot.slane %v112_v13, 2  ;;  %v132_v21 = vrot.slane %v131_v14, 4  ;;  %v5678_v23 = vcombine.high %v304_v11, %v312_v12  ;;  %v320_v27 = vld [vmem:[#allocation5 + $0x480] sm:$0xff]  ;;  %v321_v31 = vld [vmem:[#allocation5 + $0x488] sm:$0xff] }
  0x72   :  { %v105_v25 = vadd.f32 %v104_v18, %v103_v9  ;;  %v5680_v26 = vcombine.high %v305_v15, %v313_v16  ;;  %v328_v28 = vld [vmem:[#allocation5 + $0x4c0] sm:$0xff]  ;;  %v329_v32 = vld [vmem:[#allocation5 + $0x4c8] sm:$0xff]  ;;  %v5677_v34 = vcombine.low %v304_v11, %v312_v12  ;;  %v5679_v38 = vcombine.low %v305_v15, %v313_v16 }
  0x73   :  { %v141_v24 = vrot.slane %v140_v17, 2  ;;  %v114_v29 = vadd.f32 %v113_v20, %v112_v13  ;;  %v133_v30 = vadd.f32 %v132_v21, %v131_v14  ;;  %v5694_v39 = vcombine.high %v320_v27, %v328_v28  ;;  %v336_v42 = vld [vmem:[#allocation5 + $0x500] sm:$0xff]  ;;  %v337_v45 = vld [vmem:[#allocation5 + $0x508] sm:$0xff] }
  0x74   :  { %3372 = vmatpush1.bf16.msra.mxu0 %v5629_v50  ;;  %3454 = vmatpush1.bf16.msra.mxu1 %v5631_v51  ;;  %v106_v36 = vrot.slane %v105_v25, 2  ;;  %v5696_v41 = vcombine.high %v321_v31, %v329_v32  ;;  %v344_v43 = vld [vmem:[#allocation5 + $0x540] sm:$0xff]  ;;  %v345_v46 = vld [vmem:[#allocation5 + $0x548] sm:$0xff]  ;;  %v5693_v48 = vcombine.low %v320_v27, %v328_v28  ;;  %v98_v27 = vld [vmem:[#allocation2 + $0x58] sm:$0xff] }
  0x75   :  { %3373 = vmatprep.subr.bf16.mxu0 %v5646_v52  ;;  %3455 = vmatprep.subr.bf16.mxu1 %v5648_v56  ;;  %v142_v33 = vadd.f32 %v141_v24, %v140_v17  ;;  %v115_v35 = vrot.slane %v114_v29, 1  ;;  %v134_v37 = vrot.slane %v133_v30, 2  ;;  %v5695_v52 = vcombine.low %v321_v31, %v329_v32  ;;  %v352_v56 = vld [vmem:[#allocation5 + $0x580] sm:$0xff]  ;;  %v353_v59 = vld [vmem:[#allocation5 + $0x588] sm:$0xff]  ;;  %v102_v28 = vld [vmem:[#allocation2 + $0x78] sm:$0xff] }
  0x76   :  { %v107_v50 = vadd.f32 %v106_v36, %v105_v25  ;;  %v5710_v53 = vcombine.high %v336_v42, %v344_v43  ;;  %v5712_v55 = vcombine.high %v337_v45, %v345_v46  ;;  %v360_v57 = vld [vmem:[#allocation5 + $0x5c0] sm:$0xff]  ;;  %v361_v60 = vld [vmem:[#allocation5 + $0x5c8] sm:$0xff]  ;;  %v5709_v62 = vcombine.low %v336_v42, %v344_v43 }
  0x77   :  { %v143_v40 = vrot.slane %v142_v33, 1  ;;  %v116_v44 = vadd.f32 %v115_v35, %v114_v29  ;;  %v135_v51 = vadd.f32 %v134_v37, %v133_v30  ;;  %v5711_v2 = vcombine.low %v337_v45, %v345_v46  ;;  %v376_v7 = vld [vmem:[#allocation5 + $0x640] sm:$0xff]  ;;  %v369_v8 = vld [vmem:[#allocation5 + $0x608] sm:$0xff] }
  0x78   :  { %3374 = vmatpush1.bf16.msra.mxu0 %v5645_v0  ;;  %3456 = vmatpush1.bf16.msra.mxu1 %v5647_v5  ;;  %v108_v0 = vrot.slane %v107_v50, 1  ;;  %v5726_v3 = vcombine.high %v352_v56, %v360_v57  ;;  %v5728_v5 = vcombine.high %v353_v59, %v361_v60  ;;  %v377_v9 = vld [vmem:[#allocation5 + $0x648] sm:$0xff]  ;;  %v5725_v11 = vcombine.low %v352_v56, %v360_v57  ;;  %v384_v18 = vld [vmem:[#allocation5 + $0x680] sm:$0xff] }
  0x79   :  { %3375 = vmatprep.subr.bf16.mxu0 %v5662_v6  ;;  %3457 = vmatprep.subr.bf16.mxu1 %v5664_v10  ;;  %v144_v47 = vadd.f32 %v143_v40, %v142_v33  ;;  %v161_v49 = vmul.f32 0.0625, %v116_v44  ;;  %v136_v1 = vrot.slane %v135_v51, 1  ;;  %v368_v6 = vld [vmem:[#allocation5 + $0x600] sm:$0xff]  ;;  %v5727_v15 = vcombine.low %v353_v59, %v361_v60  ;;  %v385_v20 = vld [vmem:[#allocation5 + $0x688] sm:$0xff] }
  0x7a   :  { %v109_v13 = vadd.f32 %v108_v0, %v107_v50  ;;  %v5742_v16 = vcombine.high %v368_v6, %v376_v7  ;;  %v5744_v17 = vcombine.high %v369_v8, %v377_v9  ;;  %v393_v21 = vld [vmem:[#allocation5 + $0x6c8] sm:$0xff]  ;;  %v5743_v29 = vcombine.low %v369_v8, %v377_v9  ;;  %v400_v32 = vld [vmem:[#allocation5 + $0x700] sm:$0xff] }
  0x7b   :  { %v165_v54 = vmul.f32 0.0625, %v144_v47  ;;  %v169_v58 = vpack.c.bf16 %v161_v49, %v161_v49  ;;  %v137_v14 = vadd.f32 %v136_v1, %v135_v51  ;;  %v5760_v31 = vcombine.high %v385_v20, %v393_v21  ;;  %v408_v33 = vld [vmem:[#allocation5 + $0x740] sm:$0xff]  ;;  %v409_v35 = vld [vmem:[#allocation5 + $0x748] sm:$0xff] }
  0x7c   :  { %3376 = vmatpush1.bf16.msra.mxu0 %v5661_v19  ;;  %3458 = vmatpush1.bf16.msra.mxu1 %v5663_v22  ;;  %v392_v19 = vld [vmem:[#allocation5 + $0x6c0] sm:$0xff]  ;;  %v90_v22 = vld [vmem:[#allocation2 + $0x18] sm:$0xff]  ;;  %v160_v24 = vmul.f32 0.0625, %v109_v13  ;;  %v152_v37 = vadd.f32 %v102_v28, %v98_v27  ;;  %v5774_v42 = vcombine.high %v400_v32, %v408_v33  ;;  %v425_v49 = vld [vmem:[#allocation5 + $0x7c8] sm:$0xff] }
  0x7d   :  { %3377 = vmatprep.subr.bf16.mxu0 %v5678_v23  ;;  %3459 = vmatprep.subr.bf16.mxu1 %v5680_v26  ;;  %v173_v61 = vpack.c.bf16 %v165_v54, %v165_v54  ;;  %v781_v63 = vunpack.c.l.b16 %v169_v58  ;;  %v5741_v23 = vcombine.low %v368_v6, %v376_v7  ;;  %v164_v25 = vmul.f32 0.0625, %v137_v14  ;;  %v94_v26 = vld [vmem:[#allocation2 + $0x38] sm:$0xff]  ;;  %v416_v46 = vld [vmem:[#allocation5 + $0x780] sm:$0xff]  ;;  %v449_v13 = vld [vmem:[#allocation5 + $0x888] sm:$0xff] }
  0x7e   :  { %v5758_v30 = vcombine.high %v384_v18, %v392_v19  ;;  %v124_v36 = vadd.f32 %v94_v26, %v90_v22  ;;  %v153_v44 = vrot.slane %v152_v37, 4  ;;  %v424_v47 = vld [vmem:[#allocation5 + $0x7c0] sm:$0xff]  ;;  %v457_v14 = vld [vmem:[#allocation5 + $0x8c8] sm:$0xff] }
  0x7f   :  { %v785_v4 = vunpack.c.l.b16 %v173_v61  ;;  %v172_v40 = vpack.c.bf16 %v164_v25, %v164_v25  ;;  %v5790_v56 = vcombine.high %v416_v46, %v424_v47  ;;  %v432_v60 = vld [vmem:[#allocation5 + $0x800] sm:$0xff]  ;;  %v5824_v22 = vcombine.high %v449_v13, %v457_v14  ;;  %v465_v25 = vld [vmem:[#allocation5 + $0x908] sm:$0xff] }
  0x80   :  { %3378 = vmatpush1.bf16.msra.mxu0 %v5677_v34  ;;  %3460 = vmatpush1.bf16.msra.mxu1 %v5679_v38  ;;  %v401_v34 = vld [vmem:[#allocation5 + $0x708] sm:$0xff]  ;;  %v5757_v38 = vcombine.low %v384_v18, %v392_v19  ;;  %v125_v43 = vrot.slane %v124_v36, 4  ;;  %v154_v51 = vadd.f32 %v153_v44, %v152_v37  ;;  %v440_v61 = vld [vmem:[#allocation5 + $0x840] sm:$0xff] }
  0x81   :  { %3379 = vmatprep.subr.bf16.mxu0 %v5694_v39  ;;  %3461 = vmatprep.subr.bf16.mxu1 %v5696_v41  ;;  %v790_v10 = vsel %vm788_vm0, %v785_v4, %v781_v63  ;;  %v168_v39 = vpack.c.bf16 %v160_v24, %v160_v24  ;;  %v5759_v41 = vcombine.low %v385_v20, %v393_v21  ;;  %v784_v54 = vunpack.c.l.b16 %v172_v40  ;;  %v441_v63 = vld [vmem:[#allocation5 + $0x848] sm:$0xff]  ;;  %v448_v9 = vld [vmem:[#allocation5 + $0x880] sm:$0xff] }
  0x82   :  { %v6808_v12 = vpack.c.b16 %v790_v10, %v790_v10  ;;  %v5776_v45 = vcombine.high %v401_v34, %v409_v35  ;;  %v126_v50 = vadd.f32 %v125_v43, %v124_v36  ;;  %v155_v58 = vrot.slane %v154_v51, 2  ;;  %v456_v10 = vld [vmem:[#allocation5 + $0x8c0] sm:$0xff]  ;;  %v473_v26 = vld [vmem:[#allocation5 + $0x948] sm:$0xff] }
  0x83   :  { %v5822_v19 = vcombine.high %v448_v9, %v456_v10  ;;  %v472_v24 = vld [vmem:[#allocation5 + $0x940] sm:$0xff]  ;;  %v481_v37 = vld [vmem:[#allocation5 + $0x988] sm:$0xff] }
  0x84   :  { %3380 = vmatpush1.bf16.msra.mxu0 %v5693_v48  ;;  %3462 = vmatpush1.bf16.msra.mxu1 %v5695_v52  ;;  %v417_v48 = vld [vmem:[#allocation5 + $0x788] sm:$0xff]  ;;  %v5773_v52 = vcombine.low %v400_v32, %v408_v33  ;;  %v127_v57 = vrot.slane %v126_v50, 2  ;;  %v156_v1 = vadd.f32 %v155_v58, %v154_v51  ;;  %v488_v36 = vld [vmem:[#allocation5 + $0x9c0] sm:$0xff]  ;;  %v97_v58 = vld [vmem:[#allocation2 + $0x50] sm:$0xff] }
  0x85   :  { %3381 = vmatprep.subr.bf16.mxu0 %v5710_v53  ;;  %3463 = vmatprep.subr.bf16.mxu1 %v5712_v55  ;;  %v780_v53 = vunpack.c.l.b16 %v168_v39  ;;  %v5775_v55 = vcombine.low %v401_v34, %v409_v35  ;;  %v5792_v59 = vcombine.high %v417_v48, %v425_v49  ;;  %v5791_v4 = vcombine.low %v417_v48, %v425_v49  ;;  %v480_v35 = vld [vmem:[#allocation5 + $0x980] sm:$0xff]  ;;  %v505_v48 = vld [vmem:[#allocation5 + $0xa48] sm:$0xff] }
  0x86   :  { %3393 = vmatprep.mubr.bf16.mxu0 %v6808_v12  ;;  %3475 = vmatprep.mubr.bf16.mxu1 %v6808_v12  ;;  %v128_v0 = vadd.f32 %v127_v57, %v126_v50  ;;  %v157_v7 = vrot.slane %v156_v1, 1  ;;  %v5840_v34 = vcombine.high %v465_v25, %v473_v26  ;;  %v5854_v43 = vcombine.high %v480_v35, %v488_v36  ;;  %v496_v44 = vld [vmem:[#allocation5 + $0xa00] sm:$0xff]  ;;  %v93_v57 = vld [vmem:[#allocation2 + $0x30] sm:$0xff] }
  0x87   :  { %v5853_v49 = vcombine.low %v480_v35, %v488_v36  ;;  %v512_v50 = vld [vmem:[#allocation5 + $0xa80] sm:$0xff]  ;;  %v585_v35 = vld [vmem:[#allocation5 + $0xcc8] sm:$0xff] }
  0x88   :  { %3382 = vmatpush1.bf16.msra.mxu0 %v5709_v62  ;;  %3464 = vmatpush1.bf16.msra.mxu1 %v5711_v2  ;;  %v433_v62 = vld [vmem:[#allocation5 + $0x808] sm:$0xff]  ;;  %v5789_v2 = vcombine.low %v416_v46, %v424_v47  ;;  %v129_v6 = vrot.slane %v128_v0, 1  ;;  %v520_v51 = vld [vmem:[#allocation5 + $0xac0] sm:$0xff] }
  0x89   :  { %3383 = vmatprep.subr.bf16.mxu0 %v5726_v3  ;;  %3465 = vmatprep.subr.bf16.mxu1 %v5728_v5  ;;  %v789_v3 = vsel %vm788_vm0, %v784_v54, %v780_v53  ;;  %v5806_v5 = vcombine.high %v432_v60, %v440_v61  ;;  %v5808_v8 = vcombine.high %v433_v62, %v441_v63  ;;  %v497_v46 = vld [vmem:[#allocation5 + $0xa08] sm:$0xff] }
  0x8a   :  { %v5807_v18 = vcombine.low %v433_v62, %v441_v63  ;;  %v513_v54 = vld [vmem:[#allocation5 + $0xa88] sm:$0xff]  ;;  %v5871_v62 = vcombine.low %v497_v46, %v505_v48  ;;  %v5886_v63 = vcombine.high %v512_v50, %v520_v51 }
  0x8c   :  { %3384 = vmatpush1.bf16.msra.mxu0 %v5725_v11  ;;  %3466 = vmatpush1.bf16.msra.mxu1 %v5727_v15  ;;  %v6813_v11 = vpack.c.b16 %v789_v3, %v789_v3  ;;  %v130_v15 = vadd.f32 %v129_v6, %v128_v0  ;;  %v528_v0 = vld [vmem:[#allocation5 + $0xb00] sm:$0xff] }
  0x8d   :  { %3385 = vmatprep.subr.bf16.mxu0 %v5742_v16  ;;  %3467 = vmatprep.subr.bf16.mxu1 %v5744_v17  ;;  %v158_v16 = vadd.f32 %v157_v7, %v156_v1  ;;  %v5805_v17 = vcombine.low %v432_v60, %v440_v61  ;;  %v101_v60 = vld [vmem:[#allocation2 + $0x70] sm:$0xff]  ;;  %v536_v1 = vld [vmem:[#allocation5 + $0xb40] sm:$0xff]  ;;  %v5885_v7 = vcombine.low %v512_v50, %v520_v51 }
  0x8e   :  { %v163_v20 = vmul.f32 0.0625, %v130_v15  ;;  %v145_v6 = vadd.f32 %v101_v60, %v97_v58  ;;  %v553_v15 = vld [vmem:[#allocation5 + $0xbc8] sm:$0xff]  ;;  %v608_v51 = vld [vmem:[#allocation5 + $0xd80] sm:$0xff] }
  0x8f   :  { %v167_v21 = vmul.f32 0.0625, %v158_v16 }
  0x90   :  { %3386 = vmatpush1.bf16.msra.mxu0 %v5741_v23  ;;  %3468 = vmatpush1.bf16.msra.mxu1 %v5743_v29  ;;  %v464_v23 = vld [vmem:[#allocation5 + $0x900] sm:$0xff]  ;;  %v171_v27 = vpack.c.bf16 %v163_v20, %v163_v20  ;;  %v5821_v29 = vcombine.low %v448_v9, %v456_v10  ;;  %v5902_v10 = vcombine.high %v528_v0, %v536_v1 }
  0x91   :  { %3387 = vmatprep.subr.bf16.mxu0 %v5758_v30  ;;  %3469 = vmatprep.subr.bf16.mxu1 %v5760_v31  ;;  %v175_v28 = vpack.c.bf16 %v167_v21, %v167_v21  ;;  %v5823_v30 = vcombine.low %v449_v13, %v457_v14  ;;  %v5838_v31 = vcombine.high %v464_v23, %v472_v24  ;;  %v552_v13 = vld [vmem:[#allocation5 + $0xbc0] sm:$0xff]  ;;  %v545_v14 = vld [vmem:[#allocation5 + $0xb88] sm:$0xff] }
  0x92   :  { %v783_v32 = vunpack.c.l.b16 %v171_v27  ;;  %v5837_v40 = vcombine.low %v464_v23, %v472_v24  ;;  %v568_v23 = vld [vmem:[#allocation5 + $0xc40] sm:$0xff]  ;;  %v561_v24 = vld [vmem:[#allocation5 + $0xc08] sm:$0xff] }
  0x93   :  { %v787_v33 = vunpack.c.l.b16 %v175_v28 }
  0x94   :  { %3388 = vmatpush1.bf16.msra.mxu0 %v5757_v38  ;;  %3470 = vmatpush1.bf16.msra.mxu1 %v5759_v41  ;;  %v489_v38 = vld [vmem:[#allocation5 + $0x9c8] sm:$0xff] }
  0x95   :  { %3389 = vmatprep.subr.bf16.mxu0 %v5774_v42  ;;  %3471 = vmatprep.subr.bf16.mxu1 %v5776_v45  ;;  %v792_v39 = vsel %vm788_vm0, %v787_v33, %v783_v32  ;;  %v5839_v42 = vcombine.low %v465_v25, %v473_v26  ;;  %v504_v45 = vld [vmem:[#allocation5 + $0xa40] sm:$0xff]  ;;  %v5856_v47 = vcombine.high %v481_v37, %v489_v38  ;;  %v569_v26 = vld [vmem:[#allocation5 + $0xc48] sm:$0xff] }
  0x96   :  { %v6818_v41 = vpack.c.b16 %v792_v39, %v792_v39  ;;  %v5870_v53 = vcombine.high %v496_v44, %v504_v45  ;;  %v5869_v61 = vcombine.low %v496_v44, %v504_v45  ;;  %v5920_v25 = vcombine.high %v545_v14, %v553_v15  ;;  %v584_v33 = vld [vmem:[#allocation5 + $0xcc0] sm:$0xff]  ;;  %v593_v45 = vld [vmem:[#allocation5 + $0xd08] sm:$0xff] }
  0x97   :  { %v5936_v36 = vcombine.high %v561_v24, %v569_v26  ;;  %v600_v44 = vld [vmem:[#allocation5 + $0xd40] sm:$0xff] }
  0x98   :  { %3390 = vmatpush1.bf16.msra.mxu0 %v5773_v52  ;;  %3472 = vmatpush1.bf16.msra.mxu1 %v5775_v55  ;;  %v5855_v52 = vcombine.low %v481_v37, %v489_v38  ;;  %v521_v55 = vld [vmem:[#allocation5 + $0xac8] sm:$0xff] }
  0x99   :  { %3391 = vmatprep.subr.bf16.mxu0 %v5790_v56  ;;  %3473 = vmatprep.subr.bf16.mxu1 %v5792_v59  ;;  %v89_v56 = vld [vmem:[#allocation2 + $0x10] sm:$0xff]  ;;  %v5872_v59 = vcombine.high %v497_v46, %v505_v48  ;;  %v5888_v3 = vcombine.high %v513_v54, %v521_v55  ;;  %v5887_v9 = vcombine.low %v513_v54, %v521_v55  ;;  %v616_v54 = vld [vmem:[#allocation5 + $0xdc0] sm:$0xff]  ;;  %v609_v55 = vld [vmem:[#allocation5 + $0xd88] sm:$0xff] }
  0x9c   :  { %3392 = vmatpush1.bf16.msra.mxu0 %v5789_v2  ;;  %3474 = vmatpush1.bf16.msra.mxu1 %v5791_v4  ;;  %v529_v2 = vld [vmem:[#allocation5 + $0xb08] sm:$0xff] }
  0x9d   :  { %3402 = vmatprep.subr.bf16.mxu0 %v5806_v5  ;;  %3484 = vmatprep.subr.bf16.mxu1 %v5808_v8  ;;  %v537_v4 = vld [vmem:[#allocation5 + $0xb48] sm:$0xff]  ;;  %v117_v5 = vadd.f32 %v93_v57, %v89_v56  ;;  %v544_v8 = vld [vmem:[#allocation5 + $0xb80] sm:$0xff] }
  0x9e   :  { %v5904_v16 = vcombine.high %v529_v2, %v537_v4  ;;  %v5903_v20 = vcombine.low %v529_v2, %v537_v4  ;;  %v5918_v21 = vcombine.high %v544_v8, %v552_v13  ;;  %v617_v56 = vld [vmem:[#allocation5 + $0xdc8] sm:$0xff] }
  0x9f   :  { %3394 = vmatmul.mubr.bf16.vlgmr.msra.gmra.mrb[0].mxu0 %v6813_v11  ;;  %3476 = vmatmul.mubr.bf16.vlgmr.msra.gmra.mrb[0].mxu1 %v6813_v11  ;;  %v5984_v2 = vcombine.high %v609_v55, %v617_v56 }
  0xa0   :  { %3403 = vmatpush1.bf16.msra.mxu0 %v5805_v17  ;;  %3485 = vmatpush1.bf16.msra.mxu1 %v5807_v18  ;;  %v118_v17 = vrot.slane %v117_v5, 4  ;;  %v146_v18 = vrot.slane %v145_v6, 4 }
  0xa1   :  { %3404 = vmatprep.subr.bf16.mxu0 %v5822_v19  ;;  %3486 = vmatprep.subr.bf16.mxu1 %v5824_v22  ;;  %v5901_v19 = vcombine.low %v528_v0, %v536_v1  ;;  %v560_v22 = vld [vmem:[#allocation5 + $0xc00] sm:$0xff]  ;;  %v625_v1 = vld [vmem:[#allocation5 + $0xe08] sm:$0xff] }
  0xa2   :  { %3434 = vmatprep.mubr.bf16.mxu0 %v6818_v41  ;;  %3516 = vmatprep.mubr.bf16.mxu1 %v6818_v41  ;;  %v119_v27 = vadd.f32 %v118_v17, %v117_v5  ;;  %v147_v28 = vadd.f32 %v146_v18, %v145_v6  ;;  %v5934_v32 = vcombine.high %v560_v22, %v568_v23  ;;  %v632_v0 = vld [vmem:[#allocation5 + $0xe40] sm:$0xff] }
  0xa3   :  { %v5933_v39 = vcombine.low %v560_v22, %v568_v23  ;;  %v5981_v6 = vcombine.low %v608_v51, %v616_v54  ;;  %v664_v22 = vld [vmem:[#allocation5 + $0xf40] sm:$0xff]  ;;  %v657_v23 = vld [vmem:[#allocation5 + $0xf08] sm:$0xff] }
  0xa4   :  { %3405 = vmatpush1.bf16.msra.mxu0 %v5821_v29  ;;  %3487 = vmatpush1.bf16.msra.mxu1 %v5823_v30  ;;  %v5917_v29 = vcombine.low %v544_v8, %v552_v13  ;;  %v576_v30 = vld [vmem:[#allocation5 + $0xc80] sm:$0xff]  ;;  %v120_v37 = vrot.slane %v119_v27, 2  ;;  %v148_v38 = vrot.slane %v147_v28, 2  ;;  %v5983_v8 = vcombine.low %v609_v55, %v617_v56  ;;  %v641_v13 = vld [vmem:[#allocation5 + $0xe88] sm:$0xff]  ;;  %v203_v55 = vld [vmem:[#allocation5 + $0xd8] sm:$0xff] }
  0xa5   :  { %3406 = vmatprep.subr.bf16.mxu0 %v5838_v31  ;;  %3488 = vmatprep.subr.bf16.mxu1 %v5840_v34  ;;  %v5919_v31 = vcombine.low %v545_v14, %v553_v15  ;;  %v577_v34 = vld [vmem:[#allocation5 + $0xc88] sm:$0xff]  ;;  %v5949_v50 = vcombine.low %v576_v30, %v584_v33 }
  0xa6   :  { %v5952_v46 = vcombine.high %v577_v34, %v585_v35  ;;  %v121_v48 = vadd.f32 %v120_v37, %v119_v27  ;;  %v649_v14 = vld [vmem:[#allocation5 + $0xec8] sm:$0xff] }
  0xa8   :  { %3407 = vmatpush1.bf16.msra.mxu0 %v5837_v40  ;;  %3489 = vmatpush1.bf16.msra.mxu1 %v5839_v42  ;;  %v5935_v40 = vcombine.low %v561_v24, %v569_v26  ;;  %v5950_v42 = vcombine.high %v576_v30, %v584_v33  ;;  %v122_v58 = vrot.slane %v121_v48, 1  ;;  %v6016_v24 = vcombine.high %v641_v13, %v649_v14  ;;  %v673_v33 = vld [vmem:[#allocation5 + $0xf88] sm:$0xff] }
  0xa9   :  { %3408 = vmatprep.subr.bf16.mxu0 %v5854_v43  ;;  %3490 = vmatprep.subr.bf16.mxu1 %v5856_v47  ;;  %v592_v43 = vld [vmem:[#allocation5 + $0xd00] sm:$0xff]  ;;  %v601_v47 = vld [vmem:[#allocation5 + $0xd48] sm:$0xff] }
  0xaa   :  { %v5968_v57 = vcombine.high %v593_v45, %v601_v47  ;;  %v5965_v60 = vcombine.low %v592_v43, %v600_v44  ;;  %v123_v4 = vadd.f32 %v122_v58, %v121_v48 }
  0xac   :  { %3409 = vmatpush1.bf16.msra.mxu0 %v5853_v49  ;;  %3491 = vmatpush1.bf16.msra.mxu1 %v5855_v52  ;;  %v149_v49 = vadd.f32 %v148_v38, %v147_v28  ;;  %v5951_v52 = vcombine.low %v577_v34, %v585_v35  ;;  %v681_v35 = vld [vmem:[#allocation5 + $0xfc8] sm:$0xff] }
  0xad   :  { %3410 = vmatprep.subr.bf16.mxu0 %v5870_v53  ;;  %3492 = vmatprep.subr.bf16.mxu1 %v5872_v59  ;;  %v5966_v53 = vcombine.high %v592_v43, %v600_v44  ;;  %v186_v43 = vld [vmem:[#allocation5 + $0x50] sm:$0xff]  ;;  %v179_v44 = vld [vmem:[#allocation5 + $0x18] sm:$0xff] }
  0xae   :  { %v150_v59 = vrot.slane %v149_v49, 1 }
  0xb0   :  { %3411 = vmatpush1.bf16.msra.mxu0 %v5869_v61  ;;  %3493 = vmatpush1.bf16.msra.mxu1 %v5871_v62  ;;  %v5967_v61 = vcombine.low %v593_v45, %v601_v47  ;;  %v5982_v62 = vcombine.high %v608_v51, %v616_v54  ;;  %v151_v5 = vadd.f32 %v150_v59, %v149_v49  ;;  %v194_v51 = vld [vmem:[#allocation5 + $0x90] sm:$0xff] }
  0xb1   :  { %3412 = vmatprep.subr.bf16.mxu0 %v5886_v63  ;;  %3494 = vmatprep.subr.bf16.mxu1 %v5888_v3  ;;  %v624_v63 = vld [vmem:[#allocation5 + $0xe00] sm:$0xff]  ;;  %v633_v3 = vld [vmem:[#allocation5 + $0xe48] sm:$0xff]  ;;  %v6048_v45 = vcombine.high %v673_v33, %v681_v35  ;;  %v6047_v49 = vcombine.low %v673_v33, %v681_v35 }
  0xb2   :  { %v6000_v15 = vcombine.high %v625_v1, %v633_v3  ;;  %v166_v17 = vmul.f32 0.0625, %v151_v5  ;;  %v5997_v18 = vcombine.low %v624_v63, %v632_v0  ;;  %v234_v5 = vld [vmem:[#allocation5 + $0x1d0] sm:$0xff] }
  0xb4   :  { %3413 = vmatpush1.bf16.msra.mxu0 %v5885_v7  ;;  %3495 = vmatpush1.bf16.msra.mxu1 %v5887_v9  ;;  %v640_v7 = vld [vmem:[#allocation5 + $0xe80] sm:$0xff]  ;;  %v5998_v9 = vcombine.high %v624_v63, %v632_v0  ;;  %v174_v28 = vpack.c.bf16 %v166_v17, %v166_v17  ;;  %v219_v0 = vld [vmem:[#allocation5 + $0x158] sm:$0xff] }
  0xb5   :  { %3414 = vmatprep.subr.bf16.mxu0 %v5902_v10  ;;  %3496 = vmatprep.subr.bf16.mxu1 %v5904_v16  ;;  %v648_v10 = vld [vmem:[#allocation5 + $0xec0] sm:$0xff]  ;;  %v162_v16 = vmul.f32 0.0625, %v123_v4  ;;  %v226_v4 = vld [vmem:[#allocation5 + $0x190] sm:$0xff] }
  0xb6   :  { %v6013_v26 = vcombine.low %v640_v7, %v648_v10  ;;  %v786_v38 = vunpack.c.l.b16 %v174_v28 }
  0xb7   :  { %v170_v27 = vpack.c.bf16 %v162_v16, %v162_v16  ;;  %v243_v16 = vld [vmem:[#allocation5 + $0x218] sm:$0xff] }
  0xb8   :  { %3415 = vmatpush1.bf16.msra.mxu0 %v5901_v19  ;;  %3497 = vmatpush1.bf16.msra.mxu1 %v5903_v20  ;;  %v5999_v19 = vcombine.low %v625_v1, %v633_v3  ;;  %v6014_v20 = vcombine.high %v640_v7, %v648_v10 }
  0xb9   :  { %3416 = vmatprep.subr.bf16.mxu0 %v5918_v21  ;;  %3498 = vmatprep.subr.bf16.mxu1 %v5920_v25  ;;  %v656_v21 = vld [vmem:[#allocation5 + $0xf00] sm:$0xff]  ;;  %v665_v25 = vld [vmem:[#allocation5 + $0xf48] sm:$0xff]  ;;  %v782_v37 = vunpack.c.l.b16 %v170_v27 }
  0xba   :  { %v6030_v30 = vcombine.high %v656_v21, %v664_v22  ;;  %v6032_v34 = vcombine.high %v657_v23, %v665_v25 }
  0xbb   :  { %v791_v48 = vsel %vm788_vm0, %v786_v38, %v782_v37  ;;  %v290_v38 = vld [vmem:[#allocation5 + $0x390] sm:$0xff] }
  0xbc   :  { %3417 = vmatpush1.bf16.msra.mxu0 %v5917_v29  ;;  %3499 = vmatpush1.bf16.msra.mxu1 %v5919_v31  ;;  %v6015_v29 = vcombine.low %v641_v13, %v649_v14  ;;  %v672_v31 = vld [vmem:[#allocation5 + $0xf80] sm:$0xff]  ;;  %v6823_v56 = vpack.c.b16 %v791_v48, %v791_v48  ;;  %v5602_v13 = vcombine.high %v226_v4, %v234_v5  ;;  %v242_v14 = vld [vmem:[#allocation5 + $0x210] sm:$0xff] }
  0xbd   :  { %3418 = vmatprep.subr.bf16.mxu0 %v5934_v32  ;;  %3500 = vmatprep.subr.bf16.mxu1 %v5936_v36  ;;  %v680_v32 = vld [vmem:[#allocation5 + $0xfc0] sm:$0xff]  ;;  %v6029_v36 = vcombine.low %v656_v21, %v664_v22  ;;  %v258_v22 = vld [vmem:[#allocation5 + $0x290] sm:$0xff] }
  0xbe   :  { %v6045_v47 = vcombine.low %v672_v31, %v680_v32  ;;  %v314_v48 = vld [vmem:[#allocation5 + $0x450] sm:$0xff] }
  0xc0   :  { %3419 = vmatpush1.bf16.msra.mxu0 %v5933_v39  ;;  %3501 = vmatpush1.bf16.msra.mxu1 %v5935_v40  ;;  %v6031_v39 = vcombine.low %v657_v23, %v665_v25  ;;  %v6046_v40 = vcombine.high %v672_v31, %v680_v32  ;;  %v266_v23 = vld [vmem:[#allocation5 + $0x2d0] sm:$0xff]  ;;  %v275_v32 = vld [vmem:[#allocation5 + $0x318] sm:$0xff] }
  0xc1   :  { %3420 = vmatprep.subr.bf16.mxu0 %v5950_v42  ;;  %3502 = vmatprep.subr.bf16.mxu1 %v5952_v46  ;;  %v178_v42 = vld [vmem:[#allocation5 + $0x10] sm:$0xff]  ;;  %v187_v46 = vld [vmem:[#allocation5 + $0x58] sm:$0xff]  ;;  %v5633_v35 = vcombine.low %v258_v22, %v266_v23 }
  0xc2   :  { %v5556_v54 = vcombine.high %v179_v44, %v187_v46  ;;  %v5555_v58 = vcombine.low %v179_v44, %v187_v46  ;;  %v282_v31 = vld [vmem:[#allocation5 + $0x350] sm:$0xff] }
  0xc4   :  { %3421 = vmatpush1.bf16.msra.mxu0 %v5949_v50  ;;  %3503 = vmatpush1.bf16.msra.mxu1 %v5951_v52  ;;  %v5554_v50 = vcombine.high %v178_v42, %v186_v43  ;;  %v202_v52 = vld [vmem:[#allocation5 + $0xd0] sm:$0xff] }
  0xc5   :  { %3422 = vmatprep.subr.bf16.mxu0 %v5966_v53  ;;  %3504 = vmatprep.subr.bf16.mxu1 %v5968_v57  ;;  %v195_v53 = vld [vmem:[#allocation5 + $0x98] sm:$0xff]  ;;  %v5553_v57 = vcombine.low %v178_v42, %v186_v43  ;;  %v5570_v59 = vcombine.high %v194_v51, %v202_v52  ;;  %v5569_v1 = vcombine.low %v194_v51, %v202_v52 }
  0xc6   :  { %v5572_v63 = vcombine.high %v195_v53, %v203_v55  ;;  %v299_v43 = vld [vmem:[#allocation5 + $0x3d8] sm:$0xff] }
  0xc7   :  { %v315_v51 = vld [vmem:[#allocation5 + $0x458] sm:$0xff] }
  0xc8   :  { %3423 = vmatpush1.bf16.msra.mxu0 %v5965_v60  ;;  %3505 = vmatpush1.bf16.msra.mxu1 %v5967_v61  ;;  %v210_v60 = vld [vmem:[#allocation5 + $0x110] sm:$0xff] }
  0xc9   :  { %3424 = vmatprep.subr.bf16.mxu0 %v5982_v62  ;;  %3506 = vmatprep.subr.bf16.mxu1 %v5984_v2  ;;  %v218_v61 = vld [vmem:[#allocation5 + $0x150] sm:$0xff]  ;;  %v211_v62 = vld [vmem:[#allocation5 + $0x118] sm:$0xff]  ;;  %v5571_v2 = vcombine.low %v195_v53, %v203_v55 }
  0xca   :  { %v5586_v3 = vcombine.high %v210_v60, %v218_v61  ;;  %v5588_v7 = vcombine.high %v211_v62, %v219_v0  ;;  %v5587_v10 = vcombine.low %v211_v62, %v219_v0  ;;  %v322_v55 = vld [vmem:[#allocation5 + $0x490] sm:$0xff] }
  0xcb   :  { %v338_v0 = vld [vmem:[#allocation5 + $0x510] sm:$0xff] }
  0xcc   :  { %3425 = vmatpush1.bf16.msra.mxu0 %v5981_v6  ;;  %3507 = vmatpush1.bf16.msra.mxu1 %v5983_v8  ;;  %v227_v6 = vld [vmem:[#allocation5 + $0x198] sm:$0xff] }
  0xcd   :  { %3426 = vmatprep.subr.bf16.mxu0 %v5998_v9  ;;  %3508 = vmatprep.subr.bf16.mxu1 %v6000_v15  ;;  %v235_v8 = vld [vmem:[#allocation5 + $0x1d8] sm:$0xff]  ;;  %v5585_v9 = vcombine.low %v210_v60, %v218_v61  ;;  %v250_v15 = vld [vmem:[#allocation5 + $0x250] sm:$0xff] }
  0xce   :  { %v5604_v17 = vcombine.high %v227_v6, %v235_v8  ;;  %v5618_v21 = vcombine.high %v242_v14, %v250_v15  ;;  %v5617_v27 = vcombine.low %v242_v14, %v250_v15  ;;  %v331_v60 = vld [vmem:[#allocation5 + $0x4d8] sm:$0xff] }
  0xcf   :  { %v363_v14 = vld [vmem:[#allocation5 + $0x5d8] sm:$0xff] }
  0xd0   :  { %3427 = vmatpush1.bf16.msra.mxu0 %v5997_v18  ;;  %3509 = vmatpush1.bf16.msra.mxu1 %v5999_v19  ;;  %v251_v18 = vld [vmem:[#allocation5 + $0x258] sm:$0xff]  ;;  %v5601_v19 = vcombine.low %v226_v4, %v234_v5 }
  0xd1   :  { %3428 = vmatprep.subr.bf16.mxu0 %v6014_v20  ;;  %3510 = vmatprep.subr.bf16.mxu1 %v6016_v24  ;;  %v5603_v20 = vcombine.low %v227_v6, %v235_v8  ;;  %v259_v24 = vld [vmem:[#allocation5 + $0x298] sm:$0xff]  ;;  %v5620_v25 = vcombine.high %v243_v16, %v251_v18  ;;  %v5619_v28 = vcombine.low %v243_v16, %v251_v18  ;;  %v354_v8 = vld [vmem:[#allocation5 + $0x590] sm:$0xff] }
  0xd2   :  { %v347_v4 = vld [vmem:[#allocation5 + $0x558] sm:$0xff]  ;;  %v370_v18 = vld [vmem:[#allocation5 + $0x610] sm:$0xff] }
  0xd4   :  { %3429 = vmatpush1.bf16.msra.mxu0 %v6013_v26  ;;  %3511 = vmatpush1.bf16.msra.mxu1 %v6015_v29  ;;  %v267_v26 = vld [vmem:[#allocation5 + $0x2d8] sm:$0xff]  ;;  %v5634_v29 = vcombine.high %v258_v22, %v266_v23 }
  0xd5   :  { %3430 = vmatprep.subr.bf16.mxu0 %v6030_v30  ;;  %3512 = vmatprep.subr.bf16.mxu1 %v6032_v34  ;;  %v274_v30 = vld [vmem:[#allocation5 + $0x310] sm:$0xff]  ;;  %v5636_v33 = vcombine.high %v259_v24, %v267_v26  ;;  %v283_v34 = vld [vmem:[#allocation5 + $0x358] sm:$0xff] }
  0xd6   :  { %v5650_v37 = vcombine.high %v274_v30, %v282_v31  ;;  %v5652_v42 = vcombine.high %v275_v32, %v283_v34  ;;  %v5649_v44 = vcombine.low %v274_v30, %v282_v31  ;;  %v379_v22 = vld [vmem:[#allocation5 + $0x658] sm:$0xff] }
  0xd7   :  { %v395_v30 = vld [vmem:[#allocation5 + $0x6d8] sm:$0xff] }
  0xd8   :  { %3431 = vmatpush1.bf16.msra.mxu0 %v6029_v36  ;;  %3513 = vmatpush1.bf16.msra.mxu1 %v6031_v39  ;;  %v5635_v36 = vcombine.low %v259_v24, %v267_v26  ;;  %v298_v39 = vld [vmem:[#allocation5 + $0x3d0] sm:$0xff] }
  0xd9   :  { %3432 = vmatprep.subr.bf16.mxu0 %v6046_v40  ;;  %3514 = vmatprep.subr.bf16.mxu1 %v6048_v45  ;;  %v291_v40 = vld [vmem:[#allocation5 + $0x398] sm:$0xff]  ;;  %v5651_v45 = vcombine.low %v275_v32, %v283_v34  ;;  %v5666_v46 = vcombine.high %v290_v38, %v298_v39  ;;  %v5665_v52 = vcombine.low %v290_v38, %v298_v39  ;;  %v386_v26 = vld [vmem:[#allocation5 + $0x690] sm:$0xff] }
  0xda   :  { %v5667_v53 = vcombine.low %v291_v40, %v299_v43  ;;  %v402_v34 = vld [vmem:[#allocation5 + $0x710] sm:$0xff]  ;;  %v411_v38 = vld [vmem:[#allocation5 + $0x758] sm:$0xff] }
  0xdc   :  { %3433 = vmatpush1.bf16.msra.mxu0 %v6045_v47  ;;  %3515 = vmatpush1.bf16.msra.mxu1 %v6047_v49  ;;  %v306_v47 = vld [vmem:[#allocation5 + $0x410] sm:$0xff]  ;;  %v307_v49 = vld [vmem:[#allocation5 + $0x418] sm:$0xff] }
  0xdd   :  { %3525 = vmatprep.subr.bf16.mxu0 %v5554_v50  ;;  %3607 = vmatprep.subr.bf16.mxu1 %v5556_v54  ;;  %v5668_v50 = vcombine.high %v291_v40, %v299_v43  ;;  %v5682_v54 = vcombine.high %v306_v47, %v314_v48  ;;  %v5681_v61 = vcombine.low %v306_v47, %v314_v48  ;;  %v418_v43 = vld [vmem:[#allocation5 + $0x790] sm:$0xff]  ;;  %v427_v47 = vld [vmem:[#allocation5 + $0x7d8] sm:$0xff] }
  0xde   :  { %v5683_v62 = vcombine.low %v307_v49, %v315_v51 }
  0xdf   :  { %3435 = vmatmul.mubr.bf16.vlgmr.msra.gmra.mrb[0].mxu0 %v6823_v56  ;;  %3517 = vmatmul.mubr.bf16.vlgmr.msra.gmra.mrb[0].mxu1 %v6823_v56 }
  0xe0   :  { %3526 = vmatpush1.bf16.msra.mxu0 %v5553_v57  ;;  %3608 = vmatpush1.bf16.msra.mxu1 %v5555_v58  ;;  %v330_v57 = vld [vmem:[#allocation5 + $0x4d0] sm:$0xff]  ;;  %v323_v58 = vld [vmem:[#allocation5 + $0x498] sm:$0xff] }
  0xe1   :  { %3527 = vmatprep.subr.bf16.mxu0 %v5570_v59  ;;  %3609 = vmatprep.subr.bf16.mxu1 %v5572_v63  ;;  %v5684_v59 = vcombine.high %v307_v49, %v315_v51  ;;  %v5698_v63 = vcombine.high %v322_v55, %v330_v57  ;;  %v5697_v5 = vcombine.low %v322_v55, %v330_v57  ;;  %v434_v51 = vld [vmem:[#allocation5 + $0x810] sm:$0xff]  ;;  %v443_v55 = vld [vmem:[#allocation5 + $0x858] sm:$0xff] }
  0xe2   :  { %3557 = vmatprep.mubr.bf16.mxu0 %v6808_v12  ;;  %3639 = vmatprep.mubr.bf16.mxu1 %v6808_v12  ;;  %v5699_v6 = vcombine.low %v323_v58, %v331_v60 }
  0xe4   :  { %3528 = vmatpush1.bf16.msra.mxu0 %v5569_v1  ;;  %3610 = vmatpush1.bf16.msra.mxu1 %v5571_v2  ;;  %v346_v1 = vld [vmem:[#allocation5 + $0x550] sm:$0xff]  ;;  %v339_v2 = vld [vmem:[#allocation5 + $0x518] sm:$0xff] }
  0xe5   :  { %3529 = vmatprep.subr.bf16.mxu0 %v5586_v3  ;;  %3611 = vmatprep.subr.bf16.mxu1 %v5588_v7  ;;  %v5700_v3 = vcombine.high %v323_v58, %v331_v60  ;;  %v5714_v7 = vcombine.high %v338_v0, %v346_v1  ;;  %v5713_v15 = vcombine.low %v338_v0, %v346_v1  ;;  %v450_v60 = vld [vmem:[#allocation5 + $0x890] sm:$0xff]  ;;  %v459_v0 = vld [vmem:[#allocation5 + $0x8d8] sm:$0xff] }
  0xe6   :  { %v5715_v16 = vcombine.low %v339_v2, %v347_v4 }
  0xe8   :  { %3530 = vmatpush1.bf16.msra.mxu0 %v5585_v9  ;;  %3612 = vmatpush1.bf16.msra.mxu1 %v5587_v10  ;;  %v362_v9 = vld [vmem:[#allocation5 + $0x5d0] sm:$0xff]  ;;  %v355_v10 = vld [vmem:[#allocation5 + $0x598] sm:$0xff] }
  0xe9   :  { %3531 = vmatprep.subr.bf16.mxu0 %v5602_v13  ;;  %3613 = vmatprep.subr.bf16.mxu1 %v5604_v17  ;;  %v5716_v13 = vcombine.high %v339_v2, %v347_v4  ;;  %v5730_v17 = vcombine.high %v354_v8, %v362_v9  ;;  %v5729_v23 = vcombine.low %v354_v8, %v362_v9  ;;  %v466_v4 = vld [vmem:[#allocation5 + $0x910] sm:$0xff]  ;;  %v475_v8 = vld [vmem:[#allocation5 + $0x958] sm:$0xff] }
  0xea   :  { %v5731_v24 = vcombine.low %v355_v10, %v363_v14 }
  0xec   :  { %3532 = vmatpush1.bf16.msra.mxu0 %v5601_v19  ;;  %3614 = vmatpush1.bf16.msra.mxu1 %v5603_v20  ;;  %v378_v19 = vld [vmem:[#allocation5 + $0x650] sm:$0xff]  ;;  %v371_v20 = vld [vmem:[#allocation5 + $0x618] sm:$0xff] }
  0xed   :  { %3533 = vmatprep.subr.bf16.mxu0 %v5618_v21  ;;  %3615 = vmatprep.subr.bf16.mxu1 %v5620_v25  ;;  %v5732_v21 = vcombine.high %v355_v10, %v363_v14  ;;  %v5746_v25 = vcombine.high %v370_v18, %v378_v19  ;;  %v5745_v31 = vcombine.low %v370_v18, %v378_v19  ;;  %v482_v14 = vld [vmem:[#allocation5 + $0x990] sm:$0xff]  ;;  %v491_v18 = vld [vmem:[#allocation5 + $0x9d8] sm:$0xff] }
  0xee   :  { %v5747_v32 = vcombine.low %v371_v20, %v379_v22 }
  0xf0   :  { %3534 = vmatpush1.bf16.msra.mxu0 %v5617_v27  ;;  %3616 = vmatpush1.bf16.msra.mxu1 %v5619_v28  ;;  %v394_v27 = vld [vmem:[#allocation5 + $0x6d0] sm:$0xff]  ;;  %v387_v28 = vld [vmem:[#allocation5 + $0x698] sm:$0xff] }
  0xf1   :  { %3535 = vmatprep.subr.bf16.mxu0 %v5634_v29  ;;  %3617 = vmatprep.subr.bf16.mxu1 %v5636_v33  ;;  %v5748_v29 = vcombine.high %v371_v20, %v379_v22  ;;  %v5762_v33 = vcombine.high %v386_v26, %v394_v27  ;;  %v5761_v39 = vcombine.low %v386_v26, %v394_v27  ;;  %v507_v26 = vld [vmem:[#allocation5 + $0xa58] sm:$0xff] }
  0xf2   :  { %v5763_v40 = vcombine.low %v387_v28, %v395_v30 }
  0xf4   :  { %3536 = vmatpush1.bf16.msra.mxu0 %v5633_v35  ;;  %3618 = vmatpush1.bf16.msra.mxu1 %v5635_v36  ;;  %v410_v35 = vld [vmem:[#allocation5 + $0x750] sm:$0xff]  ;;  %v403_v36 = vld [vmem:[#allocation5 + $0x718] sm:$0xff] }
  0xf5   :  { %3537 = vmatprep.subr.bf16.mxu0 %v5650_v37  ;;  %3619 = vmatprep.subr.bf16.mxu1 %v5652_v42  ;;  %v5764_v37 = vcombine.high %v387_v28, %v395_v30  ;;  %v5778_v42 = vcombine.high %v402_v34, %v410_v35  ;;  %v5777_v48 = vcombine.low %v402_v34, %v410_v35  ;;  %v523_v34 = vld [vmem:[#allocation5 + $0xad8] sm:$0xff] }
  0xf6   :  { %v5779_v49 = vcombine.low %v403_v36, %v411_v38 }
  0xf8   :  { %3538 = vmatpush1.bf16.msra.mxu0 %v5649_v44  ;;  %3620 = vmatpush1.bf16.msra.mxu1 %v5651_v45  ;;  %v426_v44 = vld [vmem:[#allocation5 + $0x7d0] sm:$0xff]  ;;  %v419_v45 = vld [vmem:[#allocation5 + $0x798] sm:$0xff] }
  0xf9   :  { %3539 = vmatprep.subr.bf16.mxu0 %v5666_v46  ;;  %3621 = vmatprep.subr.bf16.mxu1 %v5668_v50  ;;  %v5780_v46 = vcombine.high %v403_v36, %v411_v38  ;;  %v5794_v50 = vcombine.high %v418_v43, %v426_v44  ;;  %v5793_v57 = vcombine.low %v418_v43, %v426_v44  ;;  %v539_v43 = vld [vmem:[#allocation5 + $0xb58] sm:$0xff] }
  0xfa   :  { %v5795_v58 = vcombine.low %v419_v45, %v427_v47 }
  0xfc   :  { %3540 = vmatpush1.bf16.msra.mxu0 %v5665_v52  ;;  %3622 = vmatpush1.bf16.msra.mxu1 %v5667_v53  ;;  %v442_v52 = vld [vmem:[#allocation5 + $0x850] sm:$0xff]  ;;  %v435_v53 = vld [vmem:[#allocation5 + $0x818] sm:$0xff] }
  0xfd   :  { %3541 = vmatprep.subr.bf16.mxu0 %v5682_v54  ;;  %3623 = vmatprep.subr.bf16.mxu1 %v5684_v59  ;;  %v5796_v54 = vcombine.high %v419_v45, %v427_v47  ;;  %v5810_v59 = vcombine.high %v434_v51, %v442_v52  ;;  %v5809_v1 = vcombine.low %v434_v51, %v442_v52  ;;  %v555_v51 = vld [vmem:[#allocation5 + $0xbd8] sm:$0xff] }
  0xfe   :  { %v5811_v2 = vcombine.low %v435_v53, %v443_v55 }
 0x100   :  { %3542 = vmatpush1.bf16.msra.mxu0 %v5681_v61  ;;  %3624 = vmatpush1.bf16.msra.mxu1 %v5683_v62  ;;  %v458_v61 = vld [vmem:[#allocation5 + $0x8d0] sm:$0xff]  ;;  %v451_v62 = vld [vmem:[#allocation5 + $0x898] sm:$0xff] }
 0x101   :  { %3543 = vmatprep.subr.bf16.mxu0 %v5698_v63  ;;  %3625 = vmatprep.subr.bf16.mxu1 %v5700_v3  ;;  %v5812_v63 = vcombine.high %v435_v53, %v443_v55  ;;  %v5826_v3 = vcombine.high %v450_v60, %v458_v61  ;;  %v5825_v9 = vcombine.low %v450_v60, %v458_v61  ;;  %v571_v60 = vld [vmem:[#allocation5 + $0xc58] sm:$0xff] }
 0x102   :  { %v5827_v10 = vcombine.low %v451_v62, %v459_v0 }
 0x104   :  { %3544 = vmatpush1.bf16.msra.mxu0 %v5697_v5  ;;  %3626 = vmatpush1.bf16.msra.mxu1 %v5699_v6  ;;  %v474_v5 = vld [vmem:[#allocation5 + $0x950] sm:$0xff]  ;;  %v467_v6 = vld [vmem:[#allocation5 + $0x918] sm:$0xff] }
 0x105   :  { %3545 = vmatprep.subr.bf16.mxu0 %v5714_v7  ;;  %3627 = vmatprep.subr.bf16.mxu1 %v5716_v13  ;;  %v5828_v7 = vcombine.high %v451_v62, %v459_v0  ;;  %v5842_v13 = vcombine.high %v466_v4, %v474_v5  ;;  %v5841_v19 = vcombine.low %v466_v4, %v474_v5  ;;  %v587_v4 = vld [vmem:[#allocation5 + $0xcd8] sm:$0xff] }
 0x106   :  { %v5843_v20 = vcombine.low %v467_v6, %v475_v8 }
 0x108   :  { %3546 = vmatpush1.bf16.msra.mxu0 %v5713_v15  ;;  %3628 = vmatpush1.bf16.msra.mxu1 %v5715_v16  ;;  %v490_v15 = vld [vmem:[#allocation5 + $0x9d0] sm:$0xff]  ;;  %v483_v16 = vld [vmem:[#allocation5 + $0x998] sm:$0xff] }
 0x109   :  { %3547 = vmatprep.subr.bf16.mxu0 %v5730_v17  ;;  %3629 = vmatprep.subr.bf16.mxu1 %v5732_v21  ;;  %v5844_v17 = vcombine.high %v467_v6, %v475_v8  ;;  %v5858_v21 = vcombine.high %v482_v14, %v490_v15  ;;  %v5860_v22 = vcombine.high %v483_v16, %v491_v18 }
 0x10a   :  { %v5857_v27 = vcombine.low %v482_v14, %v490_v15  ;;  %v5859_v28 = vcombine.low %v483_v16, %v491_v18  ;;  %v603_v14 = vld [vmem:[#allocation5 + $0xd58] sm:$0xff] }
 0x10c   :  { %3548 = vmatpush1.bf16.msra.mxu0 %v5729_v23  ;;  %3630 = vmatpush1.bf16.msra.mxu1 %v5731_v24  ;;  %v498_v23 = vld [vmem:[#allocation5 + $0xa10] sm:$0xff] }
 0x10d   :  { %3549 = vmatprep.subr.bf16.mxu0 %v5746_v25  ;;  %3631 = vmatprep.subr.bf16.mxu1 %v5748_v29  ;;  %v506_v24 = vld [vmem:[#allocation5 + $0xa50] sm:$0xff]  ;;  %v499_v25 = vld [vmem:[#allocation5 + $0xa18] sm:$0xff] }
 0x10e   :  { %v5874_v29 = vcombine.high %v498_v23, %v506_v24  ;;  %v5876_v30 = vcombine.high %v499_v25, %v507_v26  ;;  %v5873_v35 = vcombine.low %v498_v23, %v506_v24  ;;  %v5875_v36 = vcombine.low %v499_v25, %v507_v26 }
 0x110   :  { %3550 = vmatpush1.bf16.msra.mxu0 %v5745_v31  ;;  %3632 = vmatpush1.bf16.msra.mxu1 %v5747_v32  ;;  %v514_v31 = vld [vmem:[#allocation5 + $0xa90] sm:$0xff] }
 0x111   :  { %3551 = vmatprep.subr.bf16.mxu0 %v5762_v33  ;;  %3633 = vmatprep.subr.bf16.mxu1 %v5764_v37  ;;  %v522_v32 = vld [vmem:[#allocation5 + $0xad0] sm:$0xff]  ;;  %v515_v33 = vld [vmem:[#allocation5 + $0xa98] sm:$0xff] }
 0x112   :  { %v5890_v37 = vcombine.high %v514_v31, %v522_v32  ;;  %v5892_v38 = vcombine.high %v515_v33, %v523_v34  ;;  %v5889_v44 = vcombine.low %v514_v31, %v522_v32  ;;  %v5891_v45 = vcombine.low %v515_v33, %v523_v34 }
 0x114   :  { %3552 = vmatpush1.bf16.msra.mxu0 %v5761_v39  ;;  %3634 = vmatpush1.bf16.msra.mxu1 %v5763_v40  ;;  %v530_v39 = vld [vmem:[#allocation5 + $0xb10] sm:$0xff] }
 0x115   :  { %3553 = vmatprep.subr.bf16.mxu0 %v5778_v42  ;;  %3635 = vmatprep.subr.bf16.mxu1 %v5780_v46  ;;  %v538_v40 = vld [vmem:[#allocation5 + $0xb50] sm:$0xff]  ;;  %v531_v42 = vld [vmem:[#allocation5 + $0xb18] sm:$0xff] }
 0x116   :  { %v5906_v46 = vcombine.high %v530_v39, %v538_v40  ;;  %v5908_v47 = vcombine.high %v531_v42, %v539_v43  ;;  %v5905_v52 = vcombine.low %v530_v39, %v538_v40  ;;  %v5907_v53 = vcombine.low %v531_v42, %v539_v43 }
 0x118   :  { %3554 = vmatpush1.bf16.msra.mxu0 %v5777_v48  ;;  %3636 = vmatpush1.bf16.msra.mxu1 %v5779_v49  ;;  %v546_v48 = vld [vmem:[#allocation5 + $0xb90] sm:$0xff] }
 0x119   :  { %3555 = vmatprep.subr.bf16.mxu0 %v5794_v50  ;;  %3637 = vmatprep.subr.bf16.mxu1 %v5796_v54  ;;  %v554_v49 = vld [vmem:[#allocation5 + $0xbd0] sm:$0xff]  ;;  %v547_v50 = vld [vmem:[#allocation5 + $0xb98] sm:$0xff] }
 0x11a   :  { %v5922_v54 = vcombine.high %v546_v48, %v554_v49  ;;  %v5924_v55 = vcombine.high %v547_v50, %v555_v51  ;;  %v5921_v61 = vcombine.low %v546_v48, %v554_v49  ;;  %v5923_v62 = vcombine.low %v547_v50, %v555_v51 }
 0x11c   :  { %3556 = vmatpush1.bf16.msra.mxu0 %v5793_v57  ;;  %3638 = vmatpush1.bf16.msra.mxu1 %v5795_v58  ;;  %v562_v57 = vld [vmem:[#allocation5 + $0xc10] sm:$0xff] }
 0x11d   :  { %3566 = vmatprep.subr.bf16.mxu0 %v5810_v59  ;;  %3648 = vmatprep.subr.bf16.mxu1 %v5812_v63  ;;  %v570_v58 = vld [vmem:[#allocation5 + $0xc50] sm:$0xff]  ;;  %v563_v59 = vld [vmem:[#allocation5 + $0xc18] sm:$0xff] }
 0x11e   :  { %v5938_v63 = vcombine.high %v562_v57, %v570_v58  ;;  %v5940_v0 = vcombine.high %v563_v59, %v571_v60  ;;  %v5937_v5 = vcombine.low %v562_v57, %v570_v58  ;;  %v5939_v6 = vcombine.low %v563_v59, %v571_v60 }
 0x11f   :  { %3558 = vmatmul.mubr.bf16.vlgmr.msra.gmra.mrb[4].mxu0 %v6813_v11  ;;  %3640 = vmatmul.mubr.bf16.vlgmr.msra.gmra.mrb[4].mxu1 %v6813_v11 }
 0x120   :  { %3567 = vmatpush1.bf16.msra.mxu0 %v5809_v1  ;;  %3649 = vmatpush1.bf16.msra.mxu1 %v5811_v2  ;;  %v578_v1 = vld [vmem:[#allocation5 + $0xc90] sm:$0xff] }
 0x121   :  { %3568 = vmatprep.subr.bf16.mxu0 %v5826_v3  ;;  %3650 = vmatprep.subr.bf16.mxu1 %v5828_v7  ;;  %v586_v2 = vld [vmem:[#allocation5 + $0xcd0] sm:$0xff]  ;;  %v579_v3 = vld [vmem:[#allocation5 + $0xc98] sm:$0xff] }
 0x122   :  { %3598 = vmatprep.mubr.bf16.mxu0 %v6818_v41  ;;  %3680 = vmatprep.mubr.bf16.mxu1 %v6818_v41  ;;  %v5954_v7 = vcombine.high %v578_v1, %v586_v2  ;;  %v5956_v8 = vcombine.high %v579_v3, %v587_v4  ;;  %v5953_v15 = vcombine.low %v578_v1, %v586_v2 }
 0x123   :  { %v5955_v16 = vcombine.low %v579_v3, %v587_v4 }
 0x124   :  { %3569 = vmatpush1.bf16.msra.mxu0 %v5825_v9  ;;  %3651 = vmatpush1.bf16.msra.mxu1 %v5827_v10  ;;  %v594_v9 = vld [vmem:[#allocation5 + $0xd10] sm:$0xff] }
 0x125   :  { %3570 = vmatprep.subr.bf16.mxu0 %v5842_v13  ;;  %3652 = vmatprep.subr.bf16.mxu1 %v5844_v17  ;;  %v602_v10 = vld [vmem:[#allocation5 + $0xd50] sm:$0xff]  ;;  %v595_v13 = vld [vmem:[#allocation5 + $0xd18] sm:$0xff] }
 0x126   :  { %v5970_v17 = vcombine.high %v594_v9, %v602_v10  ;;  %v5972_v18 = vcombine.high %v595_v13, %v603_v14  ;;  %v5969_v23 = vcombine.low %v594_v9, %v602_v10  ;;  %v5971_v24 = vcombine.low %v595_v13, %v603_v14 }
 0x128   :  { %3571 = vmatpush1.bf16.msra.mxu0 %v5841_v19  ;;  %3653 = vmatpush1.bf16.msra.mxu1 %v5843_v20  ;;  %v610_v19 = vld [vmem:[#allocation5 + $0xd90] sm:$0xff] }
 0x129   :  { %3572 = vmatprep.subr.bf16.mxu0 %v5858_v21  ;;  %3654 = vmatprep.subr.bf16.mxu1 %v5860_v22  ;;  %v618_v20 = vld [vmem:[#allocation5 + $0xdd0] sm:$0xff]  ;;  %v611_v21 = vld [vmem:[#allocation5 + $0xd98] sm:$0xff] }
 0x12a   :  { %v619_v22 = vld [vmem:[#allocation5 + $0xdd8] sm:$0xff]  ;;  %v5986_v25 = vcombine.high %v610_v19, %v618_v20  ;;  %v5985_v31 = vcombine.low %v610_v19, %v618_v20 }
 0x12b   :  { %v5988_v26 = vcombine.high %v611_v21, %v619_v22  ;;  %v5987_v32 = vcombine.low %v611_v21, %v619_v22 }
 0x12c   :  { %3573 = vmatpush1.bf16.msra.mxu0 %v5857_v27  ;;  %3655 = vmatpush1.bf16.msra.mxu1 %v5859_v28  ;;  %v626_v27 = vld [vmem:[#allocation5 + $0xe10] sm:$0xff] }
 0x12d   :  { %3574 = vmatprep.subr.bf16.mxu0 %v5874_v29  ;;  %3656 = vmatprep.subr.bf16.mxu1 %v5876_v30  ;;  %v634_v28 = vld [vmem:[#allocation5 + $0xe50] sm:$0xff]  ;;  %v627_v29 = vld [vmem:[#allocation5 + $0xe18] sm:$0xff] }
 0x12e   :  { %v635_v30 = vld [vmem:[#allocation5 + $0xe58] sm:$0xff]  ;;  %v6002_v33 = vcombine.high %v626_v27, %v634_v28  ;;  %v6001_v39 = vcombine.low %v626_v27, %v634_v28 }
 0x12f   :  { %v6004_v34 = vcombine.high %v627_v29, %v635_v30  ;;  %v6003_v40 = vcombine.low %v627_v29, %v635_v30 }
 0x130   :  { %3575 = vmatpush1.bf16.msra.mxu0 %v5873_v35  ;;  %3657 = vmatpush1.bf16.msra.mxu1 %v5875_v36  ;;  %v642_v35 = vld [vmem:[#allocation5 + $0xe90] sm:$0xff] }
 0x131   :  { %3576 = vmatprep.subr.bf16.mxu0 %v5890_v37  ;;  %3658 = vmatprep.subr.bf16.mxu1 %v5892_v38  ;;  %v650_v36 = vld [vmem:[#allocation5 + $0xed0] sm:$0xff]  ;;  %v643_v37 = vld [vmem:[#allocation5 + $0xe98] sm:$0xff] }
 0x132   :  { %v651_v38 = vld [vmem:[#allocation5 + $0xed8] sm:$0xff]  ;;  %v6018_v42 = vcombine.high %v642_v35, %v650_v36  ;;  %v6017_v48 = vcombine.low %v642_v35, %v650_v36 }
 0x133   :  { %v6020_v43 = vcombine.high %v643_v37, %v651_v38  ;;  %v6019_v49 = vcombine.low %v643_v37, %v651_v38 }
 0x134   :  { %3577 = vmatpush1.bf16.msra.mxu0 %v5889_v44  ;;  %3659 = vmatpush1.bf16.msra.mxu1 %v5891_v45  ;;  %v658_v44 = vld [vmem:[#allocation5 + $0xf10] sm:$0xff] }
 0x135   :  { %3578 = vmatprep.subr.bf16.mxu0 %v5906_v46  ;;  %3660 = vmatprep.subr.bf16.mxu1 %v5908_v47  ;;  %v666_v45 = vld [vmem:[#allocation5 + $0xf50] sm:$0xff]  ;;  %v659_v46 = vld [vmem:[#allocation5 + $0xf18] sm:$0xff] }
 0x136   :  { %v667_v47 = vld [vmem:[#allocation5 + $0xf58] sm:$0xff]  ;;  %v6034_v50 = vcombine.high %v658_v44, %v666_v45  ;;  %v6033_v57 = vcombine.low %v658_v44, %v666_v45 }
 0x137   :  { %v6036_v51 = vcombine.high %v659_v46, %v667_v47  ;;  %v6035_v58 = vcombine.low %v659_v46, %v667_v47 }
 0x138   :  { %3579 = vmatpush1.bf16.msra.mxu0 %v5905_v52  ;;  %3661 = vmatpush1.bf16.msra.mxu1 %v5907_v53  ;;  %v674_v52 = vld [vmem:[#allocation5 + $0xf90] sm:$0xff] }
 0x139   :  { %3580 = vmatprep.subr.bf16.mxu0 %v5922_v54  ;;  %3662 = vmatprep.subr.bf16.mxu1 %v5924_v55  ;;  %v682_v53 = vld [vmem:[#allocation5 + $0xfd0] sm:$0xff]  ;;  %v675_v54 = vld [vmem:[#allocation5 + $0xf98] sm:$0xff] }
 0x13a   :  { %v683_v55 = vld [vmem:[#allocation5 + $0xfd8] sm:$0xff]  ;;  %v6050_v59 = vcombine.high %v674_v52, %v682_v53  ;;  %v6049_v1 = vcombine.low %v674_v52, %v682_v53 }
 0x13b   :  { %v6052_v60 = vcombine.high %v675_v54, %v683_v55  ;;  %v6051_v2 = vcombine.low %v675_v54, %v683_v55 }
 0x13c   :  { %3581 = vmatpush1.bf16.msra.mxu0 %v5921_v61  ;;  %3663 = vmatpush1.bf16.msra.mxu1 %v5923_v62  ;;  %v180_v61 = vld [vmem:[#allocation5 + $0x20] sm:$0xff] }
 0x13d   :  { %3582 = vmatprep.subr.bf16.mxu0 %v5938_v63  ;;  %3664 = vmatprep.subr.bf16.mxu1 %v5940_v0  ;;  %v188_v62 = vld [vmem:[#allocation5 + $0x60] sm:$0xff]  ;;  %v181_v63 = vld [vmem:[#allocation5 + $0x28] sm:$0xff] }
 0x13e   :  { %v189_v0 = vld [vmem:[#allocation5 + $0x68] sm:$0xff]  ;;  %v5558_v3 = vcombine.high %v180_v61, %v188_v62  ;;  %v5557_v9 = vcombine.low %v180_v61, %v188_v62 }
 0x13f   :  { %v5560_v4 = vcombine.high %v181_v63, %v189_v0  ;;  %v5559_v10 = vcombine.low %v181_v63, %v189_v0 }
 0x140   :  { %3583 = vmatpush1.bf16.msra.mxu0 %v5937_v5  ;;  %3665 = vmatpush1.bf16.msra.mxu1 %v5939_v6  ;;  %v196_v5 = vld [vmem:[#allocation5 + $0xa0] sm:$0xff] }
 0x141   :  { %3584 = vmatprep.subr.bf16.mxu0 %v5954_v7  ;;  %3666 = vmatprep.subr.bf16.mxu1 %v5956_v8  ;;  %v204_v6 = vld [vmem:[#allocation5 + $0xe0] sm:$0xff]  ;;  %v197_v7 = vld [vmem:[#allocation5 + $0xa8] sm:$0xff] }
 0x142   :  { %v205_v8 = vld [vmem:[#allocation5 + $0xe8] sm:$0xff]  ;;  %v5574_v13 = vcombine.high %v196_v5, %v204_v6  ;;  %v5573_v19 = vcombine.low %v196_v5, %v204_v6 }
 0x143   :  { %v5576_v14 = vcombine.high %v197_v7, %v205_v8  ;;  %v5575_v20 = vcombine.low %v197_v7, %v205_v8 }
 0x144   :  { %3585 = vmatpush1.bf16.msra.mxu0 %v5953_v15  ;;  %3667 = vmatpush1.bf16.msra.mxu1 %v5955_v16  ;;  %v212_v15 = vld [vmem:[#allocation5 + $0x120] sm:$0xff] }
 0x145   :  { %3586 = vmatprep.subr.bf16.mxu0 %v5970_v17  ;;  %3668 = vmatprep.subr.bf16.mxu1 %v5972_v18  ;;  %v220_v16 = vld [vmem:[#allocation5 + $0x160] sm:$0xff]  ;;  %v213_v17 = vld [vmem:[#allocation5 + $0x128] sm:$0xff] }
 0x146   :  { %v221_v18 = vld [vmem:[#allocation5 + $0x168] sm:$0xff]  ;;  %v5590_v21 = vcombine.high %v212_v15, %v220_v16  ;;  %v5589_v27 = vcombine.low %v212_v15, %v220_v16 }
 0x147   :  { %v5592_v22 = vcombine.high %v213_v17, %v221_v18  ;;  %v5591_v28 = vcombine.low %v213_v17, %v221_v18 }
 0x148   :  { %3587 = vmatpush1.bf16.msra.mxu0 %v5969_v23  ;;  %3669 = vmatpush1.bf16.msra.mxu1 %v5971_v24  ;;  %v228_v23 = vld [vmem:[#allocation5 + $0x1a0] sm:$0xff] }
 0x149   :  { %3588 = vmatprep.subr.bf16.mxu0 %v5986_v25  ;;  %3670 = vmatprep.subr.bf16.mxu1 %v5988_v26  ;;  %v236_v24 = vld [vmem:[#allocation5 + $0x1e0] sm:$0xff]  ;;  %v229_v25 = vld [vmem:[#allocation5 + $0x1a8] sm:$0xff] }
 0x14a   :  { %v237_v26 = vld [vmem:[#allocation5 + $0x1e8] sm:$0xff]  ;;  %v5606_v29 = vcombine.high %v228_v23, %v236_v24  ;;  %v5605_v35 = vcombine.low %v228_v23, %v236_v24 }
 0x14b   :  { %v5608_v30 = vcombine.high %v229_v25, %v237_v26  ;;  %v5607_v36 = vcombine.low %v229_v25, %v237_v26 }
 0x14c   :  { %3589 = vmatpush1.bf16.msra.mxu0 %v5985_v31  ;;  %3671 = vmatpush1.bf16.msra.mxu1 %v5987_v32  ;;  %v244_v31 = vld [vmem:[#allocation5 + $0x220] sm:$0xff] }
 0x14d   :  { %3590 = vmatprep.subr.bf16.mxu0 %v6002_v33  ;;  %3672 = vmatprep.subr.bf16.mxu1 %v6004_v34  ;;  %v252_v32 = vld [vmem:[#allocation5 + $0x260] sm:$0xff]  ;;  %v245_v33 = vld [vmem:[#allocation5 + $0x228] sm:$0xff] }
 0x14e   :  { %v253_v34 = vld [vmem:[#allocation5 + $0x268] sm:$0xff]  ;;  %v5622_v37 = vcombine.high %v244_v31, %v252_v32  ;;  %v5621_v44 = vcombine.low %v244_v31, %v252_v32 }
 0x14f   :  { %v5624_v38 = vcombine.high %v245_v33, %v253_v34  ;;  %v5623_v45 = vcombine.low %v245_v33, %v253_v34 }
 0x150   :  { %3591 = vmatpush1.bf16.msra.mxu0 %v6001_v39  ;;  %3673 = vmatpush1.bf16.msra.mxu1 %v6003_v40  ;;  %v260_v39 = vld [vmem:[#allocation5 + $0x2a0] sm:$0xff] }
 0x151   :  { %3592 = vmatprep.subr.bf16.mxu0 %v6018_v42  ;;  %3674 = vmatprep.subr.bf16.mxu1 %v6020_v43  ;;  %v268_v40 = vld [vmem:[#allocation5 + $0x2e0] sm:$0xff]  ;;  %v261_v42 = vld [vmem:[#allocation5 + $0x2a8] sm:$0xff] }
 0x152   :  { %v269_v43 = vld [vmem:[#allocation5 + $0x2e8] sm:$0xff]  ;;  %v5638_v46 = vcombine.high %v260_v39, %v268_v40  ;;  %v5637_v52 = vcombine.low %v260_v39, %v268_v40 }
 0x153   :  { %v5640_v47 = vcombine.high %v261_v42, %v269_v43  ;;  %v5639_v53 = vcombine.low %v261_v42, %v269_v43 }
 0x154   :  { %3593 = vmatpush1.bf16.msra.mxu0 %v6017_v48  ;;  %3675 = vmatpush1.bf16.msra.mxu1 %v6019_v49  ;;  %v276_v48 = vld [vmem:[#allocation5 + $0x320] sm:$0xff] }
 0x155   :  { %3594 = vmatprep.subr.bf16.mxu0 %v6034_v50  ;;  %3676 = vmatprep.subr.bf16.mxu1 %v6036_v51  ;;  %v284_v49 = vld [vmem:[#allocation5 + $0x360] sm:$0xff]  ;;  %v277_v50 = vld [vmem:[#allocation5 + $0x328] sm:$0xff] }
 0x156   :  { %v285_v51 = vld [vmem:[#allocation5 + $0x368] sm:$0xff]  ;;  %v5654_v54 = vcombine.high %v276_v48, %v284_v49  ;;  %v5653_v61 = vcombine.low %v276_v48, %v284_v49 }
 0x157   :  { %v5656_v55 = vcombine.high %v277_v50, %v285_v51  ;;  %v5655_v62 = vcombine.low %v277_v50, %v285_v51 }
 0x158   :  { %3595 = vmatpush1.bf16.msra.mxu0 %v6033_v57  ;;  %3677 = vmatpush1.bf16.msra.mxu1 %v6035_v58  ;;  %v292_v57 = vld [vmem:[#allocation5 + $0x3a0] sm:$0xff] }
 0x159   :  { %3596 = vmatprep.subr.bf16.mxu0 %v6050_v59  ;;  %3678 = vmatprep.subr.bf16.mxu1 %v6052_v60  ;;  %v300_v58 = vld [vmem:[#allocation5 + $0x3e0] sm:$0xff]  ;;  %v293_v59 = vld [vmem:[#allocation5 + $0x3a8] sm:$0xff] }
 0x15a   :  { %v301_v60 = vld [vmem:[#allocation5 + $0x3e8] sm:$0xff]  ;;  %v5670_v63 = vcombine.high %v292_v57, %v300_v58  ;;  %v5669_v5 = vcombine.low %v292_v57, %v300_v58 }
 0x15b   :  { %v5672_v0 = vcombine.high %v293_v59, %v301_v60  ;;  %v5671_v6 = vcombine.low %v293_v59, %v301_v60 }
 0x15c   :  { %3597 = vmatpush1.bf16.msra.mxu0 %v6049_v1  ;;  %3679 = vmatpush1.bf16.msra.mxu1 %v6051_v2  ;;  %v308_v1 = vld [vmem:[#allocation5 + $0x420] sm:$0xff] }
 0x15d   :  { %3689 = vmatprep.subr.bf16.mxu0 %v5558_v3  ;;  %3771 = vmatprep.subr.bf16.mxu1 %v5560_v4  ;;  %v316_v2 = vld [vmem:[#allocation5 + $0x460] sm:$0xff]  ;;  %v309_v3 = vld [vmem:[#allocation5 + $0x428] sm:$0xff] }
 0x15e   :  { %v317_v4 = vld [vmem:[#allocation5 + $0x468] sm:$0xff]  ;;  %v5686_v7 = vcombine.high %v308_v1, %v316_v2  ;;  %v5685_v15 = vcombine.low %v308_v1, %v316_v2 }
 0x15f   :  { %3599 = vmatmul.mubr.bf16.vlgmr.msra.gmra.mrb[4].mxu0 %v6823_v56  ;;  %3681 = vmatmul.mubr.bf16.vlgmr.msra.gmra.mrb[4].mxu1 %v6823_v56  ;;  %v5688_v8 = vcombine.high %v309_v3, %v317_v4  ;;  %v5687_v16 = vcombine.low %v309_v3, %v317_v4 }
 0x160   :  { %3690 = vmatpush1.bf16.msra.mxu0 %v5557_v9  ;;  %3772 = vmatpush1.bf16.msra.mxu1 %v5559_v10  ;;  %v324_v9 = vld [vmem:[#allocation5 + $0x4a0] sm:$0xff] }
 0x161   :  { %3691 = vmatprep.subr.bf16.mxu0 %v5574_v13  ;;  %3773 = vmatprep.subr.bf16.mxu1 %v5576_v14  ;;  %v332_v10 = vld [vmem:[#allocation5 + $0x4e0] sm:$0xff]  ;;  %v325_v13 = vld [vmem:[#allocation5 + $0x4a8] sm:$0xff] }
 0x162   :  { %3721 = vmatprep.mubr.bf16.mxu0 %v6808_v12  ;;  %3803 = vmatprep.mubr.bf16.mxu1 %v6808_v12  ;;  %v333_v14 = vld [vmem:[#allocation5 + $0x4e8] sm:$0xff]  ;;  %v5702_v17 = vcombine.high %v324_v9, %v332_v10  ;;  %v5701_v23 = vcombine.low %v324_v9, %v332_v10 }
 0x163   :  { %v5704_v18 = vcombine.high %v325_v13, %v333_v14  ;;  %v5703_v24 = vcombine.low %v325_v13, %v333_v14 }
 0x164   :  { %3692 = vmatpush1.bf16.msra.mxu0 %v5573_v19  ;;  %3774 = vmatpush1.bf16.msra.mxu1 %v5575_v20  ;;  %v340_v19 = vld [vmem:[#allocation5 + $0x520] sm:$0xff] }
 0x165   :  { %3693 = vmatprep.subr.bf16.mxu0 %v5590_v21  ;;  %3775 = vmatprep.subr.bf16.mxu1 %v5592_v22  ;;  %v348_v20 = vld [vmem:[#allocation5 + $0x560] sm:$0xff]  ;;  %v341_v21 = vld [vmem:[#allocation5 + $0x528] sm:$0xff] }
 0x166   :  { %v349_v22 = vld [vmem:[#allocation5 + $0x568] sm:$0xff]  ;;  %v5718_v25 = vcombine.high %v340_v19, %v348_v20  ;;  %v5717_v31 = vcombine.low %v340_v19, %v348_v20 }
 0x167   :  { %v5720_v26 = vcombine.high %v341_v21, %v349_v22  ;;  %v5719_v32 = vcombine.low %v341_v21, %v349_v22 }
 0x168   :  { %3694 = vmatpush1.bf16.msra.mxu0 %v5589_v27  ;;  %3776 = vmatpush1.bf16.msra.mxu1 %v5591_v28  ;;  %v356_v27 = vld [vmem:[#allocation5 + $0x5a0] sm:$0xff] }
 0x169   :  { %3695 = vmatprep.subr.bf16.mxu0 %v5606_v29  ;;  %3777 = vmatprep.subr.bf16.mxu1 %v5608_v30  ;;  %v364_v28 = vld [vmem:[#allocation5 + $0x5e0] sm:$0xff]  ;;  %v357_v29 = vld [vmem:[#allocation5 + $0x5a8] sm:$0xff] }
 0x16a   :  { %v365_v30 = vld [vmem:[#allocation5 + $0x5e8] sm:$0xff]  ;;  %v5734_v33 = vcombine.high %v356_v27, %v364_v28  ;;  %v5733_v39 = vcombine.low %v356_v27, %v364_v28 }
 0x16b   :  { %v5736_v34 = vcombine.high %v357_v29, %v365_v30  ;;  %v5735_v40 = vcombine.low %v357_v29, %v365_v30 }
 0x16c   :  { %3696 = vmatpush1.bf16.msra.mxu0 %v5605_v35  ;;  %3778 = vmatpush1.bf16.msra.mxu1 %v5607_v36  ;;  %v372_v35 = vld [vmem:[#allocation5 + $0x620] sm:$0xff] }
 0x16d   :  { %3697 = vmatprep.subr.bf16.mxu0 %v5622_v37  ;;  %3779 = vmatprep.subr.bf16.mxu1 %v5624_v38  ;;  %v380_v36 = vld [vmem:[#allocation5 + $0x660] sm:$0xff]  ;;  %v373_v37 = vld [vmem:[#allocation5 + $0x628] sm:$0xff] }
 0x16e   :  { %v381_v38 = vld [vmem:[#allocation5 + $0x668] sm:$0xff]  ;;  %v5750_v42 = vcombine.high %v372_v35, %v380_v36  ;;  %v5749_v48 = vcombine.low %v372_v35, %v380_v36 }
 0x16f   :  { %v5752_v43 = vcombine.high %v373_v37, %v381_v38  ;;  %v5751_v49 = vcombine.low %v373_v37, %v381_v38 }
 0x170   :  { %3698 = vmatpush1.bf16.msra.mxu0 %v5621_v44  ;;  %3780 = vmatpush1.bf16.msra.mxu1 %v5623_v45  ;;  %v388_v44 = vld [vmem:[#allocation5 + $0x6a0] sm:$0xff] }
 0x171   :  { %3699 = vmatprep.subr.bf16.mxu0 %v5638_v46  ;;  %3781 = vmatprep.subr.bf16.mxu1 %v5640_v47  ;;  %v396_v45 = vld [vmem:[#allocation5 + $0x6e0] sm:$0xff]  ;;  %v389_v46 = vld [vmem:[#allocation5 + $0x6a8] sm:$0xff] }
 0x172   :  { %v397_v47 = vld [vmem:[#allocation5 + $0x6e8] sm:$0xff]  ;;  %v5766_v50 = vcombine.high %v388_v44, %v396_v45  ;;  %v5765_v57 = vcombine.low %v388_v44, %v396_v45 }
 0x173   :  { %v5768_v51 = vcombine.high %v389_v46, %v397_v47  ;;  %v5767_v58 = vcombine.low %v389_v46, %v397_v47 }
 0x174   :  { %3700 = vmatpush1.bf16.msra.mxu0 %v5637_v52  ;;  %3782 = vmatpush1.bf16.msra.mxu1 %v5639_v53  ;;  %v404_v52 = vld [vmem:[#allocation5 + $0x720] sm:$0xff] }
 0x175   :  { %3701 = vmatprep.subr.bf16.mxu0 %v5654_v54  ;;  %3783 = vmatprep.subr.bf16.mxu1 %v5656_v55  ;;  %v412_v53 = vld [vmem:[#allocation5 + $0x760] sm:$0xff]  ;;  %v405_v54 = vld [vmem:[#allocation5 + $0x728] sm:$0xff] }
 0x176   :  { %v413_v55 = vld [vmem:[#allocation5 + $0x768] sm:$0xff]  ;;  %v5782_v59 = vcombine.high %v404_v52, %v412_v53  ;;  %v5781_v1 = vcombine.low %v404_v52, %v412_v53 }
 0x177   :  { %v5784_v60 = vcombine.high %v405_v54, %v413_v55  ;;  %v5783_v2 = vcombine.low %v405_v54, %v413_v55 }
 0x178   :  { %3702 = vmatpush1.bf16.msra.mxu0 %v5653_v61  ;;  %3784 = vmatpush1.bf16.msra.mxu1 %v5655_v62  ;;  %v420_v61 = vld [vmem:[#allocation5 + $0x7a0] sm:$0xff] }
 0x179   :  { %3703 = vmatprep.subr.bf16.mxu0 %v5670_v63  ;;  %3785 = vmatprep.subr.bf16.mxu1 %v5672_v0  ;;  %v428_v62 = vld [vmem:[#allocation5 + $0x7e0] sm:$0xff]  ;;  %v421_v63 = vld [vmem:[#allocation5 + $0x7a8] sm:$0xff] }
 0x17a   :  { %v429_v0 = vld [vmem:[#allocation5 + $0x7e8] sm:$0xff]  ;;  %v5798_v3 = vcombine.high %v420_v61, %v428_v62  ;;  %v5797_v9 = vcombine.low %v420_v61, %v428_v62 }
 0x17b   :  { %v5800_v4 = vcombine.high %v421_v63, %v429_v0  ;;  %v5799_v10 = vcombine.low %v421_v63, %v429_v0 }
 0x17c   :  { %3704 = vmatpush1.bf16.msra.mxu0 %v5669_v5  ;;  %3786 = vmatpush1.bf16.msra.mxu1 %v5671_v6  ;;  %v436_v5 = vld [vmem:[#allocation5 + $0x820] sm:$0xff] }
 0x17d   :  { %3705 = vmatprep.subr.bf16.mxu0 %v5686_v7  ;;  %3787 = vmatprep.subr.bf16.mxu1 %v5688_v8  ;;  %v444_v6 = vld [vmem:[#allocation5 + $0x860] sm:$0xff]  ;;  %v437_v7 = vld [vmem:[#allocation5 + $0x828] sm:$0xff] }
 0x17e   :  { %v445_v8 = vld [vmem:[#allocation5 + $0x868] sm:$0xff]  ;;  %v5814_v13 = vcombine.high %v436_v5, %v444_v6  ;;  %v5813_v19 = vcombine.low %v436_v5, %v444_v6 }
 0x17f   :  { %v5816_v14 = vcombine.high %v437_v7, %v445_v8  ;;  %v5815_v20 = vcombine.low %v437_v7, %v445_v8  ;;  %v549_v6 = vld [vmem:[#allocation5 + $0xba8] sm:$0xff] }
 0x180   :  { %3706 = vmatpush1.bf16.msra.mxu0 %v5685_v15  ;;  %3788 = vmatpush1.bf16.msra.mxu1 %v5687_v16  ;;  %v452_v15 = vld [vmem:[#allocation5 + $0x8a0] sm:$0xff]  ;;  %v557_v7 = vld [vmem:[#allocation5 + $0xbe8] sm:$0xff] }
 0x181   :  { %3707 = vmatprep.subr.bf16.mxu0 %v5702_v17  ;;  %3789 = vmatprep.subr.bf16.mxu1 %v5704_v18  ;;  %v460_v16 = vld [vmem:[#allocation5 + $0x8e0] sm:$0xff]  ;;  %v453_v17 = vld [vmem:[#allocation5 + $0x8a8] sm:$0xff] }
 0x182   :  { %v461_v18 = vld [vmem:[#allocation5 + $0x8e8] sm:$0xff]  ;;  %v5830_v21 = vcombine.high %v452_v15, %v460_v16  ;;  %v5829_v27 = vcombine.low %v452_v15, %v460_v16 }
 0x183   :  { %v5832_v22 = vcombine.high %v453_v17, %v461_v18  ;;  %v5831_v28 = vcombine.low %v453_v17, %v461_v18  ;;  %v5928_v18 = vcombine.high %v549_v6, %v557_v7 }
 0x184   :  { %3708 = vmatpush1.bf16.msra.mxu0 %v5701_v23  ;;  %3790 = vmatpush1.bf16.msra.mxu1 %v5703_v24  ;;  %v468_v23 = vld [vmem:[#allocation5 + $0x920] sm:$0xff] }
 0x185   :  { %3709 = vmatprep.subr.bf16.mxu0 %v5718_v25  ;;  %3791 = vmatprep.subr.bf16.mxu1 %v5720_v26  ;;  %v476_v24 = vld [vmem:[#allocation5 + $0x960] sm:$0xff]  ;;  %v469_v25 = vld [vmem:[#allocation5 + $0x928] sm:$0xff] }
 0x186   :  { %v477_v26 = vld [vmem:[#allocation5 + $0x968] sm:$0xff]  ;;  %v5846_v29 = vcombine.high %v468_v23, %v476_v24  ;;  %v5845_v35 = vcombine.low %v468_v23, %v476_v24  ;;  %v5927_v24 = vcombine.low %v549_v6, %v557_v7 }
 0x187   :  { %v5848_v30 = vcombine.high %v469_v25, %v477_v26  ;;  %v5847_v36 = vcombine.low %v469_v25, %v477_v26 }
 0x188   :  { %3710 = vmatpush1.bf16.msra.mxu0 %v5717_v31  ;;  %3792 = vmatpush1.bf16.msra.mxu1 %v5719_v32  ;;  %v484_v31 = vld [vmem:[#allocation5 + $0x9a0] sm:$0xff] }
 0x189   :  { %3711 = vmatprep.subr.bf16.mxu0 %v5734_v33  ;;  %3793 = vmatprep.subr.bf16.mxu1 %v5736_v34  ;;  %v492_v32 = vld [vmem:[#allocation5 + $0x9e0] sm:$0xff]  ;;  %v485_v33 = vld [vmem:[#allocation5 + $0x9a8] sm:$0xff] }
 0x18a   :  { %v493_v34 = vld [vmem:[#allocation5 + $0x9e8] sm:$0xff]  ;;  %v5862_v37 = vcombine.high %v484_v31, %v492_v32  ;;  %v5861_v44 = vcombine.low %v484_v31, %v492_v32 }
 0x18b   :  { %v5864_v38 = vcombine.high %v485_v33, %v493_v34  ;;  %v5863_v45 = vcombine.low %v485_v33, %v493_v34 }
 0x18c   :  { %3712 = vmatpush1.bf16.msra.mxu0 %v5733_v39  ;;  %3794 = vmatpush1.bf16.msra.mxu1 %v5735_v40  ;;  %v500_v39 = vld [vmem:[#allocation5 + $0xa20] sm:$0xff] }
 0x18d   :  { %3713 = vmatprep.subr.bf16.mxu0 %v5750_v42  ;;  %3795 = vmatprep.subr.bf16.mxu1 %v5752_v43  ;;  %v508_v40 = vld [vmem:[#allocation5 + $0xa60] sm:$0xff]  ;;  %v501_v42 = vld [vmem:[#allocation5 + $0xa28] sm:$0xff] }
 0x18e   :  { %v509_v43 = vld [vmem:[#allocation5 + $0xa68] sm:$0xff]  ;;  %v5878_v46 = vcombine.high %v500_v39, %v508_v40  ;;  %v5877_v52 = vcombine.low %v500_v39, %v508_v40 }
 0x18f   :  { %v5880_v47 = vcombine.high %v501_v42, %v509_v43  ;;  %v5879_v53 = vcombine.low %v501_v42, %v509_v43 }
 0x190   :  { %3714 = vmatpush1.bf16.msra.mxu0 %v5749_v48  ;;  %3796 = vmatpush1.bf16.msra.mxu1 %v5751_v49  ;;  %v516_v48 = vld [vmem:[#allocation5 + $0xaa0] sm:$0xff] }
 0x191   :  { %3715 = vmatprep.subr.bf16.mxu0 %v5766_v50  ;;  %3797 = vmatprep.subr.bf16.mxu1 %v5768_v51  ;;  %v524_v49 = vld [vmem:[#allocation5 + $0xae0] sm:$0xff]  ;;  %v517_v50 = vld [vmem:[#allocation5 + $0xaa8] sm:$0xff] }
 0x192   :  { %v525_v51 = vld [vmem:[#allocation5 + $0xae8] sm:$0xff]  ;;  %v5894_v54 = vcombine.high %v516_v48, %v524_v49  ;;  %v5893_v61 = vcombine.low %v516_v48, %v524_v49 }
 0x193   :  { %v5896_v55 = vcombine.high %v517_v50, %v525_v51  ;;  %v5895_v62 = vcombine.low %v517_v50, %v525_v51 }
 0x194   :  { %3716 = vmatpush1.bf16.msra.mxu0 %v5765_v57  ;;  %3798 = vmatpush1.bf16.msra.mxu1 %v5767_v58  ;;  %v532_v57 = vld [vmem:[#allocation5 + $0xb20] sm:$0xff] }
 0x195   :  { %3717 = vmatprep.subr.bf16.mxu0 %v5782_v59  ;;  %3799 = vmatprep.subr.bf16.mxu1 %v5784_v60  ;;  %v540_v58 = vld [vmem:[#allocation5 + $0xb60] sm:$0xff]  ;;  %v533_v59 = vld [vmem:[#allocation5 + $0xb28] sm:$0xff] }
 0x196   :  { %v541_v60 = vld [vmem:[#allocation5 + $0xb68] sm:$0xff]  ;;  %v5910_v63 = vcombine.high %v532_v57, %v540_v58 }
 0x197   :  { %v5911_v15 = vcombine.low %v533_v59, %v541_v60 }
 0x198   :  { %3718 = vmatpush1.bf16.msra.mxu0 %v5781_v1  ;;  %3800 = vmatpush1.bf16.msra.mxu1 %v5783_v2  ;;  %v5912_v1 = vcombine.high %v533_v59, %v541_v60  ;;  %v548_v2 = vld [vmem:[#allocation5 + $0xba0] sm:$0xff] }
 0x199   :  { %3719 = vmatprep.subr.bf16.mxu0 %v5798_v3  ;;  %3801 = vmatprep.subr.bf16.mxu1 %v5800_v4  ;;  %v556_v3 = vld [vmem:[#allocation5 + $0xbe0] sm:$0xff] }
 0x19a   :  { %v5926_v16 = vcombine.high %v548_v2, %v556_v3  ;;  %v5925_v23 = vcombine.low %v548_v2, %v556_v3 }
 0x19c   :  { %3720 = vmatpush1.bf16.msra.mxu0 %v5797_v9  ;;  %3802 = vmatpush1.bf16.msra.mxu1 %v5799_v10  ;;  %v5909_v10 = vcombine.low %v532_v57, %v540_v58 }
 0x19d   :  { %3730 = vmatprep.subr.bf16.mxu0 %v5814_v13  ;;  %3812 = vmatprep.subr.bf16.mxu1 %v5816_v14 }
 0x19f   :  { %3722 = vmatmul.mubr.bf16.vlgmr.msra.gmra.mrb[8].mxu0 %v6813_v11  ;;  %3804 = vmatmul.mubr.bf16.vlgmr.msra.gmra.mrb[8].mxu1 %v6813_v11 }
 0x1a0   :  { %3731 = vmatpush1.bf16.msra.mxu0 %v5813_v19  ;;  %3813 = vmatpush1.bf16.msra.mxu1 %v5815_v20  ;;  %v564_v19 = vld [vmem:[#allocation5 + $0xc20] sm:$0xff] }
 0x1a1   :  { %3732 = vmatprep.subr.bf16.mxu0 %v5830_v21  ;;  %3814 = vmatprep.subr.bf16.mxu1 %v5832_v22  ;;  %v572_v20 = vld [vmem:[#allocation5 + $0xc60] sm:$0xff]  ;;  %v565_v21 = vld [vmem:[#allocation5 + $0xc28] sm:$0xff] }
 0x1a2   :  { %3762 = vmatprep.mubr.bf16.mxu0 %v6818_v41  ;;  %3844 = vmatprep.mubr.bf16.mxu1 %v6818_v41  ;;  %v573_v22 = vld [vmem:[#allocation5 + $0xc68] sm:$0xff]  ;;  %v5942_v25 = vcombine.high %v564_v19, %v572_v20  ;;  %v5941_v31 = vcombine.low %v564_v19, %v572_v20  ;;  %v676_v19 = vld [vmem:[#allocation5 + $0xfa0] sm:$0xff] }
 0x1a3   :  { %v5944_v26 = vcombine.high %v565_v21, %v573_v22  ;;  %v5943_v32 = vcombine.low %v565_v21, %v573_v22  ;;  %v684_v20 = vld [vmem:[#allocation5 + $0xfe0] sm:$0xff]  ;;  %v677_v21 = vld [vmem:[#allocation5 + $0xfa8] sm:$0xff] }
 0x1a4   :  { %3733 = vmatpush1.bf16.msra.mxu0 %v5829_v27  ;;  %3815 = vmatpush1.bf16.msra.mxu1 %v5831_v28  ;;  %v580_v27 = vld [vmem:[#allocation5 + $0xca0] sm:$0xff]  ;;  %v685_v22 = vld [vmem:[#allocation5 + $0xfe8] sm:$0xff] }
 0x1a5   :  { %3734 = vmatprep.subr.bf16.mxu0 %v5846_v29  ;;  %3816 = vmatprep.subr.bf16.mxu1 %v5848_v30  ;;  %v588_v28 = vld [vmem:[#allocation5 + $0xce0] sm:$0xff]  ;;  %v581_v29 = vld [vmem:[#allocation5 + $0xca8] sm:$0xff] }
 0x1a6   :  { %v589_v30 = vld [vmem:[#allocation5 + $0xce8] sm:$0xff]  ;;  %v5958_v33 = vcombine.high %v580_v27, %v588_v28  ;;  %v5957_v39 = vcombine.low %v580_v27, %v588_v28  ;;  %v182_v27 = vld [vmem:[#allocation5 + $0x30] sm:$0xff] }
 0x1a7   :  { %v5960_v34 = vcombine.high %v581_v29, %v589_v30  ;;  %v5959_v40 = vcombine.low %v581_v29, %v589_v30  ;;  %v190_v28 = vld [vmem:[#allocation5 + $0x70] sm:$0xff]  ;;  %v183_v29 = vld [vmem:[#allocation5 + $0x38] sm:$0xff] }
 0x1a8   :  { %3735 = vmatpush1.bf16.msra.mxu0 %v5845_v35  ;;  %3817 = vmatpush1.bf16.msra.mxu1 %v5847_v36  ;;  %v596_v35 = vld [vmem:[#allocation5 + $0xd20] sm:$0xff]  ;;  %v191_v30 = vld [vmem:[#allocation5 + $0x78] sm:$0xff] }
 0x1a9   :  { %3736 = vmatprep.subr.bf16.mxu0 %v5862_v37  ;;  %3818 = vmatprep.subr.bf16.mxu1 %v5864_v38  ;;  %v604_v36 = vld [vmem:[#allocation5 + $0xd60] sm:$0xff]  ;;  %v597_v37 = vld [vmem:[#allocation5 + $0xd28] sm:$0xff] }
 0x1aa   :  { %v605_v38 = vld [vmem:[#allocation5 + $0xd68] sm:$0xff]  ;;  %v5974_v42 = vcombine.high %v596_v35, %v604_v36  ;;  %v5973_v48 = vcombine.low %v596_v35, %v604_v36  ;;  %v198_v35 = vld [vmem:[#allocation5 + $0xb0] sm:$0xff] }
 0x1ab   :  { %v5976_v43 = vcombine.high %v597_v37, %v605_v38  ;;  %v5975_v49 = vcombine.low %v597_v37, %v605_v38  ;;  %v206_v36 = vld [vmem:[#allocation5 + $0xf0] sm:$0xff]  ;;  %v199_v37 = vld [vmem:[#allocation5 + $0xb8] sm:$0xff] }
 0x1ac   :  { %3737 = vmatpush1.bf16.msra.mxu0 %v5861_v44  ;;  %3819 = vmatpush1.bf16.msra.mxu1 %v5863_v45  ;;  %v612_v44 = vld [vmem:[#allocation5 + $0xda0] sm:$0xff]  ;;  %v207_v38 = vld [vmem:[#allocation5 + $0xf8] sm:$0xff] }
 0x1ad   :  { %3738 = vmatprep.subr.bf16.mxu0 %v5878_v46  ;;  %3820 = vmatprep.subr.bf16.mxu1 %v5880_v47  ;;  %v620_v45 = vld [vmem:[#allocation5 + $0xde0] sm:$0xff]  ;;  %v613_v46 = vld [vmem:[#allocation5 + $0xda8] sm:$0xff] }
 0x1ae   :  { %v621_v47 = vld [vmem:[#allocation5 + $0xde8] sm:$0xff]  ;;  %v5990_v50 = vcombine.high %v612_v44, %v620_v45  ;;  %v5989_v57 = vcombine.low %v612_v44, %v620_v45  ;;  %v214_v44 = vld [vmem:[#allocation5 + $0x130] sm:$0xff] }
 0x1af   :  { %v5992_v51 = vcombine.high %v613_v46, %v621_v47  ;;  %v5991_v58 = vcombine.low %v613_v46, %v621_v47  ;;  %v222_v45 = vld [vmem:[#allocation5 + $0x170] sm:$0xff]  ;;  %v215_v46 = vld [vmem:[#allocation5 + $0x138] sm:$0xff] }
 0x1b0   :  { %3739 = vmatpush1.bf16.msra.mxu0 %v5877_v52  ;;  %3821 = vmatpush1.bf16.msra.mxu1 %v5879_v53  ;;  %v628_v52 = vld [vmem:[#allocation5 + $0xe20] sm:$0xff]  ;;  %v223_v47 = vld [vmem:[#allocation5 + $0x178] sm:$0xff] }
 0x1b1   :  { %3740 = vmatprep.subr.bf16.mxu0 %v5894_v54  ;;  %3822 = vmatprep.subr.bf16.mxu1 %v5896_v55  ;;  %v636_v53 = vld [vmem:[#allocation5 + $0xe60] sm:$0xff]  ;;  %v629_v54 = vld [vmem:[#allocation5 + $0xe28] sm:$0xff] }
 0x1b2   :  { %v6841_v0 = vpop.f32.mrb[0].mxu0  ;;  %v6843_v4 = vpop.f32.mrb[0].mxu1  ;;  %v637_v55 = vld [vmem:[#allocation5 + $0xe68] sm:$0xff]  ;;  %v6006_v59 = vcombine.high %v628_v52, %v636_v53  ;;  %v6005_v2 = vcombine.low %v628_v52, %v636_v53  ;;  %v230_v52 = vld [vmem:[#allocation5 + $0x1b0] sm:$0xff] }
 0x1b3   :  { %v6845_v5 = vpop.f32.mrb[1].mxu0  ;;  %v6847_v8 = vpop.f32.mrb[1].mxu1  ;;  %v6008_v60 = vcombine.high %v629_v54, %v637_v55  ;;  %v6007_v3 = vcombine.low %v629_v54, %v637_v55  ;;  %v238_v53 = vld [vmem:[#allocation5 + $0x1f0] sm:$0xff]  ;;  %v231_v54 = vld [vmem:[#allocation5 + $0x1b8] sm:$0xff] }
 0x1b4   :  { %v3440_v9 = vpop.f32.mrb[2].mxu0  ;;  %3741 = vmatpush1.bf16.msra.mxu0 %v5893_v61  ;;  %v3522_v13 = vpop.f32.mrb[2].mxu1  ;;  %3823 = vmatpush1.bf16.msra.mxu1 %v5895_v62  ;;  %v644_v61 = vld [vmem:[#allocation5 + $0xea0] sm:$0xff]  ;;  %v239_v55 = vld [vmem:[#allocation5 + $0x1f8] sm:$0xff] }
 0x1b5   :  { %v3441_v14 = vpop.f32.mrb[3].mxu0  ;;  %3742 = vmatprep.subr.bf16.mxu0 %v5910_v63  ;;  %v3523_v17 = vpop.f32.mrb[3].mxu1  ;;  %3824 = vmatprep.subr.bf16.mxu1 %v5912_v1  ;;  %v652_v62 = vld [vmem:[#allocation5 + $0xee0] sm:$0xff]  ;;  %v645_v63 = vld [vmem:[#allocation5 + $0xea8] sm:$0xff] }
 0x1b6   :  { %v653_v1 = vld [vmem:[#allocation5 + $0xee8] sm:$0xff]  ;;  %v6022_v6 = vcombine.high %v644_v61, %v652_v62  ;;  %v660_v9 = vld [vmem:[#allocation5 + $0xf20] sm:$0xff] }
 0x1b7   :  { %v6024_v7 = vcombine.high %v645_v63, %v653_v1  ;;  %v661_v13 = vld [vmem:[#allocation5 + $0xf28] sm:$0xff] }
 0x1b8   :  { %3743 = vmatpush1.bf16.msra.mxu0 %v5909_v10  ;;  %3825 = vmatpush1.bf16.msra.mxu1 %v5911_v15  ;;  %v668_v10 = vld [vmem:[#allocation5 + $0xf60] sm:$0xff]  ;;  %v669_v14 = vld [vmem:[#allocation5 + $0xf68] sm:$0xff]  ;;  %v6021_v15 = vcombine.low %v644_v61, %v652_v62  ;;  %v246_v61 = vld [vmem:[#allocation5 + $0x230] sm:$0xff] }
 0x1b9   :  { %3744 = vmatprep.subr.bf16.mxu0 %v5926_v16  ;;  %3826 = vmatprep.subr.bf16.mxu1 %v5928_v18  ;;  %v6023_v16 = vcombine.low %v645_v63, %v653_v1  ;;  %v6038_v17 = vcombine.high %v660_v9, %v668_v10  ;;  %v6040_v18 = vcombine.high %v661_v13, %v669_v14  ;;  %v254_v62 = vld [vmem:[#allocation5 + $0x270] sm:$0xff]  ;;  %v247_v63 = vld [vmem:[#allocation5 + $0x238] sm:$0xff] }
 0x1ba   :  { %v255_v1 = vld [vmem:[#allocation5 + $0x278] sm:$0xff] }
 0x1bc   :  { %3745 = vmatpush1.bf16.msra.mxu0 %v5925_v23  ;;  %3827 = vmatpush1.bf16.msra.mxu1 %v5927_v24  ;;  %v6037_v23 = vcombine.low %v660_v9, %v668_v10  ;;  %v6039_v24 = vcombine.low %v661_v13, %v669_v14  ;;  %v270_v9 = vld [vmem:[#allocation5 + $0x2f0] sm:$0xff]  ;;  %v263_v10 = vld [vmem:[#allocation5 + $0x2b8] sm:$0xff]  ;;  %v5625_v14 = vcombine.low %v246_v61, %v254_v62 }
 0x1bd   :  { %3746 = vmatprep.subr.bf16.mxu0 %v5942_v25  ;;  %3828 = vmatprep.subr.bf16.mxu1 %v5944_v26  ;;  %v6054_v25 = vcombine.high %v676_v19, %v684_v20  ;;  %v6056_v26 = vcombine.high %v677_v21, %v685_v22  ;;  %v271_v13 = vld [vmem:[#allocation5 + $0x2f8] sm:$0xff] }
 0x1c0   :  { %3747 = vmatpush1.bf16.msra.mxu0 %v5941_v31  ;;  %3829 = vmatpush1.bf16.msra.mxu1 %v5943_v32  ;;  %v6053_v31 = vcombine.low %v676_v19, %v684_v20  ;;  %v6055_v32 = vcombine.low %v677_v21, %v685_v22  ;;  %v286_v19 = vld [vmem:[#allocation5 + $0x370] sm:$0xff]  ;;  %v279_v20 = vld [vmem:[#allocation5 + $0x338] sm:$0xff] }
 0x1c1   :  { %3748 = vmatprep.subr.bf16.mxu0 %v5958_v33  ;;  %3830 = vmatprep.subr.bf16.mxu1 %v5960_v34  ;;  %v5562_v33 = vcombine.high %v182_v27, %v190_v28  ;;  %v5564_v34 = vcombine.high %v183_v29, %v191_v30  ;;  %v287_v21 = vld [vmem:[#allocation5 + $0x378] sm:$0xff] }
 0x1c4   :  { %3749 = vmatpush1.bf16.msra.mxu0 %v5957_v39  ;;  %3831 = vmatpush1.bf16.msra.mxu1 %v5959_v40  ;;  %v5561_v39 = vcombine.low %v182_v27, %v190_v28  ;;  %v5563_v40 = vcombine.low %v183_v29, %v191_v30  ;;  %v302_v27 = vld [vmem:[#allocation5 + $0x3f0] sm:$0xff]  ;;  %v295_v28 = vld [vmem:[#allocation5 + $0x3b8] sm:$0xff] }
 0x1c5   :  { %3750 = vmatprep.subr.bf16.mxu0 %v5974_v42  ;;  %3832 = vmatprep.subr.bf16.mxu1 %v5976_v43  ;;  %v5578_v42 = vcombine.high %v198_v35, %v206_v36  ;;  %v5580_v43 = vcombine.high %v199_v37, %v207_v38  ;;  %v303_v29 = vld [vmem:[#allocation5 + $0x3f8] sm:$0xff] }
 0x1c8   :  { %3751 = vmatpush1.bf16.msra.mxu0 %v5973_v48  ;;  %3833 = vmatpush1.bf16.msra.mxu1 %v5975_v49  ;;  %v5577_v48 = vcombine.low %v198_v35, %v206_v36  ;;  %v5579_v49 = vcombine.low %v199_v37, %v207_v38  ;;  %v318_v35 = vld [vmem:[#allocation5 + $0x470] sm:$0xff]  ;;  %v311_v36 = vld [vmem:[#allocation5 + $0x438] sm:$0xff] }
 0x1c9   :  { %3752 = vmatprep.subr.bf16.mxu0 %v5990_v50  ;;  %3834 = vmatprep.subr.bf16.mxu1 %v5992_v51  ;;  %v5594_v50 = vcombine.high %v214_v44, %v222_v45  ;;  %v5596_v51 = vcombine.high %v215_v46, %v223_v47  ;;  %v319_v37 = vld [vmem:[#allocation5 + $0x478] sm:$0xff] }
 0x1cc   :  { %3753 = vmatpush1.bf16.msra.mxu0 %v5989_v57  ;;  %3835 = vmatpush1.bf16.msra.mxu1 %v5991_v58  ;;  %v5593_v57 = vcombine.low %v214_v44, %v222_v45  ;;  %v5595_v58 = vcombine.low %v215_v46, %v223_v47  ;;  %v334_v44 = vld [vmem:[#allocation5 + $0x4f0] sm:$0xff]  ;;  %v327_v45 = vld [vmem:[#allocation5 + $0x4b8] sm:$0xff] }
 0x1cd   :  { %3754 = vmatprep.subr.bf16.mxu0 %v6006_v59  ;;  %3836 = vmatprep.subr.bf16.mxu1 %v6008_v60  ;;  %v5610_v59 = vcombine.high %v230_v52, %v238_v53  ;;  %v5612_v60 = vcombine.high %v231_v54, %v239_v55  ;;  %v335_v46 = vld [vmem:[#allocation5 + $0x4f8] sm:$0xff] }
 0x1d0   :  { %3755 = vmatpush1.bf16.msra.mxu0 %v6005_v2  ;;  %3837 = vmatpush1.bf16.msra.mxu1 %v6007_v3  ;;  %v5609_v2 = vcombine.low %v230_v52, %v238_v53  ;;  %v5611_v3 = vcombine.low %v231_v54, %v239_v55  ;;  %v350_v52 = vld [vmem:[#allocation5 + $0x570] sm:$0xff]  ;;  %v343_v53 = vld [vmem:[#allocation5 + $0x538] sm:$0xff] }
 0x1d1   :  { %3756 = vmatprep.subr.bf16.mxu0 %v6022_v6  ;;  %3838 = vmatprep.subr.bf16.mxu1 %v6024_v7  ;;  %v5626_v6 = vcombine.high %v246_v61, %v254_v62  ;;  %v262_v7 = vld [vmem:[#allocation5 + $0x2b0] sm:$0xff]  ;;  %v351_v54 = vld [vmem:[#allocation5 + $0x578] sm:$0xff] }
 0x1d2   :  { %v5641_v22 = vcombine.low %v262_v7, %v270_v9  ;;  %v366_v61 = vld [vmem:[#allocation5 + $0x5f0] sm:$0xff]  ;;  %v359_v62 = vld [vmem:[#allocation5 + $0x5b8] sm:$0xff] }
 0x1d4   :  { %3757 = vmatpush1.bf16.msra.mxu0 %v6021_v15  ;;  %3839 = vmatpush1.bf16.msra.mxu1 %v6023_v16  ;;  %v5627_v15 = vcombine.low %v247_v63, %v255_v1  ;;  %v5642_v16 = vcombine.high %v262_v7, %v270_v9  ;;  %v382_v7 = vld [vmem:[#allocation5 + $0x670] sm:$0xff]  ;;  %v375_v9 = vld [vmem:[#allocation5 + $0x638] sm:$0xff] }
 0x1d5   :  { %3758 = vmatprep.subr.bf16.mxu0 %v6038_v17  ;;  %3840 = vmatprep.subr.bf16.mxu1 %v6040_v18  ;;  %v5644_v17 = vcombine.high %v263_v10, %v271_v13  ;;  %v278_v18 = vld [vmem:[#allocation5 + $0x330] sm:$0xff] }
 0x1d6   :  { %v5657_v30 = vcombine.low %v278_v18, %v286_v19 }
 0x1d8   :  { %3759 = vmatpush1.bf16.msra.mxu0 %v6037_v23  ;;  %3841 = vmatpush1.bf16.msra.mxu1 %v6039_v24  ;;  %v5643_v23 = vcombine.low %v263_v10, %v271_v13  ;;  %v5658_v24 = vcombine.high %v278_v18, %v286_v19  ;;  %v383_v10 = vld [vmem:[#allocation5 + $0x678] sm:$0xff]  ;;  %v398_v18 = vld [vmem:[#allocation5 + $0x6f0] sm:$0xff] }
 0x1d9   :  { %3760 = vmatprep.subr.bf16.mxu0 %v6054_v25  ;;  %3842 = vmatprep.subr.bf16.mxu1 %v6056_v26  ;;  %v5660_v25 = vcombine.high %v279_v20, %v287_v21  ;;  %v294_v26 = vld [vmem:[#allocation5 + $0x3b0] sm:$0xff]  ;;  %v391_v19 = vld [vmem:[#allocation5 + $0x6b8] sm:$0xff] }
 0x1da   :  { %v5673_v38 = vcombine.low %v294_v26, %v302_v27 }
 0x1dc   :  { %3761 = vmatpush1.bf16.msra.mxu0 %v6053_v31  ;;  %3843 = vmatpush1.bf16.msra.mxu1 %v6055_v32  ;;  %v5659_v31 = vcombine.low %v279_v20, %v287_v21  ;;  %v5674_v32 = vcombine.high %v294_v26, %v302_v27  ;;  %v399_v20 = vld [vmem:[#allocation5 + $0x6f8] sm:$0xff]  ;;  %v414_v26 = vld [vmem:[#allocation5 + $0x770] sm:$0xff] }
 0x1dd   :  { %3853 = vmatprep.subr.bf16.mxu0 %v5562_v33  ;;  %3935 = vmatprep.subr.bf16.mxu1 %v5564_v34  ;;  %v5676_v33 = vcombine.high %v295_v28, %v303_v29  ;;  %v310_v34 = vld [vmem:[#allocation5 + $0x430] sm:$0xff]  ;;  %v407_v27 = vld [vmem:[#allocation5 + $0x738] sm:$0xff] }
 0x1de   :  { %v5689_v47 = vcombine.low %v310_v34, %v318_v35 }
 0x1df   :  { %3763 = vmatmul.mubr.bf16.vlgmr.msra.gmra.mrb[8].mxu0 %v6823_v56  ;;  %3845 = vmatmul.mubr.bf16.vlgmr.msra.gmra.mrb[8].mxu1 %v6823_v56 }
 0x1e0   :  { %3854 = vmatpush1.bf16.msra.mxu0 %v5561_v39  ;;  %3936 = vmatpush1.bf16.msra.mxu1 %v5563_v40  ;;  %v5675_v39 = vcombine.low %v295_v28, %v303_v29  ;;  %v5690_v40 = vcombine.high %v310_v34, %v318_v35  ;;  %v415_v28 = vld [vmem:[#allocation5 + $0x778] sm:$0xff]  ;;  %v430_v34 = vld [vmem:[#allocation5 + $0x7f0] sm:$0xff] }
 0x1e1   :  { %3855 = vmatprep.subr.bf16.mxu0 %v5578_v42  ;;  %3937 = vmatprep.subr.bf16.mxu1 %v5580_v43  ;;  %v5692_v42 = vcombine.high %v311_v36, %v319_v37  ;;  %v326_v43 = vld [vmem:[#allocation5 + $0x4b0] sm:$0xff]  ;;  %v423_v35 = vld [vmem:[#allocation5 + $0x7b8] sm:$0xff] }
 0x1e2   :  { %3885 = vmatprep.mubr.bf16.mxu0 %v6808_v12  ;;  %3967 = vmatprep.mubr.bf16.mxu1 %v6808_v12  ;;  %v5628_v12 = vcombine.high %v247_v63, %v255_v1  ;;  %v5705_v55 = vcombine.low %v326_v43, %v334_v44  ;;  %v367_v63 = vld [vmem:[#allocation5 + $0x5f8] sm:$0xff] }
 0x1e4   :  { %3856 = vmatpush1.bf16.msra.mxu0 %v5577_v48  ;;  %3938 = vmatpush1.bf16.msra.mxu1 %v5579_v49  ;;  %v5691_v48 = vcombine.low %v311_v36, %v319_v37  ;;  %v5706_v49 = vcombine.high %v326_v43, %v334_v44  ;;  %v431_v36 = vld [vmem:[#allocation5 + $0x7f8] sm:$0xff]  ;;  %v446_v43 = vld [vmem:[#allocation5 + $0x870] sm:$0xff] }
 0x1e5   :  { %3857 = vmatprep.subr.bf16.mxu0 %v5594_v50  ;;  %3939 = vmatprep.subr.bf16.mxu1 %v5596_v51  ;;  %v5708_v50 = vcombine.high %v327_v45, %v335_v46  ;;  %v342_v51 = vld [vmem:[#allocation5 + $0x530] sm:$0xff]  ;;  %v439_v44 = vld [vmem:[#allocation5 + $0x838] sm:$0xff] }
 0x1e6   :  { %v5721_v1 = vcombine.low %v342_v51, %v350_v52 }
 0x1e8   :  { %3858 = vmatpush1.bf16.msra.mxu0 %v5593_v57  ;;  %3940 = vmatpush1.bf16.msra.mxu1 %v5595_v58  ;;  %v5707_v57 = vcombine.low %v327_v45, %v335_v46  ;;  %v5722_v58 = vcombine.high %v342_v51, %v350_v52  ;;  %v447_v45 = vld [vmem:[#allocation5 + $0x878] sm:$0xff]  ;;  %v462_v51 = vld [vmem:[#allocation5 + $0x8f0] sm:$0xff] }
 0x1e9   :  { %3859 = vmatprep.subr.bf16.mxu0 %v5610_v59  ;;  %3941 = vmatprep.subr.bf16.mxu1 %v5612_v60  ;;  %v5724_v59 = vcombine.high %v343_v53, %v351_v54  ;;  %v358_v60 = vld [vmem:[#allocation5 + $0x5b0] sm:$0xff]  ;;  %v455_v52 = vld [vmem:[#allocation5 + $0x8b8] sm:$0xff] }
 0x1ea   :  { %v5737_v13 = vcombine.low %v358_v60, %v366_v61 }
 0x1ec   :  { %3860 = vmatpush1.bf16.msra.mxu0 %v5609_v2  ;;  %3942 = vmatpush1.bf16.msra.mxu1 %v5611_v3  ;;  %v5723_v2 = vcombine.low %v343_v53, %v351_v54  ;;  %v5738_v3 = vcombine.high %v358_v60, %v366_v61  ;;  %v463_v53 = vld [vmem:[#allocation5 + $0x8f8] sm:$0xff]  ;;  %v478_v60 = vld [vmem:[#allocation5 + $0x970] sm:$0xff] }
 0x1ed   :  { %3861 = vmatprep.subr.bf16.mxu0 %v5626_v6  ;;  %3943 = vmatprep.subr.bf16.mxu1 %v5628_v12  ;;  %v5740_v6 = vcombine.high %v359_v62, %v367_v63  ;;  %v374_v12 = vld [vmem:[#allocation5 + $0x630] sm:$0xff]  ;;  %v471_v61 = vld [vmem:[#allocation5 + $0x938] sm:$0xff] }
 0x1ee   :  { %v5753_v21 = vcombine.low %v374_v12, %v382_v7 }
 0x1f0   :  { %3862 = vmatpush1.bf16.msra.mxu0 %v5625_v14  ;;  %3944 = vmatpush1.bf16.msra.mxu1 %v5627_v15  ;;  %v5739_v14 = vcombine.low %v359_v62, %v367_v63  ;;  %v5754_v15 = vcombine.high %v374_v12, %v382_v7  ;;  %v479_v62 = vld [vmem:[#allocation5 + $0x978] sm:$0xff]  ;;  %v494_v12 = vld [vmem:[#allocation5 + $0x9f0] sm:$0xff] }
 0x1f1   :  { %3863 = vmatprep.subr.bf16.mxu0 %v5642_v16  ;;  %3945 = vmatprep.subr.bf16.mxu1 %v5644_v17  ;;  %v5756_v16 = vcombine.high %v375_v9, %v383_v10  ;;  %v390_v17 = vld [vmem:[#allocation5 + $0x6b0] sm:$0xff]  ;;  %v487_v7 = vld [vmem:[#allocation5 + $0x9b8] sm:$0xff] }
 0x1f2   :  { %v5769_v29 = vcombine.low %v390_v17, %v398_v18 }
 0x1f4   :  { %3864 = vmatpush1.bf16.msra.mxu0 %v5641_v22  ;;  %3946 = vmatpush1.bf16.msra.mxu1 %v5643_v23  ;;  %v5755_v22 = vcombine.low %v375_v9, %v383_v10  ;;  %v5770_v23 = vcombine.high %v390_v17, %v398_v18  ;;  %v495_v9 = vld [vmem:[#allocation5 + $0x9f8] sm:$0xff] }
 0x1f5   :  { %3865 = vmatprep.subr.bf16.mxu0 %v5658_v24  ;;  %3947 = vmatprep.subr.bf16.mxu1 %v5660_v25  ;;  %v5772_v24 = vcombine.high %v391_v19, %v399_v20  ;;  %v406_v25 = vld [vmem:[#allocation5 + $0x730] sm:$0xff]  ;;  %v503_v17 = vld [vmem:[#allocation5 + $0xa38] sm:$0xff] }
 0x1f6   :  { %v5785_v37 = vcombine.low %v406_v25, %v414_v26  ;;  %v511_v18 = vld [vmem:[#allocation5 + $0xa78] sm:$0xff] }
 0x1f8   :  { %3866 = vmatpush1.bf16.msra.mxu0 %v5657_v30  ;;  %3948 = vmatpush1.bf16.msra.mxu1 %v5659_v31  ;;  %v5771_v30 = vcombine.low %v391_v19, %v399_v20  ;;  %v5786_v31 = vcombine.high %v406_v25, %v414_v26  ;;  %v5867_v20 = vcombine.low %v487_v7, %v495_v9  ;;  %v527_v25 = vld [vmem:[#allocation5 + $0xaf8] sm:$0xff] }
 0x1f9   :  { %3867 = vmatprep.subr.bf16.mxu0 %v5674_v32  ;;  %3949 = vmatprep.subr.bf16.mxu1 %v5676_v33  ;;  %v5788_v32 = vcombine.high %v407_v27, %v415_v28  ;;  %v422_v33 = vld [vmem:[#allocation5 + $0x7b0] sm:$0xff] }
 0x1fa   :  { %v5801_v46 = vcombine.low %v422_v33, %v430_v34 }
 0x1fc   :  { %3868 = vmatpush1.bf16.msra.mxu0 %v5673_v38  ;;  %3950 = vmatpush1.bf16.msra.mxu1 %v5675_v39  ;;  %v5787_v38 = vcombine.low %v407_v27, %v415_v28  ;;  %v5802_v39 = vcombine.high %v422_v33, %v430_v34  ;;  %v5883_v27 = vcombine.low %v503_v17, %v511_v18  ;;  %v543_v33 = vld [vmem:[#allocation5 + $0xb78] sm:$0xff] }
 0x1fd   :  { %3869 = vmatprep.subr.bf16.mxu0 %v5690_v40  ;;  %3951 = vmatprep.subr.bf16.mxu1 %v5692_v42  ;;  %v5804_v40 = vcombine.high %v423_v35, %v431_v36  ;;  %v438_v42 = vld [vmem:[#allocation5 + $0x830] sm:$0xff] }
 0x1fe   :  { %v5817_v54 = vcombine.low %v438_v42, %v446_v43 }
 0x200   :  { %3870 = vmatpush1.bf16.msra.mxu0 %v5689_v47  ;;  %3952 = vmatpush1.bf16.msra.mxu1 %v5691_v48  ;;  %v5803_v47 = vcombine.low %v423_v35, %v431_v36  ;;  %v5818_v48 = vcombine.high %v438_v42, %v446_v43 }
 0x201   :  { %3871 = vmatprep.subr.bf16.mxu0 %v5706_v49  ;;  %3953 = vmatprep.subr.bf16.mxu1 %v5708_v50  ;;  %v5820_v49 = vcombine.high %v439_v44, %v447_v45  ;;  %v454_v50 = vld [vmem:[#allocation5 + $0x8b0] sm:$0xff] }
 0x202   :  { %v5833_v63 = vcombine.low %v454_v50, %v462_v51 }
 0x204   :  { %3872 = vmatpush1.bf16.msra.mxu0 %v5705_v55  ;;  %3954 = vmatpush1.bf16.msra.mxu1 %v5707_v57  ;;  %v5819_v55 = vcombine.low %v439_v44, %v447_v45  ;;  %v5834_v57 = vcombine.high %v454_v50, %v462_v51  ;;  %v551_v44 = vld [vmem:[#allocation5 + $0xbb8] sm:$0xff] }
 0x205   :  { %3873 = vmatprep.subr.bf16.mxu0 %v5722_v58  ;;  %3955 = vmatprep.subr.bf16.mxu1 %v5724_v59  ;;  %v5836_v58 = vcombine.high %v455_v52, %v463_v53  ;;  %v470_v59 = vld [vmem:[#allocation5 + $0x930] sm:$0xff]  ;;  %v559_v45 = vld [vmem:[#allocation5 + $0xbf8] sm:$0xff] }
 0x206   :  { %v5849_v10 = vcombine.low %v470_v59, %v478_v60 }
 0x208   :  { %3874 = vmatpush1.bf16.msra.mxu0 %v5721_v1  ;;  %3956 = vmatpush1.bf16.msra.mxu1 %v5723_v2  ;;  %v5835_v1 = vcombine.low %v455_v52, %v463_v53  ;;  %v5850_v2 = vcombine.high %v470_v59, %v478_v60  ;;  %v575_v59 = vld [vmem:[#allocation5 + $0xc78] sm:$0xff] }
 0x209   :  { %3875 = vmatprep.subr.bf16.mxu0 %v5738_v3  ;;  %3957 = vmatprep.subr.bf16.mxu1 %v5740_v6  ;;  %v5852_v3 = vcombine.high %v471_v61, %v479_v62  ;;  %v486_v6 = vld [vmem:[#allocation5 + $0x9b0] sm:$0xff] }
 0x20a   :  { %v5865_v19 = vcombine.low %v486_v6, %v494_v12 }
 0x20c   :  { %3876 = vmatpush1.bf16.msra.mxu0 %v5737_v13  ;;  %3958 = vmatpush1.bf16.msra.mxu1 %v5739_v14  ;;  %v5866_v13 = vcombine.high %v486_v6, %v494_v12  ;;  %v5868_v14 = vcombine.high %v487_v7, %v495_v9  ;;  %v591_v6 = vld [vmem:[#allocation5 + $0xcf8] sm:$0xff] }
 0x20d   :  { %3877 = vmatprep.subr.bf16.mxu0 %v5754_v15  ;;  %3959 = vmatprep.subr.bf16.mxu1 %v5756_v16  ;;  %v502_v15 = vld [vmem:[#allocation5 + $0xa30] sm:$0xff] }
 0x20e   :  { %v510_v16 = vld [vmem:[#allocation5 + $0xa70] sm:$0xff] }
 0x20f   :  { %v5881_v26 = vcombine.low %v502_v15, %v510_v16 }
 0x210   :  { %3878 = vmatpush1.bf16.msra.mxu0 %v5753_v21  ;;  %3960 = vmatpush1.bf16.msra.mxu1 %v5755_v22  ;;  %v5882_v21 = vcombine.high %v502_v15, %v510_v16  ;;  %v518_v22 = vld [vmem:[#allocation5 + $0xab0] sm:$0xff]  ;;  %v607_v15 = vld [vmem:[#allocation5 + $0xd78] sm:$0xff] }
 0x211   :  { %3879 = vmatprep.subr.bf16.mxu0 %v5770_v23  ;;  %3961 = vmatprep.subr.bf16.mxu1 %v5772_v24  ;;  %v526_v23 = vld [vmem:[#allocation5 + $0xaf0] sm:$0xff]  ;;  %v519_v24 = vld [vmem:[#allocation5 + $0xab8] sm:$0xff] }
 0x212   :  { %v5898_v28 = vcombine.high %v518_v22, %v526_v23  ;;  %v5897_v34 = vcombine.low %v518_v22, %v526_v23  ;;  %v5899_v35 = vcombine.low %v519_v24, %v527_v25  ;;  %v615_v22 = vld [vmem:[#allocation5 + $0xdb8] sm:$0xff] }
 0x213   :  { %v623_v23 = vld [vmem:[#allocation5 + $0xdf8] sm:$0xff] }
 0x214   :  { %3880 = vmatpush1.bf16.msra.mxu0 %v5769_v29  ;;  %3962 = vmatpush1.bf16.msra.mxu1 %v5771_v30  ;;  %v5900_v29 = vcombine.high %v519_v24, %v527_v25  ;;  %v534_v30 = vld [vmem:[#allocation5 + $0xb30] sm:$0xff] }
 0x215   :  { %3881 = vmatprep.subr.bf16.mxu0 %v5786_v31  ;;  %3963 = vmatprep.subr.bf16.mxu1 %v5788_v32  ;;  %v542_v31 = vld [vmem:[#allocation5 + $0xb70] sm:$0xff]  ;;  %v535_v32 = vld [vmem:[#allocation5 + $0xb38] sm:$0xff] }
 0x216   :  { %v5914_v36 = vcombine.high %v534_v30, %v542_v31  ;;  %v5915_v51 = vcombine.low %v535_v32, %v543_v33 }
 0x218   :  { %3882 = vmatpush1.bf16.msra.mxu0 %v5785_v37  ;;  %3964 = vmatpush1.bf16.msra.mxu1 %v5787_v38  ;;  %v5916_v38 = vcombine.high %v535_v32, %v543_v33  ;;  %v631_v33 = vld [vmem:[#allocation5 + $0xe38] sm:$0xff] }
 0x219   :  { %3883 = vmatprep.subr.bf16.mxu0 %v5802_v39  ;;  %3965 = vmatprep.subr.bf16.mxu1 %v5804_v40  ;;  %v550_v39 = vld [vmem:[#allocation5 + $0xbb0] sm:$0xff] }
 0x21a   :  { %v558_v40 = vld [vmem:[#allocation5 + $0xbf0] sm:$0xff] }
 0x21b   :  { %v5930_v52 = vcombine.high %v550_v39, %v558_v40  ;;  %v5929_v60 = vcombine.low %v550_v39, %v558_v40  ;;  %v646_v40 = vld [vmem:[#allocation5 + $0xeb0] sm:$0xff] }
 0x21c   :  { %3884 = vmatpush1.bf16.msra.mxu0 %v5801_v46  ;;  %3966 = vmatpush1.bf16.msra.mxu1 %v5803_v47 }
 0x21d   :  { %3894 = vmatprep.subr.bf16.mxu0 %v5818_v48  ;;  %3976 = vmatprep.subr.bf16.mxu1 %v5820_v49  ;;  %v5913_v48 = vcombine.low %v534_v30, %v542_v31  ;;  %v6710_v31 = vmov 1983009808  }
 0x21e   :  { %v4043_v32 = vunpack.c.l.s4 %v6710_v31  ;;  %v6429_v31 = vld [vmem:[%s7379_s3] sm:$0xff]  }
 0x21f   :  { %3886 = vmatmul.mubr.bf16.vlgmr.msra.gmra.mrb[12].mxu0 %v6813_v11  ;;  %3968 = vmatmul.mubr.bf16.vlgmr.msra.gmra.mrb[12].mxu1 %v6813_v11  ;;  %v5851_v11 = vcombine.low %v471_v61, %v479_v62  ;;  %v5931_v61 = vcombine.low %v551_v44, %v559_v45 }
 0x220   :  { %3895 = vmatpush1.bf16.msra.mxu0 %v5817_v54  ;;  %3977 = vmatpush1.bf16.msra.mxu1 %v5819_v55  ;;  %v5932_v54 = vcombine.high %v551_v44, %v559_v45  ;;  %v566_v55 = vld [vmem:[#allocation5 + $0xc30] sm:$0xff]  ;;  %v4044_v45 = vunpack.c.0.s8 %v4043_v32  ;;  %v6430_v32 = vld [vmem:[%s7379_s3 + $0x80] sm:$0xff]  }
 0x221   :  { %3896 = vmatprep.subr.bf16.mxu0 %v5834_v57  ;;  %3978 = vmatprep.subr.bf16.mxu1 %v5836_v58  ;;  %v574_v57 = vld [vmem:[#allocation5 + $0xc70] sm:$0xff]  ;;  %v567_v58 = vld [vmem:[#allocation5 + $0xc38] sm:$0xff] }
 0x222   :  { %3926 = vmatprep.mubr.bf16.mxu0 %v6818_v41  ;;  %4008 = vmatprep.mubr.bf16.mxu1 %v6818_v41  ;;  %v5884_v41 = vcombine.high %v503_v17, %v511_v18  ;;  %v5946_v62 = vcombine.high %v566_v55, %v574_v57  ;;  %v5945_v12 = vcombine.low %v566_v55, %v574_v57  ;;  %v654_v44 = vld [vmem:[#allocation5 + $0xef0] sm:$0xff] }
 0x223   :  { %v5947_v7 = vcombine.low %v567_v58, %v575_v59  ;;  %v6026_v55 = vcombine.high %v646_v40, %v654_v44 }
 0x224   :  { %3897 = vmatpush1.bf16.msra.mxu0 %v5833_v63  ;;  %3979 = vmatpush1.bf16.msra.mxu1 %v5835_v1  ;;  %v5948_v63 = vcombine.high %v567_v58, %v575_v59  ;;  %v582_v1 = vld [vmem:[#allocation5 + $0xcb0] sm:$0xff] }
 0x225   :  { %3898 = vmatprep.subr.bf16.mxu0 %v5850_v2  ;;  %3980 = vmatprep.subr.bf16.mxu1 %v5852_v3  ;;  %v590_v2 = vld [vmem:[#allocation5 + $0xcf0] sm:$0xff]  ;;  %v583_v3 = vld [vmem:[#allocation5 + $0xcb8] sm:$0xff] }
 0x226   :  { %v5962_v9 = vcombine.high %v582_v1, %v590_v2  ;;  %v5961_v16 = vcombine.low %v582_v1, %v590_v2  ;;  %v5963_v17 = vcombine.low %v583_v3, %v591_v6  ;;  %v662_v58 = vld [vmem:[#allocation5 + $0xf30] sm:$0xff] }
 0x227   :  { %v670_v59 = vld [vmem:[#allocation5 + $0xf70] sm:$0xff] }
 0x228   :  { %3899 = vmatpush1.bf16.msra.mxu0 %v5849_v10  ;;  %3981 = vmatpush1.bf16.msra.mxu1 %v5851_v11  ;;  %v5964_v10 = vcombine.high %v583_v3, %v591_v6  ;;  %v598_v11 = vld [vmem:[#allocation5 + $0xd30] sm:$0xff]  ;;  %v6025_v3 = vcombine.low %v646_v40, %v654_v44 }
 0x229   :  { %3900 = vmatprep.subr.bf16.mxu0 %v5866_v13  ;;  %3982 = vmatprep.subr.bf16.mxu1 %v5868_v14  ;;  %v606_v13 = vld [vmem:[#allocation5 + $0xd70] sm:$0xff]  ;;  %v599_v14 = vld [vmem:[#allocation5 + $0xd38] sm:$0xff] }
 0x22a   :  { %v5978_v18 = vcombine.high %v598_v11, %v606_v13  ;;  %v5977_v24 = vcombine.low %v598_v11, %v606_v13  ;;  %v5979_v25 = vcombine.low %v599_v14, %v607_v15  ;;  %v6435_v40 = vld [vmem:[%s7379_s3 + $0x50] sm:$0xff]  }
 0x22b   :  { %v6437_v44 = vld [vmem:[%s7379_s3 + $0x10] sm:$0xff]  }
 0x22c   :  { %3901 = vmatpush1.bf16.msra.mxu0 %v5865_v19  ;;  %3983 = vmatpush1.bf16.msra.mxu1 %v5867_v20  ;;  %v5980_v19 = vcombine.high %v599_v14, %v607_v15  ;;  %v614_v20 = vld [vmem:[#allocation5 + $0xdb0] sm:$0xff]  ;;  %v679_v14 = vld [vmem:[#allocation5 + $0xfb8] sm:$0xff] }
 0x22d   :  { %3902 = vmatprep.subr.bf16.mxu0 %v5882_v21  ;;  %3984 = vmatprep.subr.bf16.mxu1 %v5884_v41  ;;  %v622_v21 = vld [vmem:[#allocation5 + $0xdf0] sm:$0xff]  ;;  %v692_v41 = vlaneseq  ;;  %v687_v15 = vld [vmem:[#allocation5 + $0xff8] sm:$0xff] }
 0x22f   :  { %v6866_v30 = vshrl.u32 %v692_v41, 7 }
 0x230   :  { %3903 = vmatpush1.bf16.msra.mxu0 %v5881_v26  ;;  %3985 = vmatpush1.bf16.msra.mxu1 %v5883_v27  ;;  %v5994_v26 = vcombine.high %v614_v20, %v622_v21  ;;  %v5996_v27 = vcombine.high %v615_v22, %v623_v23 }
 0x231   :  { %3904 = vmatprep.subr.bf16.mxu0 %v5898_v28  ;;  %3986 = vmatprep.subr.bf16.mxu1 %v5900_v29  ;;  %v630_v28 = vld [vmem:[#allocation5 + $0xe30] sm:$0xff] }
 0x232   :  { %v6857_v37 = vpop.f32.mrb[4].mxu0  ;;  %v6859_v42 = vpop.f32.mrb[4].mxu1  ;;  %v638_v29 = vld [vmem:[#allocation5 + $0xe70] sm:$0xff] }
 0x233   :  { %v6861_v43 = vpop.f32.mrb[5].mxu0  ;;  %v6863_v46 = vpop.f32.mrb[5].mxu1 }
 0x234   :  { %v3604_v47 = vpop.f32.mrb[6].mxu0  ;;  %3905 = vmatpush1.bf16.msra.mxu0 %v5897_v34  ;;  %v3686_v49 = vpop.f32.mrb[6].mxu1  ;;  %3987 = vmatpush1.bf16.msra.mxu1 %v5899_v35  ;;  %v639_v34 = vld [vmem:[#allocation5 + $0xe78] sm:$0xff]  ;;  %v5993_v35 = vcombine.low %v614_v20, %v622_v21  ;;  %v6060_v21 = vcombine.high %v679_v14, %v687_v15 }
 0x235   :  { %v3605_v50 = vpop.f32.mrb[7].mxu0  ;;  %3906 = vmatprep.subr.bf16.mxu0 %v5914_v36  ;;  %v3687_v53 = vpop.f32.mrb[7].mxu1  ;;  %3988 = vmatprep.subr.bf16.mxu1 %v5916_v38  ;;  %v5995_v36 = vcombine.low %v615_v22, %v623_v23  ;;  %v6010_v38 = vcombine.high %v630_v28, %v638_v29  ;;  %v6012_v39 = vcombine.high %v631_v33, %v639_v34  ;;  %v698_v47 = vsub.s32 1, %v6866_v30  ;;  %v655_v49 = vld [vmem:[#allocation5 + $0xef8] sm:$0xff] }
 0x236   :  { %v6869_v50 = vld [vmem:[#allocation7] sm:$0xff]  ;;  %v4033_v53 = vld [vmem:[#allocation10] sm:$0xff] }
 0x237   :  { %v4041_v1 = vcombine.high %v4033_v53, %v4033_v53 }
 0x238   :  { %3907 = vmatpush1.bf16.msra.mxu0 %v5913_v48  ;;  %3989 = vmatpush1.bf16.msra.mxu1 %v5915_v51  ;;  %v647_v48 = vld [vmem:[#allocation5 + $0xeb8] sm:$0xff]  ;;  %v706_v51 = vsub.s32 3, %v6866_v30 }
 0x239   :  { %3908 = vmatprep.subr.bf16.mxu0 %v5930_v52  ;;  %3990 = vmatprep.subr.bf16.mxu1 %v5932_v54  ;;  %v6009_v52 = vcombine.low %v630_v28, %v638_v29  ;;  %v6011_v54 = vcombine.low %v631_v33, %v639_v34  ;;  %v6028_v57 = vcombine.high %v647_v48, %v655_v49  ;;  %v6431_v33 = vld [vmem:[%s7379_s3 + $0x48] sm:$0xff]  }
 0x23a   :  { %v707_v2 = vrot.slane %v6869_v50, %v706_v51  ;;  %v6027_v6 = vcombine.low %v647_v48, %v655_v49  ;;  %v6439_v48 = vld [vmem:[%s7379_s3 + $0x58] sm:$0xff]  }
 0x23b   :  { %v6440_v49 = vld [vmem:[%s7379_s3 + $0xd8] sm:$0xff]  }
 0x23c   :  { %3909 = vmatpush1.bf16.msra.mxu0 %v5929_v60  ;;  %3991 = vmatpush1.bf16.msra.mxu1 %v5931_v61  ;;  %v6873_v60 = vsub.s32 %v4044_v45, %v6866_v30  ;;  %v699_v61 = vrot.slane %v6869_v50, %v698_v47  ;;  %v6438_v45 = vld [vmem:[%s7379_s3 + $0x90] sm:$0xff]  }
 0x23d   :  { %3910 = vmatprep.subr.bf16.mxu0 %v5946_v62  ;;  %3992 = vmatprep.subr.bf16.mxu1 %v5948_v63  ;;  %v663_v62 = vld [vmem:[#allocation5 + $0xf38] sm:$0xff] }
 0x23e   :  { %v671_v63 = vld [vmem:[#allocation5 + $0xf78] sm:$0xff]  ;;  %v6882_v11 = vrot.slane %v4033_v53, %v6873_v60  ;;  %v6367_v13 = vadd.f32 %v6845_v5, %v699_v61  ;;  %v694_v53 = vsub.s32 0, %v6866_v30  ;;  %v722_v61 = vsub.s32 7, %v6866_v30 }
 0x240   :  { %3911 = vmatpush1.bf16.msra.mxu0 %v5945_v12  ;;  %3993 = vmatpush1.bf16.msra.mxu1 %v5947_v7  ;;  %v6042_v12 = vcombine.high %v662_v58, %v670_v59  ;;  %v6044_v7 = vcombine.high %v663_v62, %v671_v63  ;;  %v4018_v22 = vmax.f32 %v6367_v13, 0.0  ;;  %v4056_v23 = vcombine.high %v6882_v11, %v6882_v11  ;;  %v6449_v13 = vld [vmem:[%s7379_s3 + $0x28] sm:$0xff]  }
 0x241   :  { %3912 = vmatprep.subr.bf16.mxu0 %v5962_v9  ;;  %3994 = vmatprep.subr.bf16.mxu1 %v5964_v10  ;;  %v678_v9 = vld [vmem:[#allocation5 + $0xfb0] sm:$0xff] }
 0x242   :  { %v686_v10 = vld [vmem:[#allocation5 + $0xff0] sm:$0xff]  ;;  %v4126_v28 = vmul.f32 %v4056_v23, %v4018_v22 }
 0x243   :  { %v6058_v20 = vcombine.high %v678_v9, %v686_v10 }
 0x244   :  { %3913 = vmatpush1.bf16.msra.mxu0 %v5961_v16  ;;  %3995 = vmatpush1.bf16.msra.mxu1 %v5963_v17  ;;  %v6886_v16 = vrot.slane %v4041_v1, %v6873_v60  ;;  %v6369_v17 = vadd.f32 %v6847_v8, %v707_v2  ;;  %v6059_v8 = vcombine.low %v679_v14, %v687_v15  ;;  %v4034_v1 = vld [vmem:[#allocation10 + $0x8] sm:$0xff]  ;;  %v6450_v15 = vld [vmem:[%s7379_s3 + $0xa8] sm:$0xff]  }
 0x245   :  { %3914 = vmatprep.subr.bf16.mxu0 %v5978_v18  ;;  %3996 = vmatprep.subr.bf16.mxu1 %v5980_v19  ;;  %v6041_v18 = vcombine.low %v662_v58, %v670_v59  ;;  %v6043_v19 = vcombine.low %v663_v62, %v671_v63  ;;  %v4142_v34 = vpack.c.bf16 %v4126_v28, %v4126_v28  ;;  %v6444_v58 = vld [vmem:[%s7379_s3 + $0xe0] sm:$0xff]   ;;  %v714_v59 = vsub.s32 5, %v6866_v30  ;;  %v6457_v28 = vld [vmem:[%s7379_s3 + $0x38] sm:$0xff]  }
 0x246   :  { %v4020_v5 = vmax.f32 %v6369_v17, 0.0  ;;  %v6445_v62 = vld [vmem:[%s7379_s3 + $0x20] sm:$0xff]   ;;  %v695_v63 = vrot.slane %v6869_v50, %v694_v53  ;;  %v6451_v17 = vld [vmem:[%s7379_s3 + $0x70] sm:$0xff]  }
 0x247   :  { %v6446_v2 = vld [vmem:[%s7379_s3 + $0xa0] sm:$0xff]  }
 0x248   :  { %3915 = vmatpush1.bf16.msra.mxu0 %v5977_v24  ;;  %3997 = vmatpush1.bf16.msra.mxu1 %v5979_v25  ;;  %v4057_v24 = vcombine.high %v6886_v16, %v6886_v16  ;;  %v6057_v25 = vcombine.low %v678_v9, %v686_v10  ;;  %v4058_v9 = vcombine.high %v4034_v1, %v4034_v1 }
 0x249   :  { %3916 = vmatprep.subr.bf16.mxu0 %v5994_v26  ;;  %3998 = vmatprep.subr.bf16.mxu1 %v5996_v27  ;;  %v6427_v26 = vld [vmem:[%s7379_s3 + $0x40] sm:$0xff]   ;;  %v723_v10 = vrot.slane %v6869_v50, %v722_v61  ;;  %v6366_v14 = vadd.f32 %v6841_v0, %v695_v63  ;;  %v6472_v63 = vld [vmem:[%s7379_s3 + $0x1d8] sm:$0xff]  }
 0x24a   :  { %v6428_v27 = vld [vmem:[%s7379_s3 + $0xc0] sm:$0xff]   ;;  %v4128_v29 = vmul.f32 %v4057_v24, %v4020_v5  ;;  %v6454_v5 = vld [vmem:[%s7379_s3 + $0xb0] sm:$0xff]  }
 0x24b   :  { %v6373_v22 = vadd.f32 %v6863_v46, %v723_v10  ;;  %v4017_v23 = vmax.f32 %v6366_v14, 0.0  ;;  %v6456_v46 = vld [vmem:[%s7379_s3 + $0xf8] sm:$0xff]   ;;  %v6479_v14 = vld [vmem:[%s7379_s3 + $0x168] sm:$0xff]  }
 0x24c   :  { %3917 = vmatpush1.bf16.msra.mxu0 %v5993_v35  ;;  %3999 = vmatpush1.bf16.msra.mxu1 %v5995_v36  ;;  %v6432_v35 = vld [vmem:[%s7379_s3 + $0xc8] sm:$0xff]   ;;  %v4144_v36 = vpack.c.bf16 %v4128_v29, %v4128_v29 }
 0x24d   :  { %3918 = vmatprep.subr.bf16.mxu0 %v6010_v38  ;;  %4000 = vmatprep.subr.bf16.mxu1 %v6012_v39  ;;  %v6433_v38 = vld [vmem:[%s7379_s3 + $0x8] sm:$0xff]   ;;  %v4125_v29 = vmul.f32 %v6882_v11, %v4017_v23  ;;  %v6461_v11 = vld [vmem:[%s7379_s3 + $0x100] sm:$0xff]  }
 0x24e   :  { %v6434_v39 = vld [vmem:[%s7379_s3 + $0x88] sm:$0xff]  }
 0x250   :  { %3919 = vmatpush1.bf16.msra.mxu0 %v6009_v52  ;;  %4001 = vmatpush1.bf16.msra.mxu1 %v6011_v54  ;;  %v6441_v52 = vld [vmem:[%s7379_s3 + $0x18] sm:$0xff]  }
 0x251   :  { %3920 = vmatprep.subr.bf16.mxu0 %v6026_v55  ;;  %4002 = vmatprep.subr.bf16.mxu1 %v6028_v57  ;;  %v6442_v54 = vld [vmem:[%s7379_s3 + $0x98] sm:$0xff]   ;;  %v6443_v55 = vld [vmem:[%s7379_s3 + $0x60] sm:$0xff]   ;;  %v702_v57 = vsub.s32 2, %v6866_v30 }
 0x254   :  { %3921 = vmatpush1.bf16.msra.mxu0 %v6025_v3  ;;  %4003 = vmatpush1.bf16.msra.mxu1 %v6027_v6  ;;  %v6447_v3 = vld [vmem:[%s7379_s3 + $0x68] sm:$0xff]   ;;  %v703_v6 = vrot.slane %v6869_v50, %v702_v57 }
 0x255   :  { %3922 = vmatprep.subr.bf16.mxu0 %v6042_v12  ;;  %4004 = vmatprep.subr.bf16.mxu1 %v6044_v7  ;;  %v6448_v12 = vld [vmem:[%s7379_s3 + $0xe8] sm:$0xff]   ;;  %v715_v7 = vrot.slane %v6869_v50, %v714_v59 }
 0x257   :  { %v6371_v0 = vadd.f32 %v6861_v43, %v715_v7  ;;  %v6455_v43 = vld [vmem:[%s7379_s3 + $0x78] sm:$0xff]   ;;  %v6476_v7 = vld [vmem:[%s7379_s3 + $0x1e0] sm:$0xff]  }
 0x258   :  { %3923 = vmatpush1.bf16.msra.mxu0 %v6041_v18  ;;  %4005 = vmatpush1.bf16.msra.mxu1 %v6043_v19  ;;  %v6368_v18 = vadd.f32 %v6843_v4, %v703_v6  ;;  %v6452_v19 = vld [vmem:[%s7379_s3 + $0xf0] sm:$0xff]   ;;  %v6475_v6 = vld [vmem:[%s7379_s3 + $0x160] sm:$0xff]  }
 0x259   :  { %3924 = vmatprep.subr.bf16.mxu0 %v6058_v20  ;;  %4006 = vmatprep.subr.bf16.mxu1 %v6060_v21  ;;  %v6992_v20 = vrot.slane %v4034_v1, %v6873_v60  ;;  %v6996_v21 = vrot.slane %v4058_v9, %v6873_v60  ;;  %v6453_v4 = vld [vmem:[%s7379_s3 + $0x30] sm:$0xff]   ;;  %v6473_v1 = vld [vmem:[%s7379_s3 + $0x118] sm:$0xff]   ;;  %v6477_v9 = vld [vmem:[%s7379_s3 + $0x120] sm:$0xff]  }
 0x25a   :  { %v4019_v24 = vmax.f32 %v6368_v18, 0.0  ;;  %v6481_v18 = vld [vmem:[%s7379_s3 + $0x128] sm:$0xff]  }
 0x25c   :  { %3925 = vmatpush1.bf16.msra.mxu0 %v6057_v25  ;;  %4007 = vmatpush1.bf16.msra.mxu1 %v6059_v8  ;;  %v4022_v25 = vmax.f32 %v6371_v0, 0.0  ;;  %v4073_v8 = vcombine.high %v6992_v20, %v6992_v20  ;;  %v6482_v0 = vld [vmem:[%s7379_s3 + $0x1a8] sm:$0xff]  }
 0x25d   :  { %6190 = vmatprep.subr.bf16.mxu0 %v6427_v26  ;;  %6212 = vmatprep.subr.bf16.mxu1 %v6428_v27  ;;  %v4024_v26 = vmax.f32 %v6373_v22, 0.0  ;;  %v4074_v27 = vcombine.high %v6996_v21, %v6996_v21 }
 0x25f   :  { %3927 = vmatmul.mubr.bf16.vlgmr.msra.gmra.mrb[12].mxu0 %v6823_v56  ;;  %4009 = vmatmul.mubr.bf16.vlgmr.msra.gmra.mrb[12].mxu1 %v6823_v56  ;;  %v6436_v56 = vld [vmem:[%s7379_s3 + $0xd0] sm:$0xff]  }
 0x260   :  { %6191 = vmatpush3.bf16.msra.mxu0 %v6429_v31  ;;  %5220 = vmatprep.mubr.bf16.mxu0 %v4142_v34  ;;  %v6458_v31 = vld [vmem:[%s7379_s3 + $0xb8] sm:$0xff]   ;;  %v6460_v34 = vld [vmem:[%s7379_s3 + $0x1c0] sm:$0xff]  }
 0x261   :  { %6213 = vmatpush3.bf16.msra.mxu1 %v6430_v32  ;;  %5260 = vmatprep.mubr.bf16.mxu1 %v4144_v36  ;;  %v6459_v32 = vld [vmem:[%s7379_s3 + $0x140] sm:$0xff]   ;;  %v4132_v36 = vmul.f32 %v4074_v27, %v4024_v26 }
 0x262   :  { %6192 = vmatprep.subr.bf16.mxu0 %v6431_v33  ;;  %6214 = vmatprep.subr.bf16.mxu1 %v6432_v35  ;;  %v4127_v33 = vmul.f32 %v6886_v16, %v4019_v24  ;;  %v4130_v35 = vmul.f32 %v4073_v8, %v4022_v25  ;;  %v6488_v24 = vld [vmem:[%s7379_s3 + $0x1f8] sm:$0xff]   ;;  %v6491_v26 = vld [vmem:[%s7379_s3 + $0x240] sm:$0xff]  }
 0x263   :  { %v6490_v8 = vld [vmem:[%s7379_s3 + $0x1b8] sm:$0xff]  }
 0x264   :  { %6193 = vmatpush3.bf16.msra.mxu0 %v6433_v38  ;;  %v4141_v38 = vpack.c.bf16 %v4125_v29, %v4125_v29  ;;  %v4143_v16 = vpack.c.bf16 %v4127_v33, %v4127_v33  ;;  %v6496_v33 = vld [vmem:[%s7379_s3 + $0x2c8] sm:$0xff]  }
 0x265   :  { %6215 = vmatpush3.bf16.msra.mxu1 %v6434_v39  ;;  %6194 = vmatprep.subr.bf16.mxu0 %v6435_v40  ;;  %v6462_v39 = vld [vmem:[%s7379_s3 + $0x180] sm:$0xff]   ;;  %v6463_v40 = vld [vmem:[%s7379_s3 + $0x148] sm:$0xff]  }
 0x266   :  { %6216 = vmatprep.subr.bf16.mxu1 %v6436_v56  ;;  %v4146_v56 = vpack.c.bf16 %v4130_v35, %v4130_v35  ;;  %v6498_v35 = vld [vmem:[%s7379_s3 + $0x288] sm:$0xff]  }
 0x268   :  { %6195 = vmatpush3.bf16.msra.mxu0 %v6437_v44  ;;  %v6464_v44 = vld [vmem:[%s7379_s3 + $0x1c8] sm:$0xff]  }
 0x269   :  { %6217 = vmatpush3.bf16.msra.mxu1 %v6438_v45  ;;  %6196 = vmatprep.subr.bf16.mxu0 %v6439_v48  ;;  %v4148_v45 = vpack.c.bf16 %v4132_v36, %v4132_v36  ;;  %v6465_v48 = vld [vmem:[%s7379_s3 + $0x108] sm:$0xff]   ;;  %v6499_v36 = vld [vmem:[%s7379_s3 + $0x250] sm:$0xff]  }
 0x26a   :  { %6218 = vmatprep.subr.bf16.mxu1 %v6440_v49  ;;  %v6466_v49 = vld [vmem:[%s7379_s3 + $0x188] sm:$0xff]  }
 0x26c   :  { %6197 = vmatpush3.bf16.msra.mxu0 %v6441_v52  ;;  %v6467_v52 = vld [vmem:[%s7379_s3 + $0x150] sm:$0xff]  }
 0x26d   :  { %6219 = vmatpush3.bf16.msra.mxu1 %v6442_v54  ;;  %6198 = vmatprep.subr.bf16.mxu0 %v6443_v55  ;;  %v6468_v54 = vld [vmem:[%s7379_s3 + $0x1d0] sm:$0xff]  }
 0x26e   :  { %6220 = vmatprep.subr.bf16.mxu1 %v6444_v58  ;;  %v6469_v55 = vld [vmem:[%s7379_s3 + $0x110] sm:$0xff]  }
 0x26f   :  { %v6470_v58 = vld [vmem:[%s7379_s3 + $0x190] sm:$0xff]  }
 0x270   :  { %6199 = vmatpush3.bf16.msra.mxu0 %v6445_v62  ;;  %v6471_v62 = vld [vmem:[%s7379_s3 + $0x158] sm:$0xff]  }
 0x271   :  { %6221 = vmatpush3.bf16.msra.mxu1 %v6446_v2  ;;  %6200 = vmatprep.subr.bf16.mxu0 %v6447_v3  ;;  %v710_v2 = vsub.s32 4, %v6866_v30  ;;  %v6474_v3 = vld [vmem:[%s7379_s3 + $0x198] sm:$0xff]  }
 0x272   :  { %6222 = vmatprep.subr.bf16.mxu1 %v6448_v12  ;;  %v718_v12 = vsub.s32 6, %v6866_v30 }
 0x273   :  { %v711_v10 = vrot.slane %v6869_v50, %v710_v2 }
 0x274   :  { %6201 = vmatpush3.bf16.msra.mxu0 %v6449_v13  ;;  %v6478_v13 = vld [vmem:[%s7379_s3 + $0x1a0] sm:$0xff]  }
 0x275   :  { %6223 = vmatpush3.bf16.msra.mxu1 %v6450_v15  ;;  %6202 = vmatprep.subr.bf16.mxu0 %v6451_v17  ;;  %v719_v15 = vrot.slane %v6869_v50, %v718_v12  ;;  %v6480_v17 = vld [vmem:[%s7379_s3 + $0x1e8] sm:$0xff]   ;;  %v6483_v50 = vld [vmem:[%s7379_s3 + $0x170] sm:$0xff]  }
 0x276   :  { %6224 = vmatprep.subr.bf16.mxu1 %v6452_v19  ;;  %v6370_v19 = vadd.f32 %v6857_v37, %v711_v10  ;;  %v6485_v37 = vld [vmem:[%s7379_s3 + $0x130] sm:$0xff]  }
 0x277   :  { %v6372_v22 = vadd.f32 %v6859_v42, %v719_v15  ;;  %v6487_v42 = vld [vmem:[%s7379_s3 + $0x178] sm:$0xff]  }
 0x278   :  { %6203 = vmatpush3.bf16.msra.mxu0 %v6453_v4  ;;  %v6484_v4 = vld [vmem:[%s7379_s3 + $0x1f0] sm:$0xff]   ;;  %v4021_v23 = vmax.f32 %v6370_v19, 0.0 }
 0x279   :  { %6225 = vmatpush3.bf16.msra.mxu1 %v6454_v5  ;;  %6204 = vmatprep.subr.bf16.mxu0 %v6455_v43  ;;  %v6486_v5 = vld [vmem:[%s7379_s3 + $0x1b0] sm:$0xff]   ;;  %v4023_v43 = vmax.f32 %v6372_v22, 0.0 }
 0x27a   :  { %6226 = vmatprep.subr.bf16.mxu1 %v6456_v46  ;;  %v6489_v46 = vld [vmem:[%s7379_s3 + $0x138] sm:$0xff]   ;;  %v4129_v25 = vmul.f32 %v6992_v20, %v4021_v23  ;;  %v6493_v20 = vld [vmem:[%s7379_s3 + $0x200] sm:$0xff]  }
 0x27b   :  { %v4131_v27 = vmul.f32 %v6996_v21, %v4023_v43  ;;  %v6495_v21 = vld [vmem:[%s7379_s3 + $0x248] sm:$0xff]  }
 0x27c   :  { %6205 = vmatpush3.bf16.msra.mxu0 %v6457_v28  ;;  %v6492_v28 = vld [vmem:[%s7379_s3 + $0x2c0] sm:$0xff]   ;;  %v4145_v29 = vpack.c.bf16 %v4129_v25, %v4129_v25 }
 0x27d   :  { %6227 = vmatpush3.bf16.msra.mxu1 %v6458_v31  ;;  %6234 = vmatprep.subr.bf16.mxu0 %v6459_v32  ;;  %v6494_v31 = vld [vmem:[%s7379_s3 + $0x280] sm:$0xff]   ;;  %v4147_v32 = vpack.c.bf16 %v4131_v27, %v4131_v27  ;;  %v6521_v27 = vld [vmem:[%s7379_s3 + $0x2f8] sm:$0xff]  }
 0x27e   :  { %6256 = vmatprep.subr.bf16.mxu1 %v6460_v34  ;;  %v6497_v34 = vld [vmem:[%s7379_s3 + $0x208] sm:$0xff]  }
 0x27f   :  { %5221 = vmatmul.mubr.bf16.vlgmr.msra.gmra.mrb[16].mxu0 %v4141_v38  ;;  %v6501_v38 = vld [vmem:[%s7379_s3 + $0x210] sm:$0xff]  }
 0x280   :  { %5261 = vmatmul.mubr.bf16.vlgmr.msra.gmra.mrb[16].mxu1 %v4143_v16  ;;  %6235 = vmatpush3.bf16.msra.mxu0 %v6461_v11  ;;  %v6500_v11 = vld [vmem:[%s7379_s3 + $0x2d0] sm:$0xff]   ;;  %v6503_v16 = vld [vmem:[%s7379_s3 + $0x258] sm:$0xff]  }
 0x281   :  { %5300 = vmatprep.mubr.bf16.mxu0 %v4146_v56  ;;  %6257 = vmatpush3.bf16.msra.mxu1 %v6462_v39  ;;  %v6502_v39 = vld [vmem:[%s7379_s3 + $0x290] sm:$0xff]   ;;  %v6505_v56 = vld [vmem:[%s7379_s3 + $0x218] sm:$0xff]  }
 0x282   :  { %5340 = vmatprep.mubr.bf16.mxu1 %v4148_v45  ;;  %6236 = vmatprep.subr.bf16.mxu0 %v6463_v40  ;;  %v6504_v40 = vld [vmem:[%s7379_s3 + $0x2d8] sm:$0xff]   ;;  %v6507_v45 = vld [vmem:[%s7379_s3 + $0x260] sm:$0xff]  }
 0x283   :  { %6258 = vmatprep.subr.bf16.mxu1 %v6464_v44  ;;  %v6506_v44 = vld [vmem:[%s7379_s3 + $0x298] sm:$0xff]  }
 0x284   :  { %6237 = vmatpush3.bf16.msra.mxu0 %v6465_v48  ;;  %v6508_v48 = vld [vmem:[%s7379_s3 + $0x2e0] sm:$0xff]  }
 0x285   :  { %6259 = vmatpush3.bf16.msra.mxu1 %v6466_v49  ;;  %6238 = vmatprep.subr.bf16.mxu0 %v6467_v52  ;;  %v4035_v49 = vld [vmem:[#allocation10 + $0x10] sm:$0xff] }
 0x286   :  { %6260 = vmatprep.subr.bf16.mxu1 %v6468_v54  ;;  %v6509_v52 = vld [vmem:[%s7379_s3 + $0x220] sm:$0xff]   ;;  %v7188_v54 = vld [vmem:[#allocation7 + $0x8] sm:$0xff] }
 0x288   :  { %6239 = vmatpush3.bf16.msra.mxu0 %v6469_v55  ;;  %v6510_v55 = vld [vmem:[%s7379_s3 + $0x2a0] sm:$0xff]  }
 0x289   :  { %6261 = vmatpush3.bf16.msra.mxu1 %v6470_v58  ;;  %6240 = vmatprep.subr.bf16.mxu0 %v6471_v62  ;;  %v4075_v58 = vcombine.high %v4035_v49, %v4035_v49  ;;  %v6512_v62 = vld [vmem:[%s7379_s3 + $0x268] sm:$0xff]  }
 0x28a   :  { %6262 = vmatprep.subr.bf16.mxu1 %v6472_v63  ;;  %v6513_v63 = vld [vmem:[%s7379_s3 + $0x2e8] sm:$0xff]  }
 0x28b   :  { %v4089_v10 = vrot.slane %v4075_v58, %v6873_v60  ;;  %v6535_v58 = vld [vmem:[%s7379_s3 + $0x390] sm:$0xff]  }
 0x28c   :  { %6241 = vmatpush3.bf16.msra.mxu0 %v6473_v1  ;;  %v727_v1 = vrot.slane %v7188_v54, %v694_v53  ;;  %v739_v53 = vrot.slane %v7188_v54, %v706_v51 }
 0x28d   :  { %6263 = vmatpush3.bf16.msra.mxu1 %v6474_v3  ;;  %6242 = vmatprep.subr.bf16.mxu0 %v6475_v6  ;;  %v4082_v3 = vrot.slane %v4035_v49, %v6873_v60  ;;  %v735_v6 = vrot.slane %v7188_v54, %v702_v57  ;;  %v6515_v57 = vld [vmem:[%s7379_s3 + $0x2a8] sm:$0xff]   ;;  %v6532_v49 = vld [vmem:[%s7379_s3 + $0x350] sm:$0xff]  }
 0x28e   :  { %6264 = vmatprep.subr.bf16.mxu1 %v6476_v7  ;;  %v731_v7 = vrot.slane %v7188_v54, %v698_v47  ;;  %v6516_v47 = vld [vmem:[%s7379_s3 + $0x270] sm:$0xff]  }
 0x290   :  { %6243 = vmatpush3.bf16.msra.mxu0 %v6477_v9  ;;  %v6514_v9 = vld [vmem:[%s7379_s3 + $0x228] sm:$0xff]  }
 0x291   :  { %6265 = vmatpush3.bf16.msra.mxu1 %v6478_v13  ;;  %6244 = vmatprep.subr.bf16.mxu0 %v6479_v14  ;;  %v6517_v14 = vld [vmem:[%s7379_s3 + $0x2f0] sm:$0xff]  }
 0x292   :  { %6266 = vmatprep.subr.bf16.mxu1 %v6480_v17 }
 0x294   :  { %6245 = vmatpush3.bf16.msra.mxu0 %v6481_v18 }
 0x295   :  { %6267 = vmatpush3.bf16.msra.mxu1 %v6482_v0  ;;  %6246 = vmatprep.subr.bf16.mxu0 %v6483_v50  ;;  %v4090_v0 = vcombine.high %v4082_v3, %v4082_v3 }
 0x296   :  { %6268 = vmatprep.subr.bf16.mxu1 %v6484_v4  ;;  %v6518_v4 = vld [vmem:[%s7379_s3 + $0x230] sm:$0xff]  }
 0x298   :  { %6247 = vmatpush3.bf16.msra.mxu0 %v6485_v37 }
 0x299   :  { %6269 = vmatpush3.bf16.msra.mxu1 %v6486_v5  ;;  %6248 = vmatprep.subr.bf16.mxu0 %v6487_v42  ;;  %v4091_v5 = vcombine.high %v4089_v10, %v4089_v10 }
 0x29a   :  { %6270 = vmatprep.subr.bf16.mxu1 %v6488_v24  ;;  %v6519_v24 = vld [vmem:[%s7379_s3 + $0x2b0] sm:$0xff]  }
 0x29c   :  { %6249 = vmatpush3.bf16.msra.mxu0 %v6489_v46  ;;  %v6520_v46 = vld [vmem:[%s7379_s3 + $0x278] sm:$0xff]  }
 0x29d   :  { %6271 = vmatpush3.bf16.msra.mxu1 %v6490_v8  ;;  %6278 = vmatprep.subr.bf16.mxu0 %v6491_v26 }
 0x29e   :  { %6300 = vmatprep.subr.bf16.mxu1 %v6492_v28 }
 0x29f   :  { %5301 = vmatmul.mubr.bf16.vlgmr.msra.gmra.mrb[20].mxu0 %v4145_v29  ;;  %v6522_v29 = vld [vmem:[%s7379_s3 + $0x238] sm:$0xff]  }
 0x2a0   :  { %5341 = vmatmul.mubr.bf16.vlgmr.msra.gmra.mrb[20].mxu1 %v4147_v32  ;;  %6279 = vmatpush3.bf16.msra.mxu0 %v6493_v20  ;;  %v6523_v32 = vld [vmem:[%s7379_s3 + $0x2b8] sm:$0xff]  }
 0x2a1   :  { %6301 = vmatpush3.bf16.msra.mxu1 %v6494_v31  ;;  %6280 = vmatprep.subr.bf16.mxu0 %v6495_v21 }
 0x2a2   :  { %6302 = vmatprep.subr.bf16.mxu1 %v6496_v33 }
 0x2a4   :  { %6281 = vmatpush3.bf16.msra.mxu0 %v6497_v34 }
 0x2a5   :  { %6303 = vmatpush3.bf16.msra.mxu1 %v6498_v35  ;;  %6282 = vmatprep.subr.bf16.mxu0 %v6499_v36  ;;  %v6524_v35 = vld [vmem:[%s7379_s3 + $0x340] sm:$0xff]  }
 0x2a6   :  { %6304 = vmatprep.subr.bf16.mxu1 %v6500_v11  ;;  %v6525_v36 = vld [vmem:[%s7379_s3 + $0x3c0] sm:$0xff]  }
 0x2a8   :  { %6283 = vmatpush3.bf16.msra.mxu0 %v6501_v38  ;;  %v6526_v38 = vld [vmem:[%s7379_s3 + $0x300] sm:$0xff]  }
 0x2a9   :  { %6305 = vmatpush3.bf16.msra.mxu1 %v6502_v39  ;;  %6284 = vmatprep.subr.bf16.mxu0 %v6503_v16  ;;  %v6527_v16 = vld [vmem:[%s7379_s3 + $0x380] sm:$0xff]  }
 0x2aa   :  { %6306 = vmatprep.subr.bf16.mxu1 %v6504_v40  ;;  %v6528_v40 = vld [vmem:[%s7379_s3 + $0x348] sm:$0xff]  }
 0x2ac   :  { %6285 = vmatpush3.bf16.msra.mxu0 %v6505_v56 }
 0x2ad   :  { %6307 = vmatpush3.bf16.msra.mxu1 %v6506_v44  ;;  %6286 = vmatprep.subr.bf16.mxu0 %v6507_v45  ;;  %v6529_v44 = vld [vmem:[%s7379_s3 + $0x3c8] sm:$0xff]  }
 0x2ae   :  { %6308 = vmatprep.subr.bf16.mxu1 %v6508_v48  ;;  %v6530_v45 = vld [vmem:[%s7379_s3 + $0x308] sm:$0xff]  }
 0x2af   :  { %v6531_v48 = vld [vmem:[%s7379_s3 + $0x388] sm:$0xff]  }
 0x2b0   :  { %6287 = vmatpush3.bf16.msra.mxu0 %v6509_v52  ;;  %v6533_v52 = vld [vmem:[%s7379_s3 + $0x3d0] sm:$0xff]  }
 0x2b1   :  { %6309 = vmatpush3.bf16.msra.mxu1 %v6510_v55  ;;  %6288 = vmatprep.subr.bf16.mxu0 %v6512_v62  ;;  %v6534_v55 = vld [vmem:[%s7379_s3 + $0x310] sm:$0xff]   ;;  %v6536_v62 = vld [vmem:[%s7379_s3 + $0x358] sm:$0xff]  }
 0x2b2   :  { %v3764_v13 = vpop.f32.mrb[8].mxu0  ;;  %6310 = vmatprep.subr.bf16.mxu1 %v6513_v63  ;;  %v3846_v17 = vpop.f32.mrb[8].mxu1  ;;  %v6537_v63 = vld [vmem:[%s7379_s3 + $0x3d8] sm:$0xff]  }
 0x2b3   :  { %v6374_v15 = vadd.f32 %v3764_v13, %v727_v1  ;;  %v3766_v18 = vpop.f32.mrb[9].mxu0  ;;  %v6376_v19 = vadd.f32 %v3846_v17, %v735_v6  ;;  %v3848_v50 = vpop.f32.mrb[9].mxu1  ;;  %v6538_v1 = vld [vmem:[%s7379_s3 + $0x318] sm:$0xff]   ;;  %v6540_v6 = vld [vmem:[%s7379_s3 + $0x360] sm:$0xff]   ;;  %v6548_v13 = vld [vmem:[%s7379_s3 + $0x3a8] sm:$0xff]  }
 0x2b4   :  { %v6375_v51 = vadd.f32 %v3766_v18, %v731_v7  ;;  %v3768_v22 = vpop.f32.mrb[10].mxu0  ;;  %6289 = vmatpush3.bf16.msra.mxu0 %v6514_v9  ;;  %v6377_v23 = vadd.f32 %v3848_v50, %v739_v53  ;;  %v3850_v42 = vpop.f32.mrb[10].mxu1  ;;  %v6541_v7 = vld [vmem:[%s7379_s3 + $0x3e0] sm:$0xff]   ;;  %v6544_v53 = vld [vmem:[%s7379_s3 + $0x368] sm:$0xff]   ;;  %v6551_v17 = vld [vmem:[%s7379_s3 + $0x330] sm:$0xff]  }
 0x2b5   :  { %v4025_v37 = vmax.f32 %v6374_v15, 0.0  ;;  %6311 = vmatpush3.bf16.msra.mxu1 %v6515_v57  ;;  %v3769_v43 = vpop.f32.mrb[11].mxu0  ;;  %6290 = vmatprep.subr.bf16.mxu0 %v6516_v47  ;;  %v4027_v25 = vmax.f32 %v6376_v19, 0.0  ;;  %v3851_v26 = vpop.f32.mrb[11].mxu1  ;;  %v6542_v9 = vld [vmem:[%s7379_s3 + $0x320] sm:$0xff]   ;;  %v6545_v57 = vld [vmem:[%s7379_s3 + $0x3e8] sm:$0xff]   ;;  %v747_v42 = vrot.slane %v7188_v54, %v714_v59 }
 0x2b6   :  { %v4026_v8 = vmax.f32 %v6375_v51, 0.0  ;;  %6312 = vmatprep.subr.bf16.mxu1 %v6517_v14  ;;  %v4028_v28 = vmax.f32 %v6377_v23, 0.0  ;;  %v6547_v47 = vld [vmem:[%s7379_s3 + $0x328] sm:$0xff]   ;;  %v6549_v14 = vld [vmem:[%s7379_s3 + $0x370] sm:$0xff]   ;;  %v6553_v19 = vld [vmem:[%s7379_s3 + $0x378] sm:$0xff]  }
 0x2b7   :  { %v4133_v31 = vmul.f32 %v4082_v3, %v4025_v37  ;;  %v4135_v33 = vmul.f32 %v4089_v10, %v4027_v25  ;;  %v6539_v3 = vld [vmem:[%s7379_s3 + $0x398] sm:$0xff]   ;;  %v6543_v10 = vld [vmem:[%s7379_s3 + $0x3a0] sm:$0xff]   ;;  %v6550_v15 = vld [vmem:[%s7379_s3 + $0x3f0] sm:$0xff]   ;;  %v743_v37 = vrot.slane %v7188_v54, %v710_v2 }
 0x2b8   :  { %v4134_v20 = vmul.f32 %v4090_v0, %v4026_v8  ;;  %6291 = vmatpush3.bf16.msra.mxu0 %v6518_v4  ;;  %v4136_v21 = vmul.f32 %v4091_v5, %v4028_v28  ;;  %v6552_v18 = vld [vmem:[%s7379_s3 + $0x3b0] sm:$0xff]   ;;  %v6554_v51 = vld [vmem:[%s7379_s3 + $0x3f8] sm:$0xff]   ;;  %v751_v5 = vrot.slane %v7188_v54, %v718_v12 }
 0x2b9   :  { %6313 = vmatpush3.bf16.msra.mxu1 %v6519_v24  ;;  %6292 = vmatprep.subr.bf16.mxu0 %v6520_v46  ;;  %v4149_v39 = vpack.c.bf16 %v4133_v31, %v4133_v31  ;;  %v4151_v56 = vpack.c.bf16 %v4135_v33, %v4135_v33  ;;  %v6555_v0 = vld [vmem:[%s7379_s3 + $0x338] sm:$0xff]   ;;  %v4036_v22 = vld [vmem:[#allocation10 + $0x18] sm:$0xff]  ;;  %v755_v24 = vrot.slane %v7188_v54, %v722_v61 }
 0x2ba   :  { %v4150_v34 = vpack.c.bf16 %v4134_v20, %v4134_v20  ;;  %6314 = vmatprep.subr.bf16.mxu1 %v6521_v27  ;;  %v4152_v11 = vpack.c.bf16 %v4136_v21, %v4136_v21  ;;  %v6556_v50 = vld [vmem:[%s7379_s3 + $0x3b8] sm:$0xff]   ;;  %v4092_v4 = vcombine.high %v4036_v22, %v4036_v22  ;;  %v4099_v23 = vrot.slane %v4036_v22, %v6873_v60  ;;  %s6711_s3 = smov [#allocation11]  }
 0x2bb   :  { %s5538_s29 = sshll.u32 %s6711_s3, 4  ;;  %s5539_s29 = int_to_ptr.vmem [resolvable:$true] %s5538_s29 }
 0x2bc   :  { %6293 = vmatpush3.bf16.msra.mxu0 %v6522_v29  ;;  %5380 = vmatprep.mubr.bf16.mxu0 %v4150_v34  ;;  %v4106_v43 = vrot.slane %v4092_v4, %v6873_v60  ;;  %v4107_v28 = vcombine.high %v4099_v23, %v4099_v23  ;;  %s6671_s30 = scalar_lea.vmem %s5539_s29, 32  ;;  %p6676_p13 = scmp.lt.s32.totalorder %s5539_s29, %s5539_s29 }
 0x2bd   :  { %6315 = vmatpush3.bf16.msra.mxu1 %v6523_v32  ;;  %5420 = vmatprep.mubr.bf16.mxu1 %v4152_v11  ;;  %p6672_p12 = scmp.ne.s32.totalorder %s5539_s29, %s6671_s30  ;;  %p6677_p0 = scmp.lt.s32.totalorder %s6671_s30, %s6671_s30 }
 0x2be   :  { %6322 = vmatprep.subr.bf16.mxu0 %v6524_v35  ;;  %6344 = vmatprep.subr.bf16.mxu1 %v6525_v36  ;;  %v4108_v21 = vcombine.high %v4106_v43, %v4106_v43 }
 0x2bf   :  { %5381 = vmatmul.mubr.bf16.vlgmr.msra.gmra.mrb[24].mxu0 %v4149_v39  ;;  %p6678_p1 = por %p6677_p0, %p6676_p13 }
 0x2c0   :  { %5421 = vmatmul.mubr.bf16.vlgmr.msra.gmra.mrb[24].mxu1 %v4151_v56  ;;  %6323 = vmatpush3.bf16.msra.mxu0 %v6526_v38 }
 0x2c1   :  { %6345 = vmatpush3.bf16.msra.mxu1 %v6527_v16  ;;  %6324 = vmatprep.subr.bf16.mxu0 %v6528_v40  ;;  %p6679_p2 = pnand %p6678_p1, %p6672_p12 }
 0x2c2   :  { %6346 = vmatprep.subr.bf16.mxu1 %v6529_v44  ;;  %v6061_v44 = vld [vmem:[#allocation8] ss:$0 sm:$0xff] }
 0x2c4   :  { %6325 = vmatpush3.bf16.msra.mxu0 %v6530_v45 }
 0x2c5   :  { %6347 = vmatpush3.bf16.msra.mxu1 %v6531_v48  ;;  %6326 = vmatprep.subr.bf16.mxu0 %v6532_v49 }
 0x2c6   :  { %6348 = vmatprep.subr.bf16.mxu1 %v6533_v52 }
 0x2c8   :  { %6327 = vmatpush3.bf16.msra.mxu0 %v6534_v55 }
 0x2c9   :  { %6349 = vmatpush3.bf16.msra.mxu1 %v6535_v58  ;;  %6328 = vmatprep.subr.bf16.mxu0 %v6536_v62 }
 0x2ca   :  { %6350 = vmatprep.subr.bf16.mxu1 %v6537_v63 }
 0x2cc   :  { %6329 = vmatpush3.bf16.msra.mxu0 %v6538_v1 }
 0x2cd   :  { %6351 = vmatpush3.bf16.msra.mxu1 %v6539_v3  ;;  %6330 = vmatprep.subr.bf16.mxu0 %v6540_v6 }
 0x2ce   :  { %6352 = vmatprep.subr.bf16.mxu1 %v6541_v7 }
 0x2d0   :  { %6331 = vmatpush3.bf16.msra.mxu0 %v6542_v9 }
 0x2d1   :  { %6353 = vmatpush3.bf16.msra.mxu1 %v6543_v10  ;;  %6332 = vmatprep.subr.bf16.mxu0 %v6544_v53 }
 0x2d2   :  { %6354 = vmatprep.subr.bf16.mxu1 %v6545_v57 }
 0x2d4   :  { %6333 = vmatpush3.bf16.msra.mxu0 %v6547_v47 }
 0x2d5   :  { %6355 = vmatpush3.bf16.msra.mxu1 %v6548_v13  ;;  %6334 = vmatprep.subr.bf16.mxu0 %v6549_v14 }
 0x2d6   :  { %6356 = vmatprep.subr.bf16.mxu1 %v6550_v15 }
 0x2d8   :  { %6335 = vmatpush3.bf16.msra.mxu0 %v6551_v17 }
 0x2d9   :  { %6357 = vmatpush3.bf16.msra.mxu1 %v6552_v18  ;;  %6336 = vmatprep.subr.bf16.mxu0 %v6553_v19 }
 0x2da   :  { %6358 = vmatprep.subr.bf16.mxu1 %v6554_v51 }
 0x2dc   :  { %6337 = vmatpush3.bf16.msra.mxu0 %v6555_v0 }
 0x2dd   :  { %6359 = vmatpush3.bf16.msra.mxu1 %v6556_v50 }
 0x332   :  { %v3928_v46 = vpop.f32.mrb[12].mxu0  ;;  %v4010_v8 = vpop.f32.mrb[12].mxu1 }
 0x333   :  { %v6378_v25 = vadd.f32 %v3928_v46, %v743_v37  ;;  %v3930_v2 = vpop.f32.mrb[13].mxu0  ;;  %v6380_v26 = vadd.f32 %v4010_v8, %v751_v5  ;;  %v4012_v20 = vpop.f32.mrb[13].mxu1 }
 0x334   :  { %v6379_v27 = vadd.f32 %v3930_v2, %v747_v42  ;;  %v3932_v29 = vpop.f32.mrb[14].mxu0  ;;  %v6381_v31 = vadd.f32 %v4012_v20, %v755_v24  ;;  %v4014_v32 = vpop.f32.mrb[14].mxu1 }
 0x335   :  { %v4029_v12 = vmax.f32 %v6378_v25, 0.0  ;;  %v3933_v59 = vpop.f32.mrb[15].mxu0  ;;  %v4031_v33 = vmax.f32 %v6380_v26, 0.0  ;;  %v4015_v34 = vpop.f32.mrb[15].mxu1  ;;  %v5509_v25 = vand.u32 127, %v692_v41 }
 0x336   :  { %v4030_v60 = vmax.f32 %v6379_v27, 0.0  ;;  %v4032_v35 = vmax.f32 %v6381_v31, 0.0 }
 0x337   :  { %v4137_v30 = vmul.f32 %v4099_v23, %v4029_v12  ;;  %v4139_v61 = vmul.f32 %v4106_v43, %v4031_v33  ;;  %vm5510_vm1 = vcmp.ge.s32.totalorder %v5509_v25, 3  ;;  %vm5511_vm2 = vcmp.lt.s32.totalorder %v5509_v25, 7 }
 0x338   :  { %v4138_v54 = vmul.f32 %v4107_v28, %v4030_v60  ;;  %v4140_v36 = vmul.f32 %v4108_v21, %v4032_v35  ;;  %vm7354_vm3 = vmand %vm5510_vm1, %vm5511_vm2 }
 0x339   :  { %v4153_v38 = vpack.c.bf16 %v4137_v30, %v4137_v30  ;;  %v4155_v16 = vpack.c.bf16 %v4139_v61, %v4139_v61 }
 0x33a   :  { %v4154_v11 = vpack.c.bf16 %v4138_v54, %v4138_v54  ;;  %v4156_v39 = vpack.c.bf16 %v4140_v36, %v4140_v36 }
 0x33c   :  { %5460 = vmatprep.mubr.bf16.mxu0 %v4154_v11  ;;  %5500 = vmatprep.mubr.bf16.mxu1 %v4156_v39 }
 0x33d   :  { %5461 = vmatmul.mubr.bf16.vlgmr.msra.gmra.mrb[28].mxu0 %v4153_v38  ;;  %5501 = vmatmul.mubr.bf16.vlgmr.msra.gmra.mrb[28].mxu1 %v4155_v16 }
 0x352   :  { %v6206_v40 = vpop.f32.mrb[16].mxu0 }
 0x353   :  { %v6228_v56 = vpop.f32.mrb[16].mxu1  ;;  %v6207_v45 = vpop.f32.mrb[17].mxu0 }
 0x354   :  { %v6208_v48 = vadd.f32 %v6207_v45, %v6206_v40  ;;  %v6229_v49 = vpop.f32.mrb[17].mxu1  ;;  %v6209_v52 = vpop.f32.mrb[18].mxu0 }
 0x355   :  { %v6230_v55 = vadd.f32 %v6229_v49, %v6228_v56  ;;  %v6231_v58 = vpop.f32.mrb[18].mxu1  ;;  %v6210_v62 = vpop.f32.mrb[19].mxu0 }
 0x356   :  { %v5223_v63 = vadd.f32 %v6208_v48, %v6061_v44  ;;  %v6232_v1 = vpop.f32.mrb[19].mxu1 }
 0x358   :  { %v5263_v3 = vadd.f32 %v6230_v55, %v5223_v63 }
 0x372   :  { %v6250_v6 = vpop.f32.mrb[20].mxu0 }
 0x373   :  { %v6272_v7 = vpop.f32.mrb[20].mxu1  ;;  %v6251_v9 = vpop.f32.mrb[21].mxu0 }
 0x374   :  { %v6252_v10 = vadd.f32 %v6251_v9, %v6250_v6  ;;  %v6273_v53 = vpop.f32.mrb[21].mxu1  ;;  %v6253_v57 = vpop.f32.mrb[22].mxu0 }
 0x375   :  { %v6274_v47 = vadd.f32 %v6273_v53, %v6272_v7  ;;  %v6275_v13 = vpop.f32.mrb[22].mxu1  ;;  %v6254_v14 = vpop.f32.mrb[23].mxu0 }
 0x376   :  { %v5303_v15 = vadd.f32 %v6252_v10, %v5263_v3  ;;  %v6276_v17 = vpop.f32.mrb[23].mxu1 }
 0x378   :  { %v5343_v18 = vadd.f32 %v6274_v47, %v5303_v15 }
 0x392   :  { %v6294_v19 = vpop.f32.mrb[24].mxu0 }
 0x393   :  { %v6316_v51 = vpop.f32.mrb[24].mxu1  ;;  %v6295_v0 = vpop.f32.mrb[25].mxu0 }
 0x394   :  { %v6296_v50 = vadd.f32 %v6295_v0, %v6294_v19  ;;  %v6317_v22 = vpop.f32.mrb[25].mxu1  ;;  %v6297_v4 = vpop.f32.mrb[26].mxu0 }
 0x395   :  { %v6318_v37 = vadd.f32 %v6317_v22, %v6316_v51  ;;  %v6319_v23 = vpop.f32.mrb[26].mxu1  ;;  %v6298_v5 = vpop.f32.mrb[27].mxu0 }
 0x396   :  { %v5383_v42 = vadd.f32 %v6296_v50, %v5343_v18  ;;  %v6320_v43 = vpop.f32.mrb[27].mxu1 }
 0x398   :  { %v5423_v24 = vadd.f32 %v6318_v37, %v5383_v42 }
 0x410   :  { %v6338_v46 = vpop.f32.mrb[28].mxu0  ;;  %v6360_v8 = vpop.f32.mrb[28].mxu1 }
 0x411   :  { %v6339_v2 = vpop.f32.mrb[29].mxu0  ;;  %v6361_v27 = vpop.f32.mrb[29].mxu1 }
 0x412   :  { %v6340_v26 = vadd.f32 %v6339_v2, %v6338_v46  ;;  %v6341_v28 = vpop.f32.mrb[30].mxu0  ;;  %v6362_v20 = vadd.f32 %v6361_v27, %v6360_v8  ;;  %v6363_v29 = vpop.f32.mrb[30].mxu1 }
 0x413   :  { %v6342_v12 = vpop.f32.mrb[31].mxu0  ;;  %v6364_v21 = vpop.f32.mrb[31].mxu1 }
 0x414   :  { %v5463_v31 = vadd.f32 %v6340_v26, %v5423_v24 }
 0x416   :  { %v5503_v32 = vadd.f32 %v6362_v20, %v5463_v31 }
 0x418   :  { %v5513_v33 = vmul.f32 %v5503_v32, %v5503_v32 }
 0x41a   :  { %v5514_v41 = vsel %vm7354_vm3, %v5513_v33, 0.0 }
 0x41b   :  { %v5516_v60 = vsel %vm5515_vm4, %v5514_v41, 0.0 }
 0x41c   :  { %5517 = vadd.xlane.f32.xlu0 %v5516_v60 }
 0x4a9   :  { %v5518_v34 = vpop.xlane.xlu0 %5517 }
 0x4aa   :  { %6557 = vrsqrt.f32 %v5518_v34  ;;  %vm5521_vm5 = vcmp.eq.f32.partialorder %v5518_v34, inf  ;;  %v5524_v61 = vand.u32 2147483648, %v5518_v34  ;;  %vm5523_vm6 = vcmp.eq.f32.partialorder %v5518_v34, 0.0 }
 0x4b4   :  { %v6558_v30 = vpop.eup %6557 }
 0x4b5   :  { %v5520_v35 = vmul.f32 %v6558_v30, %v5518_v34 }
 0x4b7   :  { %v5522_v54 = vsel %vm5521_vm5, %v5518_v34, %v5520_v35 }
 0x4b8   :  { %v5525_v36 = vsel %vm5523_vm6, %v5524_v61, %v5522_v54 }
 0x4b9   :  { %v5526_v11 = vmax.f32 %v5525_v36, 1e-12 }
 0x4bb   :  { %6559 = vrcp.f32 %v5526_v11 }
 0x4c5   :  { %v6560_v38 = vpop.eup %6559 }
 0x4c6   :  { %v5529_v39 = vmul.f32 %v6560_v38, %v5503_v32 }
 0x4c8   :  { %v5530_v16 = vsel %vm7354_vm3, %v5529_v39, %v5503_v32 }
 0x4c9   :  { %5531 = vst.msk [vmem:[#allocation11] sm:$0x3] %vm5515_vm4, %v5530_v16 }
 0x4ca   :  { %6682 = shalt.err (!%p6679_p2)
}
 0x4cb   :  { %s6683_s8 = scalar_lea.hbm %s7382_s6, 32 }
 0x4cc   :  { %p6684_p3 = scmp.ne.s32.totalorder %s7382_s6, %s6683_s8  ;;  %p6687_p4 = scmp.lt.u32.totalorder %s6683_s8, %s7382_s6 }
 0x4ce   :  { %p6689_p5 = pnand %p6687_p4, %p6684_p3 }
 0x4d0   :  { %6692 = shalt.err (!%p6689_p5)
}
 0x4d1   :  { %5541 = dma.vmem_to_hbm [thread:$0]  %s5539_s29, 32, %s7382_s6, [#allocation4]  }
 0x4d2   :  { %6699 = dma.done.wait [#allocation4], 32  }
 0x4d3   :  { %6700 = vsyncadd [#allocation4], 4294967264 }
 0x4d4   :  { %5545 = vsyncpa [#allocation3], 1 }
 0x4d5   :  { %5546 = vsyncpa [#allocation6], 1 }
 0x4d6   :  { %5547 = vsyncpa [#allocation9], 1 }
 0x4d7   :  { %5548 = vsyncpa [#allocation4], 1 }

</bundles_post_ra>
